<compile_context>
chip_gen: v5e
topology: v5e:2x2
jax: 0.10.0
libtpu: 0.0.40
codegen_flags: <defaults>
</compile_context>

<pallas_src>
import functools
import math

import jax
import jax.numpy as jnp
from jax.experimental import pallas as pl
from jax.experimental.pallas import tpu as pltpu

LEAKY_SLOPE = 0.2
BN_EPS = 0.8  # matches nn.BatchNorm1d(out_feat, 0.8) in the reference code


def _generator_kernel(labels_ref, noise_ref,
                      ew0_ref, w0b_ref, b0_ref,
                      w1_ref, g1_ref, be1_ref,
                      w2_ref, g2_ref, be2_ref,
                      w3_hbm, g3_ref, be3_ref,
                      w4_hbm, b4_ref,
                      out_ref,
                      w3_vmem, w4_vmem, dma_sem):
    """One fused pass: embedding -> 4x (Linear[+BN]+LeakyReLU) -> Linear+Tanh."""
    B = labels_ref.shape[0]
    num_classes = ew0_ref.shape[0]

    # ---- manual prefetch of the two big weights (w3, w4): start the
    # HBM->VMEM DMAs immediately so they overlap the layer 0..2 compute. ----
    cp_w3 = pltpu.make_async_copy(w3_hbm, w3_vmem, dma_sem.at[0])
    cp_w4 = pltpu.make_async_copy(w4_hbm, w4_vmem, dma_sem.at[1])
    cp_w3.start()
    cp_w4.start()

    def dot_w(x, w_ref):
        # bf16 MXU path with f32 accumulation (weights stored bf16).
        return jnp.dot(x.astype(w_ref.dtype), w_ref[...],
                       preferred_element_type=jnp.float32)

    def leaky(y):
        return jnp.maximum(y, LEAKY_SLOPE * y)

    def batchnorm(y, g_ref, b_ref):
        # Training-mode BN with biased batch stats, one pass + folded affine.
        mean = jnp.mean(y, axis=0, keepdims=True)
        mean_sq = jnp.mean(y * y, axis=0, keepdims=True)
        var = mean_sq - mean * mean
        scale = g_ref[...] * jax.lax.rsqrt(var + BN_EPS)
        shift = b_ref[...] - mean * scale
        return y * scale + shift

    # ---- label path: one-hot matmul against the pre-folded (emb @ W0a). ----
    labels = labels_ref[...]                                        # (B, 1) i32
    iota = jax.lax.broadcasted_iota(jnp.int32, (B, num_classes), 1)
    onehot = (iota == labels).astype(jnp.float32)                   # (B, nc)

    # Layer 0: Linear(latent+nc, 128) + LeakyReLU (embedding folded into ew0).
    y = dot_w(onehot, ew0_ref) + dot_w(noise_ref[...], w0b_ref) + b0_ref[...]
    y = leaky(y)
    # Layers 1..2: Linear + BatchNorm1d(eps=0.8, batch stats) + LeakyReLU.
    # (Linear biases dropped: exactly cancelled by training-mode BatchNorm.)
    y = leaky(batchnorm(dot_w(y, w1_ref), g1_ref, be1_ref))
    y = leaky(batchnorm(dot_w(y, w2_ref), g2_ref, be2_ref))
    # Layer 3: wait for its prefetched weight, then Linear + BN + LeakyReLU.
    cp_w3.wait()
    y = leaky(batchnorm(dot_w(y, w3_vmem), g3_ref, be3_ref))
    # Head: Linear(1024, out_dim padded to 128 lanes) + Tanh.
    cp_w4.wait()
    y = jnp.tanh(dot_w(y, w4_vmem) + b4_ref[...])

    out_ref[...] = y.astype(out_ref.dtype)


# ------------------------- parameter construction -------------------------

def init_generator_params(key, latent_dim, num_classes, img_shape,
                          weight_dtype=jnp.bfloat16):
    """Parameter init matching the module's shapes.

    Linear weights are stored as (in_features, out_features) so the kernel can
    do x @ W directly (equivalent to PyTorch's x @ weight.T).  Weights are
    stored in `weight_dtype` (bf16 by default); pass jnp.float32 for an exact
    f32 parity path.
    """
    C, H, W = img_shape
    out_dim = C * H * W
    out_pad = max(128, ((out_dim + 127) // 128) * 128)   # lane-dense head
    dims = [latent_dim + num_classes, 128, 256, 512, 1024, out_dim]

    params = {}
    key, k_emb = jax.random.split(key)
    # nn.Embedding default init: N(0, 1)
    emb = jax.random.normal(k_emb, (num_classes, num_classes), jnp.float32)

    ws, bs = [], []
    for i in range(5):
        fan_in, fan_out = dims[i], dims[i + 1]
        bound = 1.0 / (fan_in ** 0.5)
        key, kw, kb = jax.random.split(key, 3)
        ws.append(jax.random.uniform(kw, (fan_in, fan_out), jnp.float32,
                                     -bound, bound))
        bs.append(jax.random.uniform(kb, (1, fan_out), jnp.float32,
                                     -bound, bound))

    # Layer 0: fold the embedding table into the label half of W0 offline
    # (exact: onehot @ (emb @ W0a) == (onehot @ emb) @ W0a in f32), and keep
    # the noise half separate so no concat / K-padding is ever needed.
    params["ew0"] = jnp.dot(emb, ws[0][:num_classes]).astype(weight_dtype)  # (nc, 128)
    params["w0b"] = ws[0][num_classes:].astype(weight_dtype)                # (latent, 128)
    params["b0"] = bs[0]

    # Layers 1..3 carry BatchNorm1d affine params; their Linear biases are
    # omitted because training-mode BN with batch stats cancels them exactly.
    for i in (1, 2, 3):
        params[f"w{i}"] = ws[i].astype(weight_dtype)
        params[f"g{i}"] = jnp.ones((1, dims[i + 1]), jnp.float32)
        params[f"be{i}"] = jnp.zeros((1, dims[i + 1]), jnp.float32)

    # Head: zero-pad columns so the output slab is a multiple of 128 lanes.
    pad = out_pad - out_dim
    params["w4"] = jnp.pad(ws[4], ((0, 0), (0, pad))).astype(weight_dtype)
    params["b4"] = jnp.pad(bs[4], ((0, 0), (0, pad)))
    return params


# ------------------------------ forward pass ------------------------------

def generator_forward(params, noise, labels, img_shape):
    """noise: (B, latent_dim) f32, labels: (B,) int -> (B, C, H, W) f32."""
    C, H, W = img_shape
    out_dim = C * H * W
    B = noise.shape[0]
    out_pad = params["w4"].shape[1]
    latent_dim = noise.shape[1]
    num_classes = params["ew0"].shape[0]

    labels2d = labels.reshape(B, 1).astype(jnp.int32)
    noise = noise.astype(jnp.float32)

    operands = [
        labels2d, noise,
        params["ew0"], params["w0b"], params["b0"],
        params["w1"], params["g1"], params["be1"],
        params["w2"], params["g2"], params["be2"],
        params["w3"], params["g3"], params["be3"],
        params["w4"], params["b4"],
    ]
    # w3 / w4 stay in HBM and are manually DMA'd in-kernel (overlap w/ compute).
    hbm_idx = {11, 14}

    full = lambda i: (0, 0)          # single grid point; blocks = full arrays
    in_specs = [
        pl.BlockSpec(memory_space=pl.ANY) if idx in hbm_idx
        else pl.BlockSpec(op.shape, full)
        for idx, op in enumerate(operands)
    ]

    scratch_shapes = [
        pltpu.VMEM(params["w3"].shape, params["w3"].dtype),
        pltpu.VMEM(params["w4"].shape, params["w4"].dtype),
        pltpu.SemaphoreType.DMA((2,)),
    ]

    # Advisory cost hint so XLA can overlap this call with surrounding work.
    flops = 2 * B * (num_classes * 128 + latent_dim * 128 + 128 * 256
                     + 256 * 512 + 512 * 1024 + 1024 * out_pad)
    transcendentals = B * out_pad + (256 + 512 + 1024)
    bytes_accessed = (sum(math.prod(op.shape) * op.dtype.itemsize
                          for op in operands)
                      + B * out_pad * 4)

    out = pl.pallas_call(
        _generator_kernel,
        out_shape=jax.ShapeDtypeStruct((B, out_pad), jnp.float32),
        grid=(1,),
        in_specs=in_specs,
        out_specs=pl.BlockSpec((B, out_pad), full),
        scratch_shapes=scratch_shapes,
        compiler_params=pltpu.CompilerParams(
            dimension_semantics=("arbitrary",)),
        cost_estimate=pl.CostEstimate(
            flops=flops,
            transcendentals=transcendentals,
            bytes_accessed=bytes_accessed),
    )(*operands)

    # Slice away the lane padding of the head, then reshape to NCHW.
    return out[:, :out_dim].reshape(B, C, H, W)


if __name__ == "__main__":
    # Small shapes consistent with the module (hidden dims 128..1024 fixed by
    # the architecture; latent/classes/image kept small).
    batch = 8
    latent_dim = 16
    num_classes = 10
    channels, img_size = 1, 8
    img_shape = (channels, img_size, img_size)

    key = jax.random.PRNGKey(0)
    key, k_params, k_noise, k_labels = jax.random.split(key, 4)

    params = init_generator_params(k_params, latent_dim, num_classes, img_shape)
    noise = jax.random.normal(k_noise, (batch, latent_dim), jnp.float32)
    labels = jax.random.randint(k_labels, (batch,), 0, num_classes, jnp.int32)

    fwd = jax.jit(functools.partial(generator_forward, img_shape=img_shape))
    img = jax.block_until_ready(fwd(params, noise, labels))

    assert img.shape == (batch, channels, img_size, img_size), img.shape
    assert bool(jnp.all(jnp.isfinite(img)))
    assert bool(jnp.all(jnp.abs(img) <= 1.0))   # tanh output range
    print("KERNEL_OK")
</pallas_src>

<mosaic_0001>
module attributes {stable_mosaic.version = 11 : i64} {
  func.func @_generator_kernel(%arg0: i32, %arg1: memref<8x1xi32, #tpu.memory_space<vmem>>, %arg2: memref<8x16xf32, #tpu.memory_space<vmem>>, %arg3: memref<10x128xbf16, #tpu.memory_space<vmem>>, %arg4: memref<16x128xbf16, #tpu.memory_space<vmem>>, %arg5: memref<1x128xf32, #tpu.memory_space<vmem>>, %arg6: memref<128x256xbf16, #tpu.memory_space<vmem>>, %arg7: memref<1x256xf32, #tpu.memory_space<vmem>>, %arg8: memref<1x256xf32, #tpu.memory_space<vmem>>, %arg9: memref<256x512xbf16, #tpu.memory_space<vmem>>, %arg10: memref<1x512xf32, #tpu.memory_space<vmem>>, %arg11: memref<1x512xf32, #tpu.memory_space<vmem>>, %arg12: memref<512x1024xbf16, #tpu.memory_space<any>>, %arg13: memref<1x1024xf32, #tpu.memory_space<vmem>>, %arg14: memref<1x1024xf32, #tpu.memory_space<vmem>>, %arg15: memref<1024x128xbf16, #tpu.memory_space<any>>, %arg16: memref<1x128xf32, #tpu.memory_space<vmem>>, %arg17: memref<8x128xf32, #tpu.memory_space<vmem>>, %arg18: memref<512x1024xbf16, #tpu.memory_space<vmem>>, %arg19: memref<1024x128xbf16, #tpu.memory_space<vmem>>, %arg20: memref<2x!tpu.dma_semaphore, #tpu.memory_space<semaphore_mem>>) attributes {dimension_semantics = [#tpu.dimension_semantics<arbitrary>], iteration_bounds = array<i64: 1>, scalar_prefetch = 0 : i64, scratch_operands = 3 : i64, tpu.core_type = #tpu.core_type<tc>, window_params = [{pipeline_mode = #tpu.pipeline_mode<synchronous>, transform_indices = @transform_0, window_bounds = array<i64: 8, 1>}, {pipeline_mode = #tpu.pipeline_mode<synchronous>, transform_indices = @transform_1, window_bounds = array<i64: 8, 16>}, {pipeline_mode = #tpu.pipeline_mode<synchronous>, transform_indices = @transform_2, window_bounds = array<i64: 10, 128>}, {pipeline_mode = #tpu.pipeline_mode<synchronous>, transform_indices = @transform_3, window_bounds = array<i64: 16, 128>}, {pipeline_mode = #tpu.pipeline_mode<synchronous>, transform_indices = @transform_4, window_bounds = array<i64: 1, 128>}, {pipeline_mode = #tpu.pipeline_mode<synchronous>, transform_indices = @transform_5, window_bounds = array<i64: 128, 256>}, {pipeline_mode = #tpu.pipeline_mode<synchronous>, transform_indices = @transform_6, window_bounds = array<i64: 1, 256>}, {pipeline_mode = #tpu.pipeline_mode<synchronous>, transform_indices = @transform_7, window_bounds = array<i64: 1, 256>}, {pipeline_mode = #tpu.pipeline_mode<synchronous>, transform_indices = @transform_8, window_bounds = array<i64: 256, 512>}, {pipeline_mode = #tpu.pipeline_mode<synchronous>, transform_indices = @transform_9, window_bounds = array<i64: 1, 512>}, {pipeline_mode = #tpu.pipeline_mode<synchronous>, transform_indices = @transform_10, window_bounds = array<i64: 1, 512>}, {}, {pipeline_mode = #tpu.pipeline_mode<synchronous>, transform_indices = @transform_12, window_bounds = array<i64: 1, 1024>}, {pipeline_mode = #tpu.pipeline_mode<synchronous>, transform_indices = @transform_13, window_bounds = array<i64: 1, 1024>}, {}, {pipeline_mode = #tpu.pipeline_mode<synchronous>, transform_indices = @transform_15, window_bounds = array<i64: 1, 128>}, {pipeline_mode = #tpu.pipeline_mode<synchronous>, transform_indices = @transform_16, window_bounds = array<i64: 8, 128>}]} {
    %c0_i32 = arith.constant 0 : i32
    %0 = tpu.memref_slice %arg20[%c0_i32] : memref<2x!tpu.dma_semaphore, #tpu.memory_space<semaphore_mem>> -> memref<1x!tpu.dma_semaphore, #tpu.memory_space<semaphore_mem>>
    %1 = tpu.memref_squeeze %0 : memref<1x!tpu.dma_semaphore, #tpu.memory_space<semaphore_mem>> -> memref<!tpu.dma_semaphore, #tpu.memory_space<semaphore_mem>>
    tpu.enqueue_dma source(%arg12 : memref<512x1024xbf16, #tpu.memory_space<any>>) target(%arg18 : memref<512x1024xbf16, #tpu.memory_space<vmem>>) target_semaphore(%1 : memref<!tpu.dma_semaphore, #tpu.memory_space<semaphore_mem>>)
    %c1_i32 = arith.constant 1 : i32
    %2 = tpu.memref_slice %arg20[%c1_i32] : memref<2x!tpu.dma_semaphore, #tpu.memory_space<semaphore_mem>> -> memref<1x!tpu.dma_semaphore, #tpu.memory_space<semaphore_mem>>
    %3 = tpu.memref_squeeze %2 : memref<1x!tpu.dma_semaphore, #tpu.memory_space<semaphore_mem>> -> memref<!tpu.dma_semaphore, #tpu.memory_space<semaphore_mem>>
    tpu.enqueue_dma source(%arg15 : memref<1024x128xbf16, #tpu.memory_space<any>>) target(%arg19 : memref<1024x128xbf16, #tpu.memory_space<vmem>>) target_semaphore(%3 : memref<!tpu.dma_semaphore, #tpu.memory_space<semaphore_mem>>)
    %c0 = arith.constant 0 : index
    %c0_0 = arith.constant 0 : index
    %4 = vector.load %arg1[%c0, %c0_0] : memref<8x1xi32, #tpu.memory_space<vmem>>, vector<8x1xi32>
    %5 = tpu.iota {dimensions = array<i32: 1>} : vector<8x10xi32>
    %6 = vector.broadcast %4 : vector<8x1xi32> to vector<8x10xi32>
    %7 = arith.cmpi eq, %5, %6 : vector<8x10xi32>
    %8 = arith.extui %7 : vector<8x10xi1> to vector<8x10xi32>
    %9 = arith.sitofp %8 : vector<8x10xi32> to vector<8x10xf32>
    %10 = arith.truncf %9 : vector<8x10xf32> to vector<8x10xbf16>
    %c0_1 = arith.constant 0 : index
    %c0_2 = arith.constant 0 : index
    %11 = vector.load %arg3[%c0_1, %c0_2] : memref<10x128xbf16, #tpu.memory_space<vmem>>, vector<10x128xbf16>
    %cst = arith.constant dense<0.000000e+00> : vector<8x128xf32>
    %12 = tpu.matmul %10, %11, %cst {dimension_numbers = #tpu.dot_dimension_numbers<[1], [0], [0], [1], [0, 0, 1, 1], [], []>} : vector<8x10xbf16>, vector<10x128xbf16>, vector<8x128xf32> -> vector<8x128xf32>
    %c0_3 = arith.constant 0 : index
    %c0_4 = arith.constant 0 : index
    %13 = vector.load %arg2[%c0_3, %c0_4] : memref<8x16xf32, #tpu.memory_space<vmem>>, vector<8x16xf32>
    %14 = arith.truncf %13 : vector<8x16xf32> to vector<8x16xbf16>
    %c0_5 = arith.constant 0 : index
    %c0_6 = arith.constant 0 : index
    %15 = vector.load %arg4[%c0_5, %c0_6] : memref<16x128xbf16, #tpu.memory_space<vmem>>, vector<16x128xbf16>
    %cst_7 = arith.constant dense<0.000000e+00> : vector<8x128xf32>
    %16 = tpu.matmul %14, %15, %cst_7 {dimension_numbers = #tpu.dot_dimension_numbers<[1], [0], [0], [1], [0, 0, 1, 1], [], []>} : vector<8x16xbf16>, vector<16x128xbf16>, vector<8x128xf32> -> vector<8x128xf32>
    %17 = arith.addf %12, %16 : vector<8x128xf32>
    %c0_8 = arith.constant 0 : index
    %c0_9 = arith.constant 0 : index
    %18 = vector.load %arg5[%c0_8, %c0_9] : memref<1x128xf32, #tpu.memory_space<vmem>>, vector<1x128xf32>
    %19 = vector.broadcast %18 : vector<1x128xf32> to vector<8x128xf32>
    %20 = arith.addf %17, %19 : vector<8x128xf32>
    %cst_10 = arith.constant 2.000000e-01 : f32
    %21 = vector.broadcast %cst_10 : f32 to vector<8x128xf32>
    %22 = arith.mulf %21, %20 : vector<8x128xf32>
    %23 = arith.maximumf %20, %22 : vector<8x128xf32>
    %24 = arith.truncf %23 : vector<8x128xf32> to vector<8x128xbf16>
    %c0_11 = arith.constant 0 : index
    %c0_12 = arith.constant 0 : index
    %25 = vector.load %arg6[%c0_11, %c0_12] : memref<128x256xbf16, #tpu.memory_space<vmem>>, vector<128x256xbf16>
    %cst_13 = arith.constant dense<0.000000e+00> : vector<8x256xf32>
    %26 = tpu.matmul %24, %25, %cst_13 {dimension_numbers = #tpu.dot_dimension_numbers<[1], [0], [0], [1], [0, 0, 1, 1], [], []>} : vector<8x128xbf16>, vector<128x256xbf16>, vector<8x256xf32> -> vector<8x256xf32>
    %cst_14 = arith.constant dense<0.000000e+00> : vector<256xf32>
    %27 = vector.multi_reduction <add>, %26, %cst_14 [0] : vector<8x256xf32> to vector<256xf32>
    %28 = vector.shape_cast %27 : vector<256xf32> to vector<1x256xf32>
    %cst_15 = arith.constant 8.000000e+00 : f32
    %29 = vector.broadcast %cst_15 : f32 to vector<1x256xf32>
    %30 = arith.divf %28, %29 : vector<1x256xf32>
    %31 = arith.mulf %26, %26 : vector<8x256xf32>
    %cst_16 = arith.constant dense<0.000000e+00> : vector<256xf32>
    %32 = vector.multi_reduction <add>, %31, %cst_16 [0] : vector<8x256xf32> to vector<256xf32>
    %33 = vector.shape_cast %32 : vector<256xf32> to vector<1x256xf32>
    %cst_17 = arith.constant 8.000000e+00 : f32
    %34 = vector.broadcast %cst_17 : f32 to vector<1x256xf32>
    %35 = arith.divf %33, %34 : vector<1x256xf32>
    %36 = arith.mulf %30, %30 : vector<1x256xf32>
    %37 = arith.subf %35, %36 : vector<1x256xf32>
    %c0_18 = arith.constant 0 : index
    %c0_19 = arith.constant 0 : index
    %38 = vector.load %arg7[%c0_18, %c0_19] : memref<1x256xf32, #tpu.memory_space<vmem>>, vector<1x256xf32>
    %cst_20 = arith.constant 8.000000e-01 : f32
    %39 = vector.broadcast %cst_20 : f32 to vector<1x256xf32>
    %40 = arith.addf %37, %39 : vector<1x256xf32>
    %41 = math.rsqrt %40 : vector<1x256xf32>
    %42 = arith.mulf %38, %41 : vector<1x256xf32>
    %c0_21 = arith.constant 0 : index
    %c0_22 = arith.constant 0 : index
    %43 = vector.load %arg8[%c0_21, %c0_22] : memref<1x256xf32, #tpu.memory_space<vmem>>, vector<1x256xf32>
    %44 = arith.mulf %30, %42 : vector<1x256xf32>
    %45 = arith.subf %43, %44 : vector<1x256xf32>
    %46 = vector.broadcast %42 : vector<1x256xf32> to vector<8x256xf32>
    %47 = arith.mulf %26, %46 : vector<8x256xf32>
    %48 = vector.broadcast %45 : vector<1x256xf32> to vector<8x256xf32>
    %49 = arith.addf %47, %48 : vector<8x256xf32>
    %cst_23 = arith.constant 2.000000e-01 : f32
    %50 = vector.broadcast %cst_23 : f32 to vector<8x256xf32>
    %51 = arith.mulf %50, %49 : vector<8x256xf32>
    %52 = arith.maximumf %49, %51 : vector<8x256xf32>
    %53 = arith.truncf %52 : vector<8x256xf32> to vector<8x256xbf16>
    %c0_24 = arith.constant 0 : index
    %c0_25 = arith.constant 0 : index
    %54 = vector.load %arg9[%c0_24, %c0_25] : memref<256x512xbf16, #tpu.memory_space<vmem>>, vector<256x512xbf16>
    %cst_26 = arith.constant dense<0.000000e+00> : vector<8x512xf32>
    %55 = tpu.matmul %53, %54, %cst_26 {dimension_numbers = #tpu.dot_dimension_numbers<[1], [0], [0], [1], [0, 0, 1, 1], [], []>} : vector<8x256xbf16>, vector<256x512xbf16>, vector<8x512xf32> -> vector<8x512xf32>
    %cst_27 = arith.constant dense<0.000000e+00> : vector<512xf32>
    %56 = vector.multi_reduction <add>, %55, %cst_27 [0] : vector<8x512xf32> to vector<512xf32>
    %57 = vector.shape_cast %56 : vector<512xf32> to vector<1x512xf32>
    %cst_28 = arith.constant 8.000000e+00 : f32
    %58 = vector.broadcast %cst_28 : f32 to vector<1x512xf32>
    %59 = arith.divf %57, %58 : vector<1x512xf32>
    %60 = arith.mulf %55, %55 : vector<8x512xf32>
    %cst_29 = arith.constant dense<0.000000e+00> : vector<512xf32>
    %61 = vector.multi_reduction <add>, %60, %cst_29 [0] : vector<8x512xf32> to vector<512xf32>
    %62 = vector.shape_cast %61 : vector<512xf32> to vector<1x512xf32>
    %cst_30 = arith.constant 8.000000e+00 : f32
    %63 = vector.broadcast %cst_30 : f32 to vector<1x512xf32>
    %64 = arith.divf %62, %63 : vector<1x512xf32>
    %65 = arith.mulf %59, %59 : vector<1x512xf32>
    %66 = arith.subf %64, %65 : vector<1x512xf32>
    %c0_31 = arith.constant 0 : index
    %c0_32 = arith.constant 0 : index
    %67 = vector.load %arg10[%c0_31, %c0_32] : memref<1x512xf32, #tpu.memory_space<vmem>>, vector<1x512xf32>
    %cst_33 = arith.constant 8.000000e-01 : f32
    %68 = vector.broadcast %cst_33 : f32 to vector<1x512xf32>
    %69 = arith.addf %66, %68 : vector<1x512xf32>
    %70 = math.rsqrt %69 : vector<1x512xf32>
    %71 = arith.mulf %67, %70 : vector<1x512xf32>
    %c0_34 = arith.constant 0 : index
    %c0_35 = arith.constant 0 : index
    %72 = vector.load %arg11[%c0_34, %c0_35] : memref<1x512xf32, #tpu.memory_space<vmem>>, vector<1x512xf32>
    %73 = arith.mulf %59, %71 : vector<1x512xf32>
    %74 = arith.subf %72, %73 : vector<1x512xf32>
    %75 = vector.broadcast %71 : vector<1x512xf32> to vector<8x512xf32>
    %76 = arith.mulf %55, %75 : vector<8x512xf32>
    %77 = vector.broadcast %74 : vector<1x512xf32> to vector<8x512xf32>
    %78 = arith.addf %76, %77 : vector<8x512xf32>
    %cst_36 = arith.constant 2.000000e-01 : f32
    %79 = vector.broadcast %cst_36 : f32 to vector<8x512xf32>
    %80 = arith.mulf %79, %78 : vector<8x512xf32>
    %81 = arith.maximumf %78, %80 : vector<8x512xf32>
    %c0_i32_37 = arith.constant 0 : i32
    %82 = tpu.memref_slice %arg20[%c0_i32_37] : memref<2x!tpu.dma_semaphore, #tpu.memory_space<semaphore_mem>> -> memref<1x!tpu.dma_semaphore, #tpu.memory_space<semaphore_mem>>
    %83 = tpu.memref_squeeze %82 : memref<1x!tpu.dma_semaphore, #tpu.memory_space<semaphore_mem>> -> memref<!tpu.dma_semaphore, #tpu.memory_space<semaphore_mem>>
    tpu.wait_dma2 semaphore(%83 : memref<!tpu.dma_semaphore, #tpu.memory_space<semaphore_mem>>) src(%arg12 : memref<512x1024xbf16, #tpu.memory_space<any>>) dst(%arg18 : memref<512x1024xbf16, #tpu.memory_space<vmem>>)
    %84 = arith.truncf %81 : vector<8x512xf32> to vector<8x512xbf16>
    %c0_38 = arith.constant 0 : index
    %c0_39 = arith.constant 0 : index
    %85 = vector.load %arg18[%c0_38, %c0_39] : memref<512x1024xbf16, #tpu.memory_space<vmem>>, vector<512x1024xbf16>
    %cst_40 = arith.constant dense<0.000000e+00> : vector<8x1024xf32>
    %86 = tpu.matmul %84, %85, %cst_40 {dimension_numbers = #tpu.dot_dimension_numbers<[1], [0], [0], [1], [0, 0, 1, 1], [], []>} : vector<8x512xbf16>, vector<512x1024xbf16>, vector<8x1024xf32> -> vector<8x1024xf32>
    %cst_41 = arith.constant dense<0.000000e+00> : vector<1024xf32>
    %87 = vector.multi_reduction <add>, %86, %cst_41 [0] : vector<8x1024xf32> to vector<1024xf32>
    %88 = vector.shape_cast %87 : vector<1024xf32> to vector<1x1024xf32>
    %cst_42 = arith.constant 8.000000e+00 : f32
    %89 = vector.broadcast %cst_42 : f32 to vector<1x1024xf32>
    %90 = arith.divf %88, %89 : vector<1x1024xf32>
    %91 = arith.mulf %86, %86 : vector<8x1024xf32>
    %cst_43 = arith.constant dense<0.000000e+00> : vector<1024xf32>
    %92 = vector.multi_reduction <add>, %91, %cst_43 [0] : vector<8x1024xf32> to vector<1024xf32>
    %93 = vector.shape_cast %92 : vector<1024xf32> to vector<1x1024xf32>
    %cst_44 = arith.constant 8.000000e+00 : f32
    %94 = vector.broadcast %cst_44 : f32 to vector<1x1024xf32>
    %95 = arith.divf %93, %94 : vector<1x1024xf32>
    %96 = arith.mulf %90, %90 : vector<1x1024xf32>
    %97 = arith.subf %95, %96 : vector<1x1024xf32>
    %c0_45 = arith.constant 0 : index
    %c0_46 = arith.constant 0 : index
    %98 = vector.load %arg13[%c0_45, %c0_46] : memref<1x1024xf32, #tpu.memory_space<vmem>>, vector<1x1024xf32>
    %cst_47 = arith.constant 8.000000e-01 : f32
    %99 = vector.broadcast %cst_47 : f32 to vector<1x1024xf32>
    %100 = arith.addf %97, %99 : vector<1x1024xf32>
    %101 = math.rsqrt %100 : vector<1x1024xf32>
    %102 = arith.mulf %98, %101 : vector<1x1024xf32>
    %c0_48 = arith.constant 0 : index
    %c0_49 = arith.constant 0 : index
    %103 = vector.load %arg14[%c0_48, %c0_49] : memref<1x1024xf32, #tpu.memory_space<vmem>>, vector<1x1024xf32>
    %104 = arith.mulf %90, %102 : vector<1x1024xf32>
    %105 = arith.subf %103, %104 : vector<1x1024xf32>
    %106 = vector.broadcast %102 : vector<1x1024xf32> to vector<8x1024xf32>
    %107 = arith.mulf %86, %106 : vector<8x1024xf32>
    %108 = vector.broadcast %105 : vector<1x1024xf32> to vector<8x1024xf32>
    %109 = arith.addf %107, %108 : vector<8x1024xf32>
    %cst_50 = arith.constant 2.000000e-01 : f32
    %110 = vector.broadcast %cst_50 : f32 to vector<8x1024xf32>
    %111 = arith.mulf %110, %109 : vector<8x1024xf32>
    %112 = arith.maximumf %109, %111 : vector<8x1024xf32>
    %c1_i32_51 = arith.constant 1 : i32
    %113 = tpu.memref_slice %arg20[%c1_i32_51] : memref<2x!tpu.dma_semaphore, #tpu.memory_space<semaphore_mem>> -> memref<1x!tpu.dma_semaphore, #tpu.memory_space<semaphore_mem>>
    %114 = tpu.memref_squeeze %113 : memref<1x!tpu.dma_semaphore, #tpu.memory_space<semaphore_mem>> -> memref<!tpu.dma_semaphore, #tpu.memory_space<semaphore_mem>>
    tpu.wait_dma2 semaphore(%114 : memref<!tpu.dma_semaphore, #tpu.memory_space<semaphore_mem>>) src(%arg15 : memref<1024x128xbf16, #tpu.memory_space<any>>) dst(%arg19 : memref<1024x128xbf16, #tpu.memory_space<vmem>>)
    %115 = arith.truncf %112 : vector<8x1024xf32> to vector<8x1024xbf16>
    %c0_52 = arith.constant 0 : index
    %c0_53 = arith.constant 0 : index
    %116 = vector.load %arg19[%c0_52, %c0_53] : memref<1024x128xbf16, #tpu.memory_space<vmem>>, vector<1024x128xbf16>
    %cst_54 = arith.constant dense<0.000000e+00> : vector<8x128xf32>
    %117 = tpu.matmul %115, %116, %cst_54 {dimension_numbers = #tpu.dot_dimension_numbers<[1], [0], [0], [1], [0, 0, 1, 1], [], []>} : vector<8x1024xbf16>, vector<1024x128xbf16>, vector<8x128xf32> -> vector<8x128xf32>
    %c0_55 = arith.constant 0 : index
    %c0_56 = arith.constant 0 : index
    %118 = vector.load %arg16[%c0_55, %c0_56] : memref<1x128xf32, #tpu.memory_space<vmem>>, vector<1x128xf32>
    %119 = vector.broadcast %118 : vector<1x128xf32> to vector<8x128xf32>
    %120 = arith.addf %117, %119 : vector<8x128xf32>
    %121 = math.tanh %120 : vector<8x128xf32>
    %c0_57 = arith.constant 0 : index
    %c0_58 = arith.constant 0 : index
    %122 = vector.load %arg17[%c0_57, %c0_58] : memref<8x128xf32, #tpu.memory_space<vmem>>, vector<8x128xf32>
    tpu.vector_store %arg17[%c0_57, %c0_58], %121 {strides = array<i32>} : memref<8x128xf32, #tpu.memory_space<vmem>>, vector<8x128xf32>,
    return
  }
  func.func @transform_0(%arg0: i32) -> (i32, i32) {
    %c0_i32 = arith.constant 0 : i32
    %c0_i32_0 = arith.constant 0 : i32
    %c0_i32_1 = arith.constant 0 : i32
    return %c0_i32, %c0_i32_0 : i32, i32
  }
  func.func @transform_1(%arg0: i32) -> (i32, i32) {
    %c0_i32 = arith.constant 0 : i32
    %c0_i32_0 = arith.constant 0 : i32
    %c0_i32_1 = arith.constant 0 : i32
    return %c0_i32, %c0_i32_0 : i32, i32
  }
  func.func @transform_2(%arg0: i32) -> (i32, i32) {
    %c0_i32 = arith.constant 0 : i32
    %c0_i32_0 = arith.constant 0 : i32
    %c0_i32_1 = arith.constant 0 : i32
    return %c0_i32, %c0_i32_0 : i32, i32
  }
  func.func @transform_3(%arg0: i32) -> (i32, i32) {
    %c0_i32 = arith.constant 0 : i32
    %c0_i32_0 = arith.constant 0 : i32
    %c0_i32_1 = arith.constant 0 : i32
    return %c0_i32, %c0_i32_0 : i32, i32
  }
  func.func @transform_4(%arg0: i32) -> (i32, i32) {
    %c0_i32 = arith.constant 0 : i32
    %c0_i32_0 = arith.constant 0 : i32
    %c0_i32_1 = arith.constant 0 : i32
    return %c0_i32, %c0_i32_0 : i32, i32
  }
  func.func @transform_5(%arg0: i32) -> (i32, i32) {
    %c0_i32 = arith.constant 0 : i32
    %c0_i32_0 = arith.constant 0 : i32
    %c0_i32_1 = arith.constant 0 : i32
    return %c0_i32, %c0_i32_0 : i32, i32
  }
  func.func @transform_6(%arg0: i32) -> (i32, i32) {
    %c0_i32 = arith.constant 0 : i32
    %c0_i32_0 = arith.constant 0 : i32
    %c0_i32_1 = arith.constant 0 : i32
    return %c0_i32, %c0_i32_0 : i32, i32
  }
  func.func @transform_7(%arg0: i32) -> (i32, i32) {
    %c0_i32 = arith.constant 0 : i32
    %c0_i32_0 = arith.constant 0 : i32
    %c0_i32_1 = arith.constant 0 : i32
    return %c0_i32, %c0_i32_0 : i32, i32
  }
  func.func @transform_8(%arg0: i32) -> (i32, i32) {
    %c0_i32 = arith.constant 0 : i32
    %c0_i32_0 = arith.constant 0 : i32
    %c0_i32_1 = arith.constant 0 : i32
    return %c0_i32, %c0_i32_0 : i32, i32
  }
  func.func @transform_9(%arg0: i32) -> (i32, i32) {
    %c0_i32 = arith.constant 0 : i32
    %c0_i32_0 = arith.constant 0 : i32
    %c0_i32_1 = arith.constant 0 : i32
    return %c0_i32, %c0_i32_0 : i32, i32
  }
  func.func @transform_10(%arg0: i32) -> (i32, i32) {
    %c0_i32 = arith.constant 0 : i32
    %c0_i32_0 = arith.constant 0 : i32
    %c0_i32_1 = arith.constant 0 : i32
    return %c0_i32, %c0_i32_0 : i32, i32
  }
  func.func @transform_12(%arg0: i32) -> (i32, i32) {
    %c0_i32 = arith.constant 0 : i32
    %c0_i32_0 = arith.constant 0 : i32
    %c0_i32_1 = arith.constant 0 : i32
    return %c0_i32, %c0_i32_0 : i32, i32
  }
  func.func @transform_13(%arg0: i32) -> (i32, i32) {
    %c0_i32 = arith.constant 0 : i32
    %c0_i32_0 = arith.constant 0 : i32
    %c0_i32_1 = arith.constant 0 : i32
    return %c0_i32, %c0_i32_0 : i32, i32
  }
  func.func @transform_15(%arg0: i32) -> (i32, i32) {
    %c0_i32 = arith.constant 0 : i32
    %c0_i32_0 = arith.constant 0 : i32
    %c0_i32_1 = arith.constant 0 : i32
    return %c0_i32, %c0_i32_0 : i32, i32
  }
  func.func @transform_16(%arg0: i32) -> (i32, i32) {
    %c0_i32 = arith.constant 0 : i32
    %c0_i32_0 = arith.constant 0 : i32
    %c0_i32_1 = arith.constant 0 : i32
    return %c0_i32, %c0_i32_0 : i32, i32
  }
}

</mosaic_0001>

<bundles_post_ra>
// kernel: generator_forward.1
= control target key start
LH: loop header
LB: loop body
LE: loop exit
PB: predicated region body
PF: predicated region fallthrough
CT: control target
= control target key end

     0   :  { %s7108_s0 = inlined_call_operand.vmem [shape: s32[8,1], index: 0, kind: input, shape index: {}]   ;;  %s7109_s1 = inlined_call_operand.vmem [shape: f32[8,16], index: 1, kind: input, shape index: {}]   ;;  %s7110_s2 = inlined_call_operand.hbm [shape: bf16[10,128], index: 2, kind: input, shape index: {}]   ;;  %s7111_s3 = inlined_call_operand.vmem [shape: bf16[16,128], index: 3, kind: input, shape index: {}]   ;;  %s7112_s4 = inlined_call_operand.hbm [shape: f32[1,128], index: 4, kind: input, shape index: {}]   ;;  %s7113_s5 = inlined_call_operand.hbm [shape: bf16[128,256], index: 5, kind: input, shape index: {}]   ;;  %s7114_s6 = inlined_call_operand.hbm [shape: f32[1,256], index: 6, kind: input, shape index: {}]   ;;  %s7115_s7 = inlined_call_operand.hbm [shape: f32[1,256], index: 7, kind: input, shape index: {}]   ;;  %s7116_s8 = inlined_call_operand.hbm [shape: bf16[256,512], index: 8, kind: input, shape index: {}]   ;;  %s7117_s9 = inlined_call_operand.hbm [shape: f32[1,512], index: 9, kind: input, shape index: {}]   ;;  %s7118_s10 = inlined_call_operand.hbm [shape: f32[1,512], index: 10, kind: input, shape index: {}]   ;;  %s7119_s11 = inlined_call_operand.hbm [shape: bf16[512,1024], index: 11, kind: input, shape index: {}]   ;;  %s7120_s12 = inlined_call_operand.hbm [shape: f32[1,1024], index: 12, kind: input, shape index: {}]   ;;  %s7121_s13 = inlined_call_operand.hbm [shape: f32[1,1024], index: 13, kind: input, shape index: {}]   ;;  %s7122_s14 = inlined_call_operand.hbm [shape: bf16[1024,128], index: 14, kind: input, shape index: {}]   ;;  %s7123_s15 = inlined_call_operand.hbm [shape: f32[1,128], index: 15, kind: input, shape index: {}]   ;;  %s7124_s16 = inlined_call_operand.vmem [shape: f32[8,128], index: 16, kind: output, shape index: {}]  }
   0x1   :  { %7125 = sst [smem:[#allocation36_spill]] %s7108_s0 }
   0x2   :  { %21 = vsyncpa [#allocation6], 0 }
   0x3   :  { %22 = vsyncpa [#allocation8], 0 }
   0x4   :  { %23 = vsyncpa [#allocation11], 0 }
   0x5   :  { %24 = vsyncpa [#allocation14], 0 }
   0x6   :  { %25 = vsyncpa [#allocation17], 0  ;;  %s51_s23 = sshll.u32 %s7112_s4, 4  ;;  %s52_s23 = int_to_ptr.hbm [resolvable:$true] %s51_s23 }
   0x7   :  { %26 = vsyncpa [#allocation20], 0  ;;  %s6562_s24 = smov [#allocation7]   ;;  %s75_s28 = sshll.u32 %s7114_s6, 4  ;;  %s76_s28 = int_to_ptr.hbm [resolvable:$true] %s75_s28 }
   0x8   :  { %s53_s25 = sshll.u32 %s6562_s24, 4  ;;  %s6563_s29 = smov [#allocation10]   ;;  %s54_s25 = int_to_ptr.vmem [resolvable:$true] %s53_s25 }
   0x9   :  { %56 = dma.hbm_to_vmem [thread:$0]  %s52_s23, 16, %s54_s25, [#allocation8]  }
   0xa   :  { %s77_s30 = sshll.u32 %s6563_s29, 4  ;;  %s96_s18 = sshll.u32 %s7116_s8, 4  ;;  %s78_s30 = int_to_ptr.vmem [resolvable:$true] %s77_s30  ;;  %s97_s18 = int_to_ptr.hbm [resolvable:$true] %s96_s18 }
   0xb   :  { %80 = dma.hbm_to_vmem [thread:$0]  %s76_s28, 32, %s78_s30, [#allocation11]  }
   0xc   :  { %s6564_s4 = smov [#allocation13]   ;;  %s121_s22 = sshll.u32 %s7118_s10, 4  ;;  %s122_s22 = int_to_ptr.hbm [resolvable:$true] %s121_s22 }
   0xd   :  { %s98_s19 = sshll.u32 %s6564_s4, 4  ;;  %s6565_s24 = smov 256   ;;  %s99_s19 = int_to_ptr.vmem [resolvable:$true] %s98_s19 }
   0xe   :  { %s6566_s6 = smov 16   ;;  %s6567_s23 = smov [#allocation16]  }
   0xf   :  { %104 = dma.hbm_to_vmem [thread:$0]  %s97_s18, 8192, %s99_s19, [#allocation14], %s6565_s24, %s6565_s24, %s6566_s6  }
  0x10   :  { %s123_s25 = sshll.u32 %s6567_s23, 4  ;;  %s143_s8 = sshll.u32 %s7121_s13, 4  ;;  %s124_s25 = int_to_ptr.vmem [resolvable:$true] %s123_s25  ;;  %s144_s8 = int_to_ptr.hbm [resolvable:$true] %s143_s8 }
  0x11   :  { %126 = dma.hbm_to_vmem [thread:$0]  %s122_s22, 64, %s124_s25, [#allocation17]  }
  0x12   :  { %s35_s30 = sshll.u32 %s7110_s2, 4  ;;  %s6568_s0 = smov [#allocation19]   ;;  %s36_s30 = int_to_ptr.hbm [resolvable:$true] %s35_s30 }
  0x13   :  { %s145_s17 = sshll.u32 %s6568_s0, 4  ;;  %s6569_s10 = smov [#allocation5]   ;;  %s146_s17 = int_to_ptr.vmem [resolvable:$true] %s145_s17 }
  0x14   :  { %148 = dma.hbm_to_vmem [thread:$0]  %s144_s8, 128, %s146_s17, [#allocation20]  }
  0x15   :  { %s37_s18 = sshll.u32 %s6569_s10, 4  ;;  %s6570_s4 = smov 64   ;;  %s38_s18 = int_to_ptr.vmem [resolvable:$true] %s37_s18 }
  0x16   :  { %s6571_s19 = smov 4   ;;  %s61_s21 = sshll.u32 %s7113_s5, 4  ;;  %s62_s21 = int_to_ptr.hbm [resolvable:$true] %s61_s21 }
  0x17   :  { %43 = dma.hbm_to_vmem [thread:$0]  %s36_s30, 128, %s38_s18, [#allocation6], %s6570_s4, %s6570_s4, %s6571_s19  }
  0x18   :  { %s6572_s22 = smov [#allocation9]   ;;  %s86_s23 = sshll.u32 %s7115_s7, 4  ;;  %s87_s23 = int_to_ptr.hbm [resolvable:$true] %s86_s23 }
  0x19   :  { %s63_s24 = sshll.u32 %s6572_s22, 4  ;;  %s6573_s25 = smov 128   ;;  %s64_s24 = int_to_ptr.vmem [resolvable:$true] %s63_s24 }
  0x1a   :  { %s6574_s26 = smov 8   ;;  %s6575_s27 = smov [#allocation12]  }
  0x1b   :  { %69 = dma.hbm_to_vmem [thread:$0]  %s62_s21, 2048, %s64_s24, [#allocation8], %s6573_s25, %s6573_s25, %s6574_s26  }
  0x1c   :  { %s88_s8 = sshll.u32 %s6575_s27, 4  ;;  %s110_s30 = sshll.u32 %s7117_s9, 4  ;;  %s89_s8 = int_to_ptr.vmem [resolvable:$true] %s88_s8  ;;  %s111_s30 = int_to_ptr.hbm [resolvable:$true] %s110_s30 }
  0x1d   :  { %91 = dma.hbm_to_vmem [thread:$0]  %s87_s23, 32, %s89_s8, [#allocation11]  }
  0x1e   :  { %s132_s17 = sshll.u32 %s7120_s12, 4  ;;  %s6576_s10 = smov [#allocation15]   ;;  %s133_s17 = int_to_ptr.hbm [resolvable:$true] %s132_s17 }
  0x1f   :  { %s112_s18 = sshll.u32 %s6576_s10, 4  ;;  %s6577_s7 = smov [#allocation18]   ;;  %s113_s18 = int_to_ptr.vmem [resolvable:$true] %s112_s18 }
  0x20   :  { %115 = dma.hbm_to_vmem [thread:$0]  %s111_s30, 64, %s113_s18, [#allocation14]  }
  0x21   :  { %s134_s4 = sshll.u32 %s6577_s7, 4  ;;  %s154_s13 = sshll.u32 %s7123_s15, 4  ;;  %s135_s4 = int_to_ptr.vmem [resolvable:$true] %s134_s4  ;;  %s155_s13 = int_to_ptr.hbm [resolvable:$true] %s154_s13 }
  0x22   :  { %137 = dma.hbm_to_vmem [thread:$0]  %s133_s17, 128, %s135_s4, [#allocation17]  }
  0x23   :  { %s6578_s9 = smov [#allocation21]  }
  0x24   :  { %s156_s21 = sshll.u32 %s6578_s9, 4  ;;  %s157_s21 = int_to_ptr.vmem [resolvable:$true] %s156_s21 }
  0x25   :  { %159 = dma.hbm_to_vmem [thread:$0]  %s155_s13, 16, %s157_s21, [#allocation20]  }
  0x26   :  { %6546 = dma.done.wait [#allocation6], 128  }
  0x27   :  { %6547 = vsyncadd [#allocation6], 4294967168 }
  0x28   :  { %6548 = dma.done.wait [#allocation8], 2064  }
  0x29   :  { %6549 = vsyncadd [#allocation8], 4294965232 }
  0x2a   :  { %6550 = dma.done.wait [#allocation11], 64  }
  0x2b   :  { %6551 = vsyncadd [#allocation11], 4294967232 }
  0x2c   :  { %6552 = dma.done.wait [#allocation14], 8256  }
  0x2d   :  { %6553 = vsyncadd [#allocation14], 4294959040 }
  0x2e   :  { %6554 = dma.done.wait [#allocation17], 192  }
  0x2f   :  { %6555 = vsyncadd [#allocation17], 4294967104 }
  0x30   :  { %6556 = dma.done.wait [#allocation20], 144  }
  0x31   :  { %6557 = vsyncadd [#allocation20], 4294967152  ;;  %v6579_v0 = vmov 0   ;;  %s7126_s22 = sld [smem:[#allocation36_spill]]  ;;  %v5776_v2 = vld [vmem:[%s7111_s3] sm:$0xff]  ;;  %vm254_vm0 = vcmask 130048   ;;  %v233_v39 = vlaneseq }
  0x32   :  { %6199 = vset.pattern.permute.xlu0 %v6579_v0  ;;  %v244_v3 = vld [vmem:[%s7109_s1] sm:$0xff]  ;;  %265 = vmatpush.bf16.msra.mxu0 %v5776_v2  ;;  %vm280_vm1 = vcmask 1044480   ;;  %v4231_v9 = vld [vmem:[#allocation9 + $0x70] sm:$0xf]  ;;  %v4223_v14 = vld [vmem:[#allocation9 + $0x60] sm:$0xf] }
  0x33   :  { %v245_v4 = vpack.c.bf16 %v244_v3, %v244_v3  ;;  %v4170_v5 = vld [vmem:[#allocation5] sm:$0xf]  ;;  %v5775_v6 = vld [vmem:[#allocation5] sm:$0x10]  ;;  %v4233_v13 = vld [vmem:[#allocation9 + $0x78] sm:$0xf0] }
  0x34   :  { %v4171_v7 = vor.u32 %v5775_v6, %v4170_v5  ;;  %v5792_v10 = vld [vmem:[#allocation9 + $0x74] sm:$0xf0]  ;;  %v5791_v11 = vld [vmem:[#allocation9 + $0x74] sm:$0xf]  ;;  %v5790_v15 = vld [vmem:[#allocation9 + $0x64] sm:$0xf0] }
  0x35   :  { %4167 = vmatmul.msk.bf16.vlgmr.msra.gmra.mxu0 %vm254_vm0, %v245_v4  ;;  %v4232_v12 = vor.u32 %v5792_v10, %v4231_v9  ;;  %v4236_v16 = vor.u32 %v5791_v11, %v4233_v13  ;;  %v5789_v17 = vld [vmem:[#allocation9 + $0x64] sm:$0xf]  ;;  %v4225_v18 = vld [vmem:[#allocation9 + $0x68] sm:$0xf0]  ;;  %v4224_v19 = vor.u32 %v5790_v15, %v4223_v14  ;;  %v4215_v21 = vld [vmem:[#allocation9 + $0x50] sm:$0xf] }
  0x36   :  { %v282_v8 = vsel %vm280_vm1, %v4171_v7, 0  ;;  %v4228_v20 = vor.u32 %v5789_v17, %v4225_v18  ;;  %v5788_v22 = vld [vmem:[#allocation9 + $0x54] sm:$0xf0]  ;;  %v5787_v23 = vld [vmem:[#allocation9 + $0x54] sm:$0xf]  ;;  %v234_v40 = vand.u32 127, %v233_v39 }
  0x37   :  { %v232_v1 = vld [vmem:[%s7126_s22] sm:$0xff]  ;;  %291 = vmatpush.bf16.msra.mxu1 %v282_v8  ;;  %401 = vmatpush.bf16.msra.mxu2 %v4232_v12  ;;  %v4216_v25 = vor.u32 %v5788_v22, %v4215_v21  ;;  %v4207_v27 = vld [vmem:[#allocation9 + $0x40] sm:$0xf]  ;;  %v5786_v28 = vld [vmem:[#allocation9 + $0x44] sm:$0xf0]  ;;  %v6580_v42 = vmov 0.0  }
  0x38   :  { %236 = vperm.xlu0 %6199, %v232_v1   ;;  %414 = vmatpush.bf16.msra.mxu3 %v4236_v16  ;;  %v4217_v24 = vld [vmem:[#allocation9 + $0x58] sm:$0xf0]  ;;  %v5785_v29 = vld [vmem:[#allocation9 + $0x44] sm:$0xf]  ;;  %v4208_v30 = vor.u32 %v5786_v28, %v4207_v27  ;;  %v4209_v31 = vld [vmem:[#allocation9 + $0x48] sm:$0xf0] }
  0x39   :  { %v4220_v26 = vor.u32 %v5787_v23, %v4217_v24  ;;  %v4212_v32 = vor.u32 %v5785_v29, %v4209_v31  ;;  %v4199_v33 = vld [vmem:[#allocation9 + $0x30] sm:$0xf]  ;;  %v5784_v34 = vld [vmem:[#allocation9 + $0x34] sm:$0xf0]  ;;  %v5783_v35 = vld [vmem:[#allocation9 + $0x34] sm:$0xf] }
  0x3a   :  { %v4201_v36 = vld [vmem:[#allocation9 + $0x38] sm:$0xf0]  ;;  %v4200_v37 = vor.u32 %v5784_v34, %v4199_v33  ;;  %vm276_vm3 = vcmask 80896   ;;  %v4191_v47 = vld [vmem:[#allocation9 + $0x20] sm:$0xf]  ;;  %v6581_v9 = vmov 8.0  }
  0x3b   :  { %402 = vmatpush.bf16.msra.mxu2 %v4224_v19  ;;  %v4204_v38 = vor.u32 %v5783_v35, %v4201_v36  ;;  %v5782_v48 = vld [vmem:[#allocation9 + $0x24] sm:$0xf0]  ;;  %v5781_v49 = vld [vmem:[#allocation9 + $0x24] sm:$0xf]  ;;  %v4193_v51 = vld [vmem:[#allocation9 + $0x28] sm:$0xf0]  ;;  %6201 = vrcp.f32 %v6581_v9 }
  0x3c   :  { %415 = vmatpush.bf16.msra.mxu3 %v4228_v20  ;;  %v4192_v50 = vor.u32 %v5782_v48, %v4191_v47  ;;  %v4196_v52 = vor.u32 %v5781_v49, %v4193_v51  ;;  %v4183_v53 = vld [vmem:[#allocation9 + $0x10] sm:$0xf]  ;;  %v5780_v54 = vld [vmem:[#allocation9 + $0x14] sm:$0xf0]  ;;  %v5779_v56 = vld [vmem:[#allocation9 + $0x14] sm:$0xf] }
  0x3d   :  { %v4184_v55 = vor.u32 %v5780_v54, %v4183_v53  ;;  %v4185_v57 = vld [vmem:[#allocation9 + $0x18] sm:$0xf0]  ;;  %v4175_v59 = vld [vmem:[#allocation9] sm:$0xf]  ;;  %v5778_v60 = vld [vmem:[#allocation9 + $0x4] sm:$0xf0] }
  0x3e   :  { %v4188_v58 = vor.u32 %v5779_v56, %v4185_v57  ;;  %v5777_v61 = vld [vmem:[#allocation9 + $0x4] sm:$0xf]  ;;  %v4176_v62 = vor.u32 %v5778_v60, %v4175_v59  ;;  %v4177_v63 = vld [vmem:[#allocation9 + $0x8] sm:$0xf0]  ;;  %v6200_v1 = vld [vmem:[#allocation7] ss:$0 sm:$0xff] }
  0x3f   :  { %403 = vmatpush.bf16.msra.mxu2 %v4216_v25  ;;  %v4180_v0 = vor.u32 %v5777_v61, %v4177_v63  ;;  %v4351_v10 = vld [vmem:[#allocation13 + $0xe0] sm:$0xf]  ;;  %v5823_v11 = vld [vmem:[#allocation13 + $0xec] sm:$0xf0]  ;;  %v5821_v15 = vld [vmem:[#allocation13 + $0xe4] sm:$0xf] }
  0x40   :  { %416 = vmatpush.bf16.msra.mxu3 %v4220_v26  ;;  %v4479_v12 = vld [vmem:[#allocation13 + $0x1e0] sm:$0xf]  ;;  %v4352_v13 = vor.u32 %v5823_v11, %v4351_v10  ;;  %v5855_v14 = vld [vmem:[#allocation13 + $0x1ec] sm:$0xf0]  ;;  %v4353_v16 = vld [vmem:[#allocation13 + $0xf0] sm:$0xf0] }
  0x41   :  { %v4480_v17 = vor.u32 %v5855_v14, %v4479_v12  ;;  %v4356_v18 = vor.u32 %v5821_v15, %v4353_v16  ;;  %v5853_v19 = vld [vmem:[#allocation13 + $0x1e4] sm:$0xf]  ;;  %v4481_v20 = vld [vmem:[#allocation13 + $0x1f0] sm:$0xf0]  ;;  %v6711_v22 = vpop.eup %6201  ;;  %v4335_v23 = vld [vmem:[#allocation13 + $0xc0] sm:$0xf] }
  0x42   :  { %911 = vmatpush.bf16.msrb.mxu0 %v4352_v13  ;;  %v4484_v21 = vor.u32 %v5853_v19, %v4481_v20  ;;  %v5819_v24 = vld [vmem:[#allocation13 + $0xcc] sm:$0xf0]  ;;  %v4463_v25 = vld [vmem:[#allocation13 + $0x1c0] sm:$0xf]  ;;  %v5817_v28 = vld [vmem:[#allocation13 + $0xc4] sm:$0xf]  ;;  %vm444_vm4 = vweird.f32 %v6711_v22 }
  0x43   :  { %404 = vmatpush.bf16.msra.mxu2 %v4208_v30  ;;  %924 = vmatpush.bf16.msrb.mxu1 %v4480_v17  ;;  %v4336_v26 = vor.u32 %v5819_v24, %v4335_v23  ;;  %v5851_v27 = vld [vmem:[#allocation13 + $0x1cc] sm:$0xf0]  ;;  %v4337_v29 = vld [vmem:[#allocation13 + $0xd0] sm:$0xf0]  ;;  %v440_v34 = vmul.f32 8.0, %v6711_v22  ;;  %vm494_vm8 = vcmask 1040384  }
  0x44   :  { %417 = vmatpush.bf16.msra.mxu3 %v4212_v32  ;;  %v4464_v30 = vor.u32 %v5851_v27, %v4463_v25  ;;  %v4340_v31 = vor.u32 %v5817_v28, %v4337_v29  ;;  %v5849_v32 = vld [vmem:[#allocation13 + $0x1c4] sm:$0xf]  ;;  %v4465_v33 = vld [vmem:[#allocation13 + $0x1d0] sm:$0xf0]  ;;  %v4319_v36 = vld [vmem:[#allocation13 + $0xa0] sm:$0xf] }
  0x45   :  { %v4468_v35 = vor.u32 %v5849_v32, %v4465_v33  ;;  %v441_v47 = vsub.f32 1.0, %v440_v34  ;;  %v4303_v49 = vld [vmem:[#allocation13 + $0x80] sm:$0xf]  ;;  %v5843_v53 = vld [vmem:[#allocation13 + $0x18c] sm:$0xf0]  ;;  %s212_s25 = sshll.u32 %s7119_s11, 4  ;;  %s213_s25 = int_to_ptr.hbm [resolvable:$true] %s212_s25 }
  0x46   :  { %912 = vmatpush.bf16.msrb.mxu0 %v4336_v26  ;;  %v4431_v51 = vld [vmem:[#allocation13 + $0x180] sm:$0xf]  ;;  %v5809_v54 = vld [vmem:[#allocation13 + $0x84] sm:$0xf]  ;;  %v4433_v59 = vld [vmem:[#allocation13 + $0x190] sm:$0xf0] }
  0x47   :  { %405 = vmatpush.bf16.msra.mxu2 %v4200_v37  ;;  %925 = vmatpush.bf16.msrb.mxu1 %v4464_v30  ;;  %v5815_v37 = vld [vmem:[#allocation13 + $0xac] sm:$0xf0]  ;;  %v4432_v56 = vor.u32 %v5843_v53, %v4431_v51  ;;  %v5805_v9 = vld [vmem:[#allocation13 + $0x64] sm:$0xf]  ;;  %v4289_v14 = vld [vmem:[#allocation13 + $0x70] sm:$0xf0] }
  0x48   :  { %418 = vmatpush.bf16.msra.mxu3 %v4204_v38  ;;  %v4447_v38 = vld [vmem:[#allocation13 + $0x1a0] sm:$0xf]  ;;  %v4320_v39 = vor.u32 %v5815_v37, %v4319_v36  ;;  %v5837_v15 = vld [vmem:[#allocation13 + $0x164] sm:$0xf]  ;;  %v4292_v17 = vor.u32 %v5805_v9, %v4289_v14  ;;  %v5803_v25 = vld [vmem:[#allocation13 + $0x4c] sm:$0xf0] }
  0x49   :  { %v4271_v24 = vld [vmem:[#allocation13 + $0x40] sm:$0xf]  ;;  %v5835_v30 = vld [vmem:[#allocation13 + $0x14c] sm:$0xf0]  ;;  %v4273_v36 = vld [vmem:[#allocation13 + $0x50] sm:$0xf0] }
  0x4a   :  { %913 = vmatpush.bf16.msrb.mxu0 %v4320_v39  ;;  %v4272_v28 = vor.u32 %v5803_v25, %v4271_v24  ;;  %v4399_v29 = vld [vmem:[#allocation13 + $0x140] sm:$0xf]  ;;  %v5833_v37 = vld [vmem:[#allocation13 + $0x144] sm:$0xf]  ;;  %v5831_v53 = vld [vmem:[#allocation13 + $0x12c] sm:$0xf0] }
  0x4b   :  { %406 = vmatpush.bf16.msra.mxu2 %v4192_v50  ;;  %v5811_v50 = vld [vmem:[#allocation13 + $0x8c] sm:$0xf0]  ;;  %v5824_v24 = vld [vmem:[#allocation13 + $0xf4] sm:$0xf0]  ;;  %v4487_v25 = vld [vmem:[#allocation13 + $0x1e8] sm:$0xf] }
  0x4c   :  { %419 = vmatpush.bf16.msra.mxu3 %v4196_v52  ;;  %v4304_v52 = vor.u32 %v5811_v50, %v4303_v49  ;;  %s6582_s26 = smov [#allocation2]   ;;  %s226_s29 = sshll.u32 %s7122_s14, 4  ;;  %s227_s29 = int_to_ptr.hbm [resolvable:$true] %s226_s29 }
  0x4d   :  { %s214_s27 = sshll.u32 %s6582_s26, 4  ;;  %s6583_s30 = smov [#allocation3]   ;;  %s215_s27 = int_to_ptr.vmem [resolvable:$true] %s214_s27 }
  0x4e   :  { %914 = vmatpush.bf16.msrb.mxu0 %v4304_v52  ;;  %v4383_v52 = vld [vmem:[#allocation13 + $0x120] sm:$0xf]  ;;  %217 = dma.hbm_to_vmem [thread:$0]  %s213_s25, 32768, %s215_s27, [#allocation4] }
  0x4f   :  { %407 = vmatpush.bf16.msra.mxu2 %v4184_v55  ;;  %v4305_v55 = vld [vmem:[#allocation13 + $0x90] sm:$0xf0]  ;;  %s228_s5 = sshll.u32 %s6583_s30, 4  ;;  %s229_s5 = int_to_ptr.vmem [resolvable:$true] %s228_s5 }
  0x50   :  { %420 = vmatpush.bf16.msra.mxu3 %v4188_v58  ;;  %v4308_v57 = vor.u32 %v5809_v54, %v4305_v55  ;;  %v5841_v58 = vld [vmem:[#allocation13 + $0x184] sm:$0xf]  ;;  %231 = dma.hbm_to_vmem [thread:$0]  %s227_s29, 8192, %s229_s5, [#allocation4 + $0x1] }
  0x51   :  { %v5797_v54 = vld [vmem:[#allocation13 + $0x24] sm:$0xf] }
  0x53   :  { %408 = vmatpush.bf16.msra.mxu2 %v4176_v62  ;;  %v4436_v62 = vor.u32 %v5841_v58, %v4433_v59  ;;  %v4257_v59 = vld [vmem:[#allocation13 + $0x30] sm:$0xf0] }
  0x54   :  { %421 = vmatpush.bf16.msra.mxu3 %v4180_v0 }
  0x57   :  { %937 = vmatpush.bf16.msrb.mxu2 %v4356_v18  ;;  %v4417_v18 = vld [vmem:[#allocation13 + $0x170] sm:$0xf0] }
  0x58   :  { %950 = vmatpush.bf16.msrb.mxu3 %v4484_v21  ;;  %v4420_v27 = vor.u32 %v5837_v15, %v4417_v18  ;;  %v4369_v18 = vld [vmem:[#allocation13 + $0x110] sm:$0xf0] }
  0x5b   :  { %938 = vmatpush.bf16.msrb.mxu2 %v4340_v31  ;;  %v5801_v31 = vld [vmem:[#allocation13 + $0x44] sm:$0xf] }
  0x5c   :  { %951 = vmatpush.bf16.msrb.mxu3 %v4468_v35 }
  0xaa   :  { %v237_v41 = vpop.permute.xlu0 %236 }
  0xab   :  { %vm238_vm2 = vcmp.eq.s32.totalorder %v234_v40, %v237_v41  ;;  %v5847_v40 = vld [vmem:[#allocation13 + $0x1ac] sm:$0xf0]  ;;  %v5813_v41 = vld [vmem:[#allocation13 + $0xa4] sm:$0xf] }
  0xac   :  { %v4162_v43 = vsel %vm238_vm2, 1.0, %v6580_v42  ;;  %v4321_v42 = vld [vmem:[#allocation13 + $0xb0] sm:$0xf0] }
  0xad   :  { %v241_v44 = vpack.c.bf16 %v4162_v43, %v4162_v43  ;;  %v4448_v43 = vor.u32 %v5847_v40, %v4447_v38  ;;  %v4400_v40 = vor.u32 %v5835_v30, %v4399_v29 }
  0xaf   :  { %4172 = vmatmul.msk.bf16.vlgmr.msra.gmra.mxu1 %vm276_vm3, %v241_v44  ;;  %v4324_v44 = vor.u32 %v5813_v41, %v4321_v42  ;;  %v4276_v41 = vor.u32 %v5801_v31, %v4273_v36  ;;  %v4401_v42 = vld [vmem:[#allocation13 + $0x150] sm:$0xf0]  ;;  %v5822_v31 = vld [vmem:[#allocation13 + $0xec] sm:$0xf]  ;;  %v4343_v36 = vld [vmem:[#allocation13 + $0xc8] sm:$0xf] }
  0xb0   :  { %926 = vmatpush.bf16.msrb.mxu1 %v4448_v43  ;;  %v4404_v50 = vor.u32 %v5833_v37, %v4401_v42  ;;  %v5820_v37 = vld [vmem:[#allocation13 + $0xd4] sm:$0xf0]  ;;  %v4471_v42 = vld [vmem:[#allocation13 + $0x1c8] sm:$0xf] }
  0xb1   :  { %939 = vmatpush.bf16.msrb.mxu2 %v4324_v44 }
  0xb2   :  { %v267_v45 = vpop.f32.mrf.mxu0 }
  0xb4   :  { %927 = vmatpush.bf16.msrb.mxu1 %v4432_v56 }
  0xb5   :  { %940 = vmatpush.bf16.msrb.mxu2 %v4308_v57 }
  0xb9   :  { %941 = vmatpush.bf16.msrb.mxu2 %v4292_v17  ;;  %v5825_v17 = vld [vmem:[#allocation13 + $0x104] sm:$0xf] }
  0xba   :  { %v269_v46 = vpop.f32.mrf.mxu0 }
  0xbb   :  { %v4449_v46 = vld [vmem:[#allocation13 + $0x1b0] sm:$0xf0] }
  0xbd   :  { %942 = vmatpush.bf16.msrb.mxu2 %v4276_v41  ;;  %v4344_v41 = vor.u32 %v5820_v37, %v4343_v36  ;;  %v4279_v36 = vld [vmem:[#allocation13 + $0x48] sm:$0xf] }
 0x12c   :  { %v293_v2 = vpop.f32.mrf.mxu1 }
 0x12d   :  { %v294_v3 = vadd.f32 %v293_v2, %v267_v45  ;;  %v5845_v45 = vld [vmem:[#allocation13 + $0x1a4] sm:$0xf] }
 0x12e   :  { %v4452_v48 = vor.u32 %v5845_v45, %v4449_v46 }
 0x12f   :  { %v301_v4 = vadd.f32 %v6200_v1, %v294_v3  ;;  %v4287_v3 = vld [vmem:[#allocation13 + $0x60] sm:$0xf] }
 0x130   :  { %952 = vmatpush.bf16.msrb.mxu3 %v4452_v48  ;;  %v5799_v48 = vld [vmem:[#allocation13 + $0x2c] sm:$0xf0] }
 0x131   :  { %v302_v5 = vmul.f32 0.2, %v301_v4 }
 0x133   :  { %v303_v6 = vmax.f32 %v301_v4, %v302_v5  ;;  %v5807_v4 = vld [vmem:[#allocation13 + $0x6c] sm:$0xf0]  ;;  %v442_v5 = vmul.f32 %v6711_v22, %v441_v47  ;;  %v4255_v47 = vld [vmem:[#allocation13 + $0x20] sm:$0xf] }
 0x134   :  { %v295_v7 = vpop.f32.mrf.mxu1  ;;  %953 = vmatpush.bf16.msrb.mxu3 %v4436_v62  ;;  %v4256_v51 = vor.u32 %v5799_v48, %v4255_v47  ;;  %v4384_v62 = vor.u32 %v5831_v53, %v4383_v52  ;;  %v5850_v47 = vld [vmem:[#allocation13 + $0x1cc] sm:$0xf]  ;;  %v4473_v48 = vld [vmem:[#allocation13 + $0x1d8] sm:$0xf0]  ;;  %v4327_v52 = vld [vmem:[#allocation13 + $0xa8] sm:$0xf] }
 0x135   :  { %v304_v8 = vpack.c.bf16 %v303_v6, %v303_v6  ;;  %v4288_v6 = vor.u32 %v5807_v4, %v4287_v3  ;;  %v4415_v7 = vld [vmem:[#allocation13 + $0x160] sm:$0xf]  ;;  %v443_v26 = vadd.f32 %v6711_v22, %v442_v5  ;;  %v5816_v53 = vld [vmem:[#allocation13 + $0xb4] sm:$0xf0] }
 0x136   :  { %v4239_v5 = vld [vmem:[#allocation13] sm:$0xf] }
 0x137   :  { %409 = vmatmul.bf16.vlgmr.msra.gmra.mxu2 %v304_v8  ;;  %422 = vmatmul.bf16.vlgmr.msra.gmra.mxu3 %v304_v8  ;;  %v5839_v8 = vld [vmem:[#allocation13 + $0x16c] sm:$0xf0]  ;;  %v6732_v49 = vsel %vm444_vm4, %v6711_v22, %v443_v26  ;;  %v5856_v26 = vld [vmem:[#allocation13 + $0x1f4] sm:$0xf0] }
 0x138   :  { %915 = vmatpush.bf16.msrb.mxu0 %v4288_v6  ;;  %v4416_v16 = vor.u32 %v5839_v8, %v4415_v7  ;;  %954 = vmatpush.bf16.msrb.mxu3 %v4420_v27  ;;  %v5795_v6 = vld [vmem:[#allocation13 + $0xc] sm:$0xf0]  ;;  %v4367_v7 = vld [vmem:[#allocation13 + $0x100] sm:$0xf]  ;;  %v4488_v30 = vor.u32 %v5856_v26, %v4487_v25 }
 0x139   :  { %v4240_v9 = vor.u32 %v5795_v6, %v4239_v5  ;;  %v4439_v5 = vld [vmem:[#allocation13 + $0x188] sm:$0xf] }
 0x13a   :  { %928 = vmatpush.bf16.msrb.mxu1 %v4416_v16 }
 0x13c   :  { %916 = vmatpush.bf16.msrb.mxu0 %v4272_v28  ;;  %955 = vmatpush.bf16.msrb.mxu3 %v4404_v50 }
 0x13e   :  { %929 = vmatpush.bf16.msrb.mxu1 %v4400_v40 }
 0x140   :  { %917 = vmatpush.bf16.msrb.mxu0 %v4256_v51  ;;  %v4476_v51 = vor.u32 %v5850_v47, %v4473_v48 }
 0x142   :  { %930 = vmatpush.bf16.msrb.mxu1 %v4384_v62 }
 0x144   :  { %918 = vmatpush.bf16.msrb.mxu0 %v4240_v9  ;;  %v5810_v9 = vld [vmem:[#allocation13 + $0x8c] sm:$0xf] }
 0x1ba   :  { %v6714_v60 = vpop.f32.mrf.mxu2  ;;  %v6716_v61 = vpop.f32.mrf.mxu3 }
 0x1bb   :  { %v427_v63 = vrot.slane %v6714_v60, 4  ;;  %v448_v0 = vmul.f32 %v6714_v60, %v6714_v60  ;;  %v433_v1 = vrot.slane %v6716_v61, 4  ;;  %v449_v2 = vmul.f32 %v6716_v61, %v6716_v61 }
 0x1bd   :  { %v428_v10 = vadd.f32 %v427_v63, %v6714_v60  ;;  %v450_v11 = vrot.slane %v448_v0, 4  ;;  %v434_v12 = vadd.f32 %v433_v1, %v6716_v61  ;;  %v456_v13 = vrot.slane %v449_v2, 4  ;;  %v4385_v1 = vld [vmem:[#allocation13 + $0x130] sm:$0xf0] }
 0x1be   :  { %v4260_v63 = vor.u32 %v5797_v54, %v4257_v59  ;;  %v4455_v54 = vld [vmem:[#allocation13 + $0x1a8] sm:$0xf] }
 0x1bf   :  { %v429_v19 = vrot.slane %v428_v10, 2  ;;  %v451_v20 = vadd.f32 %v450_v11, %v448_v0  ;;  %v435_v21 = vrot.slane %v434_v12, 2  ;;  %v457_v23 = vadd.f32 %v456_v13, %v449_v2  ;;  %v5829_v0 = vld [vmem:[#allocation13 + $0x124] sm:$0xf] }
 0x1c0   :  { %943 = vmatpush.bf16.msrb.mxu2 %v4260_v63  ;;  %v4388_v8 = vor.u32 %v5829_v0, %v4385_v1  ;;  %v5793_v11 = vld [vmem:[#allocation13 + $0x4] sm:$0xf]  ;;  %v5846_v63 = vld [vmem:[#allocation13 + $0x1ac] sm:$0xf]  ;;  %v4457_v0 = vld [vmem:[#allocation13 + $0x1b8] sm:$0xf0] }
 0x1c1   :  { %v430_v32 = vadd.f32 %v429_v19, %v428_v10  ;;  %v452_v33 = vrot.slane %v451_v20, 2  ;;  %v436_v34 = vadd.f32 %v435_v21, %v434_v12  ;;  %v458_v35 = vrot.slane %v457_v23, 2  ;;  %v5827_v10 = vld [vmem:[#allocation13 + $0x10c] sm:$0xf0]  ;;  %v4241_v12 = vld [vmem:[#allocation13 + $0x10] sm:$0xf0] }
 0x1c2   :  { %v412_v38 = vpop.f32.mrf.mxu2  ;;  %v425_v39 = vpop.f32.mrf.mxu3  ;;  %v4359_v19 = vld [vmem:[#allocation13 + $0xe8] sm:$0xf]  ;;  %956 = vmatpush.bf16.msrb.mxu3 %v4388_v8  ;;  %v4244_v21 = vor.u32 %v5793_v11, %v4241_v12  ;;  %v4460_v1 = vor.u32 %v5846_v63, %v4457_v0  ;;  %v5844_v8 = vld [vmem:[#allocation13 + $0x194] sm:$0xf0] }
 0x1c3   :  { %v431_v43 = vrot.slane %v430_v32, 1  ;;  %v453_v44 = vadd.f32 %v452_v33, %v451_v20  ;;  %v437_v45 = vrot.slane %v436_v34, 1  ;;  %v459_v46 = vadd.f32 %v458_v35, %v457_v23  ;;  %v5854_v33 = vld [vmem:[#allocation13 + $0x1ec] sm:$0xf]  ;;  %v4489_v35 = vld [vmem:[#allocation13 + $0x1f8] sm:$0xf0] }
 0x1c4   :  { %v4368_v20 = vor.u32 %v5827_v10, %v4367_v7  ;;  %v4372_v23 = vor.u32 %v5825_v17, %v4369_v18  ;;  %v4360_v29 = vor.u32 %v5824_v24, %v4359_v19  ;;  %944 = vmatpush.bf16.msrb.mxu2 %v4244_v21  ;;  %v4492_v40 = vor.u32 %v5854_v33, %v4489_v35  ;;  %v4313_v10 = vld [vmem:[#allocation13 + $0x98] sm:$0xf0]  ;;  %v4295_v21 = vld [vmem:[#allocation13 + $0x68] sm:$0xf] }
 0x1c5   :  { %v432_v55 = vadd.f32 %v431_v43, %v430_v32  ;;  %v454_v56 = vrot.slane %v453_v44, 1  ;;  %v438_v57 = vadd.f32 %v437_v45, %v436_v34  ;;  %v460_v58 = vrot.slane %v459_v46, 1  ;;  %v4361_v32 = vld [vmem:[#allocation13 + $0xf8] sm:$0xf0]  ;;  %v5852_v43 = vld [vmem:[#allocation13 + $0x1d4] sm:$0xf0] }
 0x1c6   :  { %931 = vmatpush.bf16.msrb.mxu1 %v4368_v20  ;;  %v4364_v34 = vor.u32 %v5822_v31, %v4361_v32  ;;  %963 = vmatpush.bf16.msra.mxu0 %v4360_v29  ;;  %v4345_v45 = vld [vmem:[#allocation13 + $0xd8] sm:$0xf0]  ;;  %v4423_v24 = vld [vmem:[#allocation13 + $0x168] sm:$0xf]  ;;  %v5838_v32 = vld [vmem:[#allocation13 + $0x16c] sm:$0xf] }
 0x1c7   :  { %v6735_v22 = vmul.f32 %v6732_v49, %v432_v55  ;;  %v455_v2 = vadd.f32 %v454_v56, %v453_v44  ;;  %v6738_v3 = vmul.f32 %v6732_v49, %v438_v57  ;;  %v461_v4 = vadd.f32 %v460_v58, %v459_v46  ;;  %957 = vmatpush.bf16.msrb.mxu3 %v4372_v23  ;;  %v5818_v44 = vld [vmem:[#allocation13 + $0xcc] sm:$0xf]  ;;  %v5848_v56 = vld [vmem:[#allocation13 + $0x1b4] sm:$0xf0]  ;;  %v4329_v58 = vld [vmem:[#allocation13 + $0xb8] sm:$0xf0] }
 0x1c8   :  { %989 = vmatpush.bf16.msra.mxu2 %v4364_v34  ;;  %v4472_v46 = vor.u32 %v5852_v43, %v4471_v42  ;;  %v4348_v50 = vor.u32 %v5818_v44, %v4345_v45  ;;  %v4328_v55 = vor.u32 %v5816_v53, %v4327_v52  ;;  %v5814_v57 = vld [vmem:[#allocation13 + $0xac] sm:$0xf]  ;;  %v4456_v59 = vor.u32 %v5848_v56, %v4455_v54  ;;  %v5808_v23 = vld [vmem:[#allocation13 + $0x74] sm:$0xf0]  ;;  %v4297_v31 = vld [vmem:[#allocation13 + $0x78] sm:$0xf0] }
 0x1c9   :  { %v462_v13 = vmul.f32 %v455_v2, %v6732_v49  ;;  %v464_v14 = vmul.f32 %v6735_v22, %v6735_v22  ;;  %v463_v15 = vmul.f32 %v461_v4, %v6732_v49  ;;  %v465_v16 = vmul.f32 %v6738_v3, %v6738_v3  ;;  %v4311_v2 = vld [vmem:[#allocation13 + $0x88] sm:$0xf]  ;;  %v5812_v4 = vld [vmem:[#allocation13 + $0x94] sm:$0xf0]  ;;  %v4425_v35 = vld [vmem:[#allocation13 + $0x178] sm:$0xf0] }
 0x1ca   :  { %976 = vmatpush.bf16.msra.mxu1 %v4488_v30  ;;  %964 = vmatpush.bf16.msra.mxu0 %v4344_v41  ;;  %v4332_v62 = vor.u32 %v5814_v57, %v4329_v58  ;;  %v4312_v7 = vor.u32 %v5812_v4, %v4311_v2  ;;  %v4296_v26 = vor.u32 %v5808_v23, %v4295_v21  ;;  %v5804_v42 = vld [vmem:[#allocation13 + $0x54] sm:$0xf0]  ;;  %v4407_v43 = vld [vmem:[#allocation13 + $0x148] sm:$0xf]  ;;  %v5802_v45 = vld [vmem:[#allocation13 + $0x4c] sm:$0xf] }
 0x1cb   :  { %v466_v27 = vsub.f32 %v462_v13, %v464_v14  ;;  %v467_v28 = vsub.f32 %v463_v15, %v465_v16  ;;  %1002 = vmatpush.bf16.msra.mxu3 %v4492_v40  ;;  %v4440_v13 = vor.u32 %v5844_v8, %v4439_v5  ;;  %v4316_v14 = vor.u32 %v5810_v9, %v4313_v10  ;;  %v5842_v15 = vld [vmem:[#allocation13 + $0x18c] sm:$0xf]  ;;  %v4441_v16 = vld [vmem:[#allocation13 + $0x198] sm:$0xf0]  ;;  %v5836_v44 = vld [vmem:[#allocation13 + $0x154] sm:$0xf0] }
 0x1cc   :  { %990 = vmatpush.bf16.msra.mxu2 %v4348_v50  ;;  %v4444_v18 = vor.u32 %v5842_v15, %v4441_v16  ;;  %v4428_v41 = vor.u32 %v5838_v32, %v4425_v35  ;;  %v4408_v50 = vor.u32 %v5836_v44, %v4407_v43  ;;  %v5834_v52 = vld [vmem:[#allocation13 + $0x14c] sm:$0xf]  ;;  %v4409_v53 = vld [vmem:[#allocation13 + $0x158] sm:$0xf0]  ;;  %v4263_v54 = vld [vmem:[#allocation13 + $0x28] sm:$0xf] }
 0x1cd   :  { %v6746_v38 = vadd.f32 0.8, %v466_v27  ;;  %v6748_v39 = vadd.f32 0.8, %v467_v28  ;;  %v5840_v27 = vld [vmem:[#allocation13 + $0x174] sm:$0xf0]  ;;  %v4412_v56 = vor.u32 %v5834_v52, %v4409_v53 }
 0x1ce   :  { %977 = vmatpush.bf16.msra.mxu1 %v4472_v46  ;;  %965 = vmatpush.bf16.msra.mxu0 %v4328_v55  ;;  %v5806_v28 = vld [vmem:[#allocation13 + $0x6c] sm:$0xf]  ;;  %v4424_v30 = vor.u32 %v5840_v27, %v4423_v24  ;;  %v4281_v46 = vld [vmem:[#allocation13 + $0x58] sm:$0xf0]  ;;  %v5800_v57 = vld [vmem:[#allocation13 + $0x34] sm:$0xf0] }
 0x1cf   :  { %6203 = vrsqrt.f32 %v6746_v38  ;;  %1003 = vmatpush.bf16.msra.mxu3 %v4476_v51  ;;  %vm487_vm6 = vweird.f32 %v6748_v39  ;;  %v4300_v34 = vor.u32 %v5806_v28, %v4297_v31  ;;  %v4284_v51 = vor.u32 %v5802_v45, %v4281_v46  ;;  %v468_v55 = vld [vmem:[#allocation10] sm:$0x3]  ;;  %v4391_v58 = vld [vmem:[#allocation13 + $0x128] sm:$0xf]  ;;  %v5830_v4 = vld [vmem:[#allocation13 + $0x12c] sm:$0xf] }
 0x1d0   :  { %6205 = vrsqrt.f32 %v6748_v39  ;;  %991 = vmatpush.bf16.msra.mxu2 %v4332_v62  ;;  %vm477_vm10 = vweird.f32 %v6746_v38  ;;  %v4264_v63 = vor.u32 %v5800_v57, %v4263_v54  ;;  %v4265_v2 = vld [vmem:[#allocation13 + $0x38] sm:$0xf0]  ;;  %v4247_v9 = vld [vmem:[#allocation13 + $0x8] sm:$0xf]  ;;  %v5794_v15 = vld [vmem:[#allocation13 + $0xc] sm:$0xf] }
 0x1d1   :  { %v4393_v8 = vld [vmem:[#allocation13 + $0x138] sm:$0xf0] }
 0x1d2   :  { %978 = vmatpush.bf16.msra.mxu1 %v4456_v59  ;;  %966 = vmatpush.bf16.msra.mxu0 %v4312_v7  ;;  %v5832_v59 = vld [vmem:[#allocation13 + $0x134] sm:$0xf0]  ;;  %v4396_v10 = vor.u32 %v5830_v4, %v4393_v8  ;;  %v4249_v16 = vld [vmem:[#allocation13 + $0x18] sm:$0xf0] }
 0x1d3   :  { %1004 = vmatpush.bf16.msra.mxu3 %v4460_v1  ;;  %v4392_v0 = vor.u32 %v5832_v59, %v4391_v58  ;;  %v5798_v1 = vld [vmem:[#allocation13 + $0x2c] sm:$0xf]  ;;  %v4252_v23 = vor.u32 %v5794_v15, %v4249_v16  ;;  %v498_v27 = vld [vmem:[#allocation12] sm:$0x3] }
 0x1d4   :  { %992 = vmatpush.bf16.msra.mxu2 %v4316_v14  ;;  %v4268_v7 = vor.u32 %v5798_v1, %v4265_v2 }
 0x1d5   :  { %v6752_v6 = vpop.eup %6203 }
 0x1d6   :  { %v6754_v11 = vpop.eup %6205  ;;  %v472_v12 = vmul.f32 %v6752_v6, %v6746_v38  ;;  %979 = vmatpush.bf16.msra.mxu1 %v4440_v13  ;;  %967 = vmatpush.bf16.msra.mxu0 %v4296_v26  ;;  %vm478_vm9 = vweird.f32 %v6752_v6  ;;  %v5828_v13 = vld [vmem:[#allocation13 + $0x114] sm:$0xf0] }
 0x1d7   :  { %v482_v17 = vmul.f32 %v6754_v11, %v6748_v39  ;;  %vm488_vm5 = vweird.f32 %v6754_v11  ;;  %1005 = vmatpush.bf16.msra.mxu3 %v4444_v18  ;;  %v4280_v39 = vor.u32 %v5804_v42, %v4279_v36  ;;  %vm479_vm11 = vmor %vm477_vm10, %vm478_vm9  ;;  %vm1138_vm10 = vcmask 1041408  }
 0x1d8   :  { %v473_v19 = vmul.f32 %v6752_v6, %v472_v12  ;;  %vm6766_vm7 = vmor %vm487_vm6, %vm488_vm5  ;;  %993 = vmatpush.bf16.msra.mxu2 %v4300_v34  ;;  %v4375_v12 = vld [vmem:[#allocation13 + $0x108] sm:$0xf] }
 0x1d9   :  { %v483_v20 = vmul.f32 %v6754_v11, %v482_v17  ;;  %v5826_v17 = vld [vmem:[#allocation13 + $0x10c] sm:$0xf]  ;;  %v4376_v21 = vor.u32 %v5828_v13, %v4375_v12 }
 0x1da   :  { %v474_v25 = vmul.f32 0.5, %v473_v19  ;;  %980 = vmatpush.bf16.msra.mxu1 %v4424_v30  ;;  %968 = vmatpush.bf16.msra.mxu0 %v4280_v39 }
 0x1db   :  { %v484_v29 = vmul.f32 0.5, %v483_v20  ;;  %1006 = vmatpush.bf16.msra.mxu3 %v4428_v41  ;;  %v4377_v20 = vld [vmem:[#allocation13 + $0x118] sm:$0xf0] }
 0x1dc   :  { %v475_v33 = vsub.f32 1.5, %v474_v25  ;;  %994 = vmatpush.bf16.msra.mxu2 %v4284_v51  ;;  %v4380_v25 = vor.u32 %v5826_v17, %v4377_v20 }
 0x1dd   :  { %v485_v37 = vsub.f32 1.5, %v484_v29 }
 0x1de   :  { %v476_v47 = vmul.f32 %v6752_v6, %v475_v33  ;;  %981 = vmatpush.bf16.msra.mxu1 %v4408_v50  ;;  %969 = vmatpush.bf16.msra.mxu0 %v4264_v63 }
 0x1df   :  { %v486_v48 = vmul.f32 %v6754_v11, %v485_v37  ;;  %1007 = vmatpush.bf16.msra.mxu3 %v4412_v56 }
 0x1e0   :  { %v480_v38 = vsel %vm479_vm11, %v6752_v6, %v476_v47  ;;  %995 = vmatpush.bf16.msra.mxu2 %v4268_v7 }
 0x1e1   :  { %v490_v62 = vsel %vm6766_vm7, %v6754_v11, %v486_v48  ;;  %v5796_v11 = vld [vmem:[#allocation13 + $0x14] sm:$0xf0]  ;;  %vm1136_vm7 = vcmask 1042434  }
 0x1e2   :  { %v493_v5 = vrot.slane %v490_v62, 7  ;;  %982 = vmatpush.bf16.msra.mxu1 %v4392_v0  ;;  %v4248_v19 = vor.u32 %v5796_v11, %v4247_v9 }
 0x1e3   :  { %1008 = vmatpush.bf16.msra.mxu3 %v4396_v10 }
 0x1e4   :  { %v495_v14 = vsel %vm494_vm8, %v480_v38, %v493_v5  ;;  %970 = vmatpush.bf16.msra.mxu0 %v4248_v19  ;;  %996 = vmatpush.bf16.msra.mxu2 %v4252_v23 }
 0x1e5   :  { %v497_v18 = vmul.f32 %v495_v14, %v468_v55 }
 0x1e6   :  { %983 = vmatpush.bf16.msra.mxu1 %v4376_v21 }
 0x1e7   :  { %v500_v24 = vperm.slane %v497_v18, 0  ;;  %v501_v6 = vperm.slane %v497_v18, 1  ;;  %1009 = vmatpush.bf16.msra.mxu3 %v4380_v25 }
 0x1e9   :  { %v505_v26 = vmul.f32 %v501_v6, %v6738_v3  ;;  %v504_v28 = vmul.f32 %v500_v24, %v6735_v22  ;;  %v513_v32 = vmul.f32 %v501_v6, %v6716_v61  ;;  %v512_v34 = vmul.f32 %v500_v24, %v6714_v60 }
 0x1eb   :  { %v508_v29 = vrot.slane %v505_v26, 7 }
 0x1ed   :  { %v509_v30 = vsel %vm494_vm8, %v504_v28, %v508_v29 }
 0x1ee   :  { %v511_v31 = vsub.f32 %v498_v27, %v509_v30 }
 0x1f0   :  { %v516_v33 = vperm.slane %v511_v31, 1  ;;  %v515_v35 = vperm.slane %v511_v31, 0 }
 0x1f2   :  { %v520_v36 = vadd.f32 %v516_v33, %v513_v32  ;;  %v519_v37 = vadd.f32 %v515_v35, %v512_v34 }
 0x1f4   :  { %v522_v3 = vmul.f32 0.2, %v520_v36  ;;  %v521_v40 = vmul.f32 0.2, %v519_v37 }
 0x1f6   :  { %v523_v41 = vmax.f32 %v519_v37, %v521_v40  ;;  %v524_v42 = vmax.f32 %v520_v36, %v522_v3 }
 0x1f8   :  { %v525_v43 = vpack.c.bf16 %v523_v41, %v523_v41  ;;  %v526_v39 = vpack.c.bf16 %v524_v42, %v524_v42 }
 0x1fa   :  { %919 = vmatmul.bf16.vlgmr.msrb.gmra.mxu0 %v525_v43  ;;  %932 = vmatmul.bf16.vlgmr.msrb.gmra.mxu1 %v526_v39 }
 0x1fb   :  { %945 = vmatmul.bf16.vlgmr.msrb.gmra.mxu2 %v525_v43  ;;  %958 = vmatmul.bf16.vlgmr.msrb.gmra.mxu3 %v526_v39 }
 0x20a   :  { %971 = vmatmul.bf16.vlgmr.msra.gmra.mxu0 %v525_v43  ;;  %984 = vmatmul.bf16.vlgmr.msra.gmra.mxu1 %v526_v39 }
 0x20b   :  { %997 = vmatmul.bf16.vlgmr.msra.gmra.mxu2 %v525_v43  ;;  %1010 = vmatmul.bf16.vlgmr.msra.gmra.mxu3 %v526_v39 }
 0x277   :  { %v920_v60 = vpop.f32.mrf.mxu0  ;;  %v933_v61 = vpop.f32.mrf.mxu1 }
 0x278   :  { %v6792_v22 = vadd.f32 %v933_v61, %v920_v60 }
 0x27a   :  { %v1015_v44 = vrot.slane %v6792_v22, 4  ;;  %v1043_v45 = vmul.f32 %v6792_v22, %v6792_v22 }
 0x27c   :  { %v1016_v46 = vadd.f32 %v1015_v44, %v6792_v22  ;;  %v1047_v47 = vrot.slane %v1043_v45, 4 }
 0x27e   :  { %v1017_v48 = vrot.slane %v1016_v46, 2  ;;  %v1048_v50 = vadd.f32 %v1047_v47, %v1043_v45  ;;  %v946_v51 = vpop.f32.mrf.mxu2  ;;  %v959_v52 = vpop.f32.mrf.mxu3 }
 0x27f   :  { %v6798_v53 = vadd.f32 %v959_v52, %v946_v51  ;;  %v922_v54 = vpop.f32.mrf.mxu0  ;;  %v935_v55 = vpop.f32.mrf.mxu1 }
 0x280   :  { %v1049_v56 = vrot.slane %v1048_v50, 2  ;;  %v1018_v57 = vadd.f32 %v1017_v48, %v1016_v46 }
 0x281   :  { %v1021_v58 = vrot.slane %v6798_v53, 4  ;;  %v1044_v59 = vmul.f32 %v6798_v53, %v6798_v53 }
 0x282   :  { %v1050_v0 = vadd.f32 %v1049_v56, %v1048_v50  ;;  %v1019_v1 = vrot.slane %v1018_v57, 1 }
 0x283   :  { %v1022_v62 = vadd.f32 %v1021_v58, %v6798_v53  ;;  %v1053_v63 = vrot.slane %v1044_v59, 4 }
 0x284   :  { %v1051_v11 = vrot.slane %v1050_v0, 1  ;;  %v1020_v13 = vadd.f32 %v1019_v1, %v1018_v57 }
 0x285   :  { %v1023_v2 = vrot.slane %v1022_v62, 2  ;;  %v1054_v4 = vadd.f32 %v1053_v63, %v1044_v59 }
 0x286   :  { %v948_v5 = vpop.f32.mrf.mxu2  ;;  %v961_v7 = vpop.f32.mrf.mxu3  ;;  %v1052_v20 = vadd.f32 %v1051_v11, %v1050_v0  ;;  %v6811_v24 = vmul.f32 %v1020_v13, %v6732_v49 }
 0x287   :  { %v1024_v8 = vadd.f32 %v1023_v2, %v1022_v62  ;;  %v1055_v9 = vrot.slane %v1054_v4, 2  ;;  %v972_v38 = vpop.f32.mrf.mxu0  ;;  %v985_v10 = vpop.f32.mrf.mxu1 }
 0x288   :  { %v6804_v12 = vadd.f32 %v985_v10, %v972_v38  ;;  %v1071_v35 = vmul.f32 %v1052_v20, %v6732_v49  ;;  %v1075_v3 = vmul.f32 %v6811_v24, %v6811_v24 }
 0x289   :  { %v1025_v14 = vrot.slane %v1024_v8, 1  ;;  %v1056_v15 = vadd.f32 %v1055_v9, %v1054_v4 }
 0x28a   :  { %v1027_v16 = vrot.slane %v6804_v12, 4  ;;  %v1045_v17 = vmul.f32 %v6804_v12, %v6804_v12  ;;  %v1079_v47 = vsub.f32 %v1071_v35, %v1075_v3 }
 0x28b   :  { %v1026_v18 = vadd.f32 %v1025_v14, %v1024_v8  ;;  %v1057_v19 = vrot.slane %v1056_v15, 1 }
 0x28c   :  { %v1028_v21 = vadd.f32 %v1027_v16, %v6804_v12  ;;  %v1059_v23 = vrot.slane %v1045_v17, 4  ;;  %v1084_v62 = vadd.f32 0.8, %v1079_v47 }
 0x28d   :  { %v6814_v6 = vmul.f32 %v1026_v18, %v6732_v49  ;;  %v1058_v25 = vadd.f32 %v1057_v19, %v1056_v15 }
 0x28e   :  { %v1029_v26 = vrot.slane %v1028_v21, 2  ;;  %v1060_v27 = vadd.f32 %v1059_v23, %v1045_v17  ;;  %v998_v28 = vpop.f32.mrf.mxu2  ;;  %v1011_v29 = vpop.f32.mrf.mxu3  ;;  %vm1094_vm6 = vweird.f32 %v1084_v62 }
 0x28f   :  { %v1072_v30 = vmul.f32 %v1058_v25, %v6732_v49  ;;  %v1076_v31 = vmul.f32 %v6814_v6, %v6814_v6  ;;  %v6819_v32 = vadd.f32 %v1011_v29, %v998_v28  ;;  %v974_v33 = vpop.f32.mrf.mxu0  ;;  %v987_v34 = vpop.f32.mrf.mxu1 }
 0x290   :  { %v1030_v36 = vadd.f32 %v1029_v26, %v1028_v21  ;;  %v1061_v37 = vrot.slane %v1060_v27, 2 }
 0x291   :  { %v1080_v40 = vsub.f32 %v1072_v30, %v1076_v31  ;;  %v1033_v41 = vrot.slane %v6819_v32, 4  ;;  %v1046_v42 = vmul.f32 %v6819_v32, %v6819_v32 }
 0x292   :  { %v1031_v43 = vrot.slane %v1030_v36, 1  ;;  %v1062_v39 = vadd.f32 %v1061_v37, %v1060_v27 }
 0x293   :  { %v1085_v60 = vadd.f32 0.8, %v1080_v40  ;;  %v1034_v61 = vadd.f32 %v1033_v41, %v6819_v32  ;;  %v1065_v44 = vrot.slane %v1046_v42, 4 }
 0x294   :  { %v1032_v45 = vadd.f32 %v1031_v43, %v1030_v36  ;;  %v1063_v46 = vrot.slane %v1062_v39, 1 }
 0x295   :  { %v1035_v51 = vrot.slane %v1034_v61, 2  ;;  %v1066_v52 = vadd.f32 %v1065_v44, %v1046_v42  ;;  %6207 = vrsqrt.f32 %v1085_v60  ;;  %vm1104_vm13 = vweird.f32 %v1085_v60  ;;  %v1083_v44 = vld [vmem:[#allocation15] sm:$0xf] }
 0x296   :  { %v6829_v48 = vmul.f32 %v1032_v45, %v6732_v49  ;;  %v1064_v50 = vadd.f32 %v1063_v46, %v1062_v39  ;;  %v1000_v54 = vpop.f32.mrf.mxu2  ;;  %v1013_v55 = vpop.f32.mrf.mxu3  ;;  %6209 = vrsqrt.f32 %v1084_v62 }
 0x297   :  { %v1036_v58 = vadd.f32 %v1035_v51, %v1034_v61  ;;  %v1067_v59 = vrot.slane %v1066_v52, 2 }
 0x298   :  { %v1073_v56 = vmul.f32 %v1064_v50, %v6732_v49  ;;  %v1077_v57 = vmul.f32 %v6829_v48, %v6829_v48 }
 0x299   :  { %v1037_v0 = vrot.slane %v1036_v58, 1  ;;  %v1068_v1 = vadd.f32 %v1067_v59, %v1066_v52 }
 0x29a   :  { %v1081_v63 = vsub.f32 %v1073_v56, %v1077_v57 }
 0x29b   :  { %v1038_v4 = vadd.f32 %v1037_v0, %v1036_v58  ;;  %v6208_v5 = vpop.eup %6207  ;;  %v1069_v7 = vrot.slane %v1068_v1, 1 }
 0x29c   :  { %v1086_v2 = vadd.f32 0.8, %v1081_v63  ;;  %v1099_v38 = vmul.f32 %v6208_v5, %v1085_v60  ;;  %v6210_v13 = vpop.eup %6209  ;;  %vm1105_vm12 = vweird.f32 %v6208_v5 }
 0x29d   :  { %v1042_v8 = vmul.f32 %v1038_v4, %v6732_v49  ;;  %v1070_v9 = vadd.f32 %v1069_v7, %v1068_v1  ;;  %v1089_v19 = vmul.f32 %v6210_v13, %v1084_v62  ;;  %vm1106_vm15 = vmor %vm1104_vm13, %vm1105_vm12  ;;  %vm1095_vm2 = vweird.f32 %v6210_v13 }
 0x29e   :  { %6211 = vrsqrt.f32 %v1086_v2  ;;  %v1100_v16 = vmul.f32 %v6208_v5, %v1099_v38  ;;  %vm1114_vm0 = vweird.f32 %v1086_v2  ;;  %vm1096_vm9 = vmor %vm1094_vm6, %vm1095_vm2 }
 0x29f   :  { %v1078_v10 = vmul.f32 %v1042_v8, %v1042_v8  ;;  %v1074_v11 = vmul.f32 %v1070_v9, %v6732_v49  ;;  %v1090_v23 = vmul.f32 %v6210_v13, %v1089_v19 }
 0x2a0   :  { %v1101_v21 = vmul.f32 0.5, %v1100_v16 }
 0x2a1   :  { %v1082_v14 = vsub.f32 %v1074_v11, %v1078_v10  ;;  %v1091_v28 = vmul.f32 0.5, %v1090_v23 }
 0x2a2   :  { %v1102_v26 = vsub.f32 1.5, %v1101_v21 }
 0x2a3   :  { %v1087_v18 = vadd.f32 0.8, %v1082_v14  ;;  %v1092_v34 = vsub.f32 1.5, %v1091_v28 }
 0x2a4   :  { %v6212_v15 = vpop.eup %6211  ;;  %v1103_v31 = vmul.f32 %v6208_v5, %v1102_v26 }
 0x2a5   :  { %v1109_v17 = vmul.f32 %v6212_v15, %v1086_v2  ;;  %6213 = vrsqrt.f32 %v1087_v18  ;;  %vm1115_vm14 = vweird.f32 %v6212_v15  ;;  %v1093_v40 = vmul.f32 %v6210_v13, %v1092_v34  ;;  %v1142_v2 = vld [vmem:[#allocation16] sm:$0xf] }
 0x2a6   :  { %v1107_v37 = vsel %vm1106_vm15, %v6208_v5, %v1103_v31  ;;  %vm1116_vm3 = vmor %vm1114_vm0, %vm1115_vm14  ;;  %vm1124_vm4 = vweird.f32 %v1087_v18 }
 0x2a7   :  { %v1110_v20 = vmul.f32 %v6212_v15, %v1109_v17  ;;  %v1132_v43 = vrot.slane %v1107_v37, 7  ;;  %v1097_v45 = vsel %vm1096_vm9, %v6210_v13, %v1093_v40 }
 0x2a9   :  { %v1111_v25 = vmul.f32 0.5, %v1110_v20  ;;  %v1135_v46 = vsel %vm494_vm8, %v1097_v45, %v1132_v43 }
 0x2ab   :  { %v6214_v27 = vpop.eup %6213  ;;  %v1112_v29 = vsub.f32 1.5, %v1111_v25 }
 0x2ac   :  { %v1119_v30 = vmul.f32 %v6214_v27, %v1087_v18  ;;  %vm1125_vm1 = vweird.f32 %v6214_v27 }
 0x2ad   :  { %v1113_v35 = vmul.f32 %v6212_v15, %v1112_v29  ;;  %vm1126_vm5 = vmor %vm1124_vm4, %vm1125_vm1 }
 0x2ae   :  { %v1120_v33 = vmul.f32 %v6214_v27, %v1119_v30 }
 0x2af   :  { %v1117_v41 = vsel %vm1116_vm3, %v6212_v15, %v1113_v35 }
 0x2b0   :  { %v1121_v36 = vmul.f32 0.5, %v1120_v33  ;;  %v1133_v60 = vrot.slane %v1117_v41, 6 }
 0x2b2   :  { %v1122_v3 = vsub.f32 1.5, %v1121_v36 }
 0x2b4   :  { %v1123_v42 = vmul.f32 %v6214_v27, %v1122_v3 }
 0x2b6   :  { %v1127_v39 = vsel %vm1126_vm5, %v6214_v27, %v1123_v42 }
 0x2b7   :  { %v1134_v61 = vrot.slane %v1127_v39, 5 }
 0x2b9   :  { %v1137_v47 = vsel %vm1136_vm7, %v1133_v60, %v1134_v61 }
 0x2ba   :  { %v1139_v50 = vsel %vm1138_vm10, %v1135_v46, %v1137_v47 }
 0x2bb   :  { %v1141_v51 = vmul.f32 %v1139_v50, %v1083_v44 }
 0x2bd   :  { %v1144_v52 = vperm.slane %v1141_v51, 0  ;;  %v1145_v54 = vperm.slane %v1141_v51, 1  ;;  %v1146_v55 = vperm.slane %v1141_v51, 2  ;;  %v1147_v56 = vperm.slane %v1141_v51, 3 }
 0x2bf   :  { %v1153_v57 = vmul.f32 %v1145_v54, %v6814_v6  ;;  %v1154_v58 = vmul.f32 %v1146_v55, %v6829_v48  ;;  %v1155_v59 = vmul.f32 %v1147_v56, %v1042_v8  ;;  %v1152_v62 = vmul.f32 %v1144_v52, %v6811_v24 }
 0x2c0   :  { %v1168_v38 = vmul.f32 %v1144_v52, %v6792_v22  ;;  %v1169_v6 = vmul.f32 %v1145_v54, %v6798_v53  ;;  %v1170_v48 = vmul.f32 %v1146_v55, %v6804_v12  ;;  %v1171_v8 = vmul.f32 %v1147_v56, %v6819_v32 }
 0x2c1   :  { %v1160_v63 = vrot.slane %v1153_v57, 7  ;;  %v1161_v0 = vrot.slane %v1154_v58, 6  ;;  %v1162_v1 = vrot.slane %v1155_v59, 5 }
 0x2c3   :  { %v1163_v4 = vsel %vm494_vm8, %v1152_v62, %v1160_v63  ;;  %v1164_v5 = vsel %vm1136_vm7, %v1161_v0, %v1162_v1 }
 0x2c4   :  { %v1165_v7 = vsel %vm1138_vm10, %v1163_v4, %v1164_v5 }
 0x2c5   :  { %v1167_v9 = vsub.f32 %v1142_v2, %v1165_v7 }
 0x2c7   :  { %v1173_v24 = vperm.slane %v1167_v9, 0  ;;  %v1174_v10 = vperm.slane %v1167_v9, 1  ;;  %v1175_v11 = vperm.slane %v1167_v9, 2  ;;  %v1176_v13 = vperm.slane %v1167_v9, 3 }
 0x2c9   :  { %v1181_v14 = vadd.f32 %v1173_v24, %v1168_v38  ;;  %v1182_v15 = vadd.f32 %v1174_v10, %v1169_v6  ;;  %v1183_v16 = vadd.f32 %v1175_v11, %v1170_v48  ;;  %v1184_v17 = vadd.f32 %v1176_v13, %v1171_v8 }
 0x2cb   :  { %v1185_v18 = vmul.f32 0.2, %v1181_v14  ;;  %v1186_v19 = vmul.f32 0.2, %v1182_v15  ;;  %v1187_v20 = vmul.f32 0.2, %v1183_v16 }
 0x2cc   :  { %v1188_v21 = vmul.f32 0.2, %v1184_v17 }
 0x2cd   :  { %v6849_v23 = vmax.f32 %v1181_v14, %v1185_v18  ;;  %v6851_v22 = vmax.f32 %v1182_v15, %v1186_v19  ;;  %v6853_v53 = vmax.f32 %v1183_v16, %v1187_v20 }
 0x2ce   :  { %v6855_v12 = vmax.f32 %v1184_v17, %v1188_v21 }
 0x2cf   :  { %6558 = dma.done.wait [#allocation4], 32768 }
 0x2d0   :  { %6559 = vsyncadd [#allocation4], 4294934528  ;;  %v4719_v32 = vld [vmem:[#allocation2 + $0x1c0] sm:$0xf] }
 0x2d1   :  { %v5917_v25 = vld [vmem:[#allocation2 + $0x1dc] sm:$0xf0] }
 0x2d2   :  { %v4975_v26 = vld [vmem:[#allocation2 + $0x3c0] sm:$0xf]  ;;  %v4720_v27 = vor.u32 %v5917_v25, %v4719_v32 }
 0x2d3   :  { %v5981_v28 = vld [vmem:[#allocation2 + $0x3dc] sm:$0xf0] }
 0x2d4   :  { %v5231_v29 = vld [vmem:[#allocation2 + $0x5c0] sm:$0xf]  ;;  %v4976_v31 = vor.u32 %v5981_v28, %v4975_v26  ;;  %2737 = vmatpush.bf16.msrb.mxu0 %v4720_v27 }
 0x2d5   :  { %v6045_v30 = vld [vmem:[#allocation2 + $0x5dc] sm:$0xf0] }
 0x2d6   :  { %v5232_v33 = vor.u32 %v6045_v30, %v5231_v29  ;;  %v5487_v34 = vld [vmem:[#allocation2 + $0x7c0] sm:$0xf]  ;;  %2750 = vmatpush.bf16.msrb.mxu1 %v4976_v31 }
 0x2d7   :  { %v6109_v35 = vld [vmem:[#allocation2 + $0x7dc] sm:$0xf0] }
 0x2d8   :  { %v4687_v36 = vld [vmem:[#allocation2 + $0x180] sm:$0xf]  ;;  %v5488_v37 = vor.u32 %v6109_v35, %v5487_v34  ;;  %2763 = vmatpush.bf16.msrb.mxu2 %v5232_v33 }
 0x2d9   :  { %v5909_v3 = vld [vmem:[#allocation2 + $0x19c] sm:$0xf0] }
 0x2da   :  { %v4943_v40 = vld [vmem:[#allocation2 + $0x380] sm:$0xf]  ;;  %v4688_v42 = vor.u32 %v5909_v3, %v4687_v36  ;;  %2776 = vmatpush.bf16.msrb.mxu3 %v5488_v37 }
 0x2db   :  { %v5973_v41 = vld [vmem:[#allocation2 + $0x39c] sm:$0xf0] }
 0x2dc   :  { %v4944_v43 = vor.u32 %v5973_v41, %v4943_v40  ;;  %v5199_v39 = vld [vmem:[#allocation2 + $0x580] sm:$0xf]  ;;  %2738 = vmatpush.bf16.msrb.mxu0 %v4688_v42 }
 0x2dd   :  { %v6037_v60 = vld [vmem:[#allocation2 + $0x59c] sm:$0xf0] }
 0x2de   :  { %v5455_v61 = vld [vmem:[#allocation2 + $0x780] sm:$0xf]  ;;  %v5200_v44 = vor.u32 %v6037_v60, %v5199_v39  ;;  %2751 = vmatpush.bf16.msrb.mxu1 %v4944_v43 }
 0x2df   :  { %v6101_v45 = vld [vmem:[#allocation2 + $0x79c] sm:$0xf0] }
 0x2e0   :  { %v4655_v46 = vld [vmem:[#allocation2 + $0x140] sm:$0xf]  ;;  %v5456_v50 = vor.u32 %v6101_v45, %v5455_v61  ;;  %2764 = vmatpush.bf16.msrb.mxu2 %v5200_v44 }
 0x2e1   :  { %v5901_v47 = vld [vmem:[#allocation2 + $0x15c] sm:$0xf0] }
 0x2e2   :  { %v4911_v51 = vld [vmem:[#allocation2 + $0x340] sm:$0xf]  ;;  %v4656_v55 = vor.u32 %v5901_v47, %v4655_v46  ;;  %2777 = vmatpush.bf16.msrb.mxu3 %v5456_v50 }
 0x2e3   :  { %v5965_v52 = vld [vmem:[#allocation2 + $0x35c] sm:$0xf0] }
 0x2e4   :  { %v5167_v54 = vld [vmem:[#allocation2 + $0x540] sm:$0xf]  ;;  %v4912_v59 = vor.u32 %v5965_v52, %v4911_v51  ;;  %2739 = vmatpush.bf16.msrb.mxu0 %v4656_v55 }
 0x2e5   :  { %v6029_v56 = vld [vmem:[#allocation2 + $0x55c] sm:$0xf0] }
 0x2e6   :  { %v5423_v57 = vld [vmem:[#allocation2 + $0x740] sm:$0xf]  ;;  %v5168_v62 = vor.u32 %v6029_v56, %v5167_v54  ;;  %2752 = vmatpush.bf16.msrb.mxu1 %v4912_v59  ;;  %v5913_v59 = vld [vmem:[#allocation2 + $0x1c4] sm:$0xf] }
 0x2e7   :  { %v6093_v58 = vld [vmem:[#allocation2 + $0x75c] sm:$0xf0] }
 0x2e8   :  { %v4623_v63 = vld [vmem:[#allocation2 + $0x100] sm:$0xf]  ;;  %v5424_v2 = vor.u32 %v6093_v58, %v5423_v57  ;;  %2765 = vmatpush.bf16.msrb.mxu2 %v5168_v62  ;;  %v4721_v62 = vld [vmem:[#allocation2 + $0x1e0] sm:$0xf0] }
 0x2e9   :  { %v5893_v0 = vld [vmem:[#allocation2 + $0x11c] sm:$0xf0] }
 0x2ea   :  { %v4879_v1 = vld [vmem:[#allocation2 + $0x300] sm:$0xf]  ;;  %v4624_v6 = vor.u32 %v5893_v0, %v4623_v63  ;;  %2778 = vmatpush.bf16.msrb.mxu3 %v5424_v2  ;;  %v5977_v63 = vld [vmem:[#allocation2 + $0x3c4] sm:$0xf] }
 0x2eb   :  { %v5957_v4 = vld [vmem:[#allocation2 + $0x31c] sm:$0xf0]  ;;  %v6041_v2 = vld [vmem:[#allocation2 + $0x5c4] sm:$0xf] }
 0x2ec   :  { %v5135_v5 = vld [vmem:[#allocation2 + $0x500] sm:$0xf]  ;;  %v4880_v48 = vor.u32 %v5957_v4, %v4879_v1  ;;  %2740 = vmatpush.bf16.msrb.mxu0 %v4624_v6  ;;  %v4977_v1 = vld [vmem:[#allocation2 + $0x3e0] sm:$0xf0] }
 0x2ed   :  { %v6021_v7 = vld [vmem:[#allocation2 + $0x51c] sm:$0xf0]  ;;  %v5233_v4 = vld [vmem:[#allocation2 + $0x5e0] sm:$0xf0] }
 0x2ee   :  { %v5391_v9 = vld [vmem:[#allocation2 + $0x700] sm:$0xf]  ;;  %v5136_v8 = vor.u32 %v6021_v7, %v5135_v5  ;;  %2753 = vmatpush.bf16.msrb.mxu1 %v4880_v48  ;;  %v4724_v48 = vor.u32 %v5913_v59, %v4721_v62  ;;  %v5361_v59 = vld [vmem:[#allocation2 + $0x6e0] sm:$0xf0] }
 0x2ef   :  { %v6085_v38 = vld [vmem:[#allocation2 + $0x71c] sm:$0xf0] }
 0x2f0   :  { %v4591_v24 = vld [vmem:[#allocation2 + $0xc0] sm:$0xf]  ;;  %v5392_v13 = vor.u32 %v6085_v38, %v5391_v9  ;;  %2766 = vmatpush.bf16.msrb.mxu2 %v5136_v8  ;;  %v6105_v9 = vld [vmem:[#allocation2 + $0x7c4] sm:$0xf]  ;;  %v4980_v8 = vor.u32 %v5977_v63, %v4977_v1 }
 0x2f1   :  { %v5885_v10 = vld [vmem:[#allocation2 + $0xdc] sm:$0xf0]  ;;  %v5489_v38 = vld [vmem:[#allocation2 + $0x7e0] sm:$0xf0] }
 0x2f2   :  { %v4847_v11 = vld [vmem:[#allocation2 + $0x2c0] sm:$0xf]  ;;  %v4592_v19 = vor.u32 %v5885_v10, %v4591_v24  ;;  %2779 = vmatpush.bf16.msrb.mxu3 %v5392_v13  ;;  %v5236_v24 = vor.u32 %v6041_v2, %v5233_v4  ;;  %v5905_v10 = vld [vmem:[#allocation2 + $0x184] sm:$0xf] }
 0x2f3   :  { %v5949_v14 = vld [vmem:[#allocation2 + $0x2dc] sm:$0xf0]  ;;  %v5969_v13 = vld [vmem:[#allocation2 + $0x384] sm:$0xf] }
 0x2f4   :  { %v5103_v15 = vld [vmem:[#allocation2 + $0x4c0] sm:$0xf]  ;;  %v4848_v20 = vor.u32 %v5949_v14, %v4847_v11  ;;  %2741 = vmatpush.bf16.msrb.mxu0 %v4592_v19  ;;  %v4689_v11 = vld [vmem:[#allocation2 + $0x1a0] sm:$0xf0]  ;;  %v5492_v14 = vor.u32 %v6105_v9, %v5489_v38 }
 0x2f5   :  { %v6013_v16 = vld [vmem:[#allocation2 + $0x4dc] sm:$0xf0]  ;;  %v6097_v19 = vld [vmem:[#allocation2 + $0x784] sm:$0xf] }
 0x2f6   :  { %v5359_v17 = vld [vmem:[#allocation2 + $0x6c0] sm:$0xf]  ;;  %v5104_v21 = vor.u32 %v6013_v16, %v5103_v15  ;;  %2754 = vmatpush.bf16.msrb.mxu1 %v4848_v20  ;;  %v4945_v15 = vld [vmem:[#allocation2 + $0x3a0] sm:$0xf0] }
 0x2f7   :  { %v6077_v18 = vld [vmem:[#allocation2 + $0x6dc] sm:$0xf0]  ;;  %v6033_v16 = vld [vmem:[#allocation2 + $0x584] sm:$0xf] }
 0x2f8   :  { %v4559_v32 = vld [vmem:[#allocation2 + $0x80] sm:$0xf]  ;;  %v5360_v27 = vor.u32 %v6077_v18, %v5359_v17  ;;  %2767 = vmatpush.bf16.msrb.mxu2 %v5104_v21  ;;  %v5201_v17 = vld [vmem:[#allocation2 + $0x5a0] sm:$0xf0]  ;;  %v6859_v18 = vpack.c.bf16 %v6853_v53, %v6853_v53  ;;  %v6863_v21 = vpack.c.bf16 %v6855_v12, %v6855_v12  ;;  %v4948_v53 = vor.u32 %v5969_v13, %v4945_v15 }
 0x2f9   :  { %v5877_v25 = vld [vmem:[#allocation2 + $0x9c] sm:$0xf0]  ;;  %v5457_v20 = vld [vmem:[#allocation2 + $0x7a0] sm:$0xf0] }
 0x2fa   :  { %v4815_v26 = vld [vmem:[#allocation2 + $0x280] sm:$0xf]  ;;  %v4560_v34 = vor.u32 %v5877_v25, %v4559_v32  ;;  %2780 = vmatpush.bf16.msrb.mxu3 %v5360_v27  ;;  %v6867_v32 = vpack.c.bf16 %v6849_v23, %v6849_v23  ;;  %v4692_v25 = vor.u32 %v5905_v10, %v4689_v11  ;;  %v5204_v27 = vor.u32 %v6033_v16, %v5201_v17  ;;  %v4913_v23 = vld [vmem:[#allocation2 + $0x360] sm:$0xf0] }
 0x2fb   :  { %v5941_v28 = vld [vmem:[#allocation2 + $0x29c] sm:$0xf0]  ;;  %v5460_v12 = vor.u32 %v6097_v19, %v5457_v20  ;;  %v5873_v1 = vld [vmem:[#allocation2 + $0x84] sm:$0xf] }
 0x2fc   :  { %v5071_v29 = vld [vmem:[#allocation2 + $0x480] sm:$0xf]  ;;  %v4816_v35 = vor.u32 %v5941_v28, %v4815_v26  ;;  %2742 = vmatpush.bf16.msrb.mxu0 %v4560_v34  ;;  %v6871_v26 = vpack.c.bf16 %v6851_v22, %v6851_v22  ;;  %v5897_v28 = vld [vmem:[#allocation2 + $0x144] sm:$0xf] }
 0x2fd   :  { %v6005_v30 = vld [vmem:[#allocation2 + $0x49c] sm:$0xf0]  ;;  %v6089_v34 = vld [vmem:[#allocation2 + $0x744] sm:$0xf] }
 0x2fe   :  { %v5327_v31 = vld [vmem:[#allocation2 + $0x680] sm:$0xf]  ;;  %v5072_v36 = vor.u32 %v6005_v30, %v5071_v29  ;;  %2755 = vmatpush.bf16.msrb.mxu1 %v4816_v35  ;;  %v4657_v29 = vld [vmem:[#allocation2 + $0x160] sm:$0xf0] }
 0x2ff   :  { %v6069_v33 = vld [vmem:[#allocation2 + $0x69c] sm:$0xf0]  ;;  %v5961_v30 = vld [vmem:[#allocation2 + $0x344] sm:$0xf]  ;;  %v4660_v22 = vor.u32 %v5897_v28, %v4657_v29 }
 0x300   :  { %v4527_v37 = vld [vmem:[#allocation2 + $0x40] sm:$0xf]  ;;  %v5328_v41 = vor.u32 %v6069_v33, %v5327_v31  ;;  %2768 = vmatpush.bf16.msrb.mxu2 %v5072_v36  ;;  %v6025_v31 = vld [vmem:[#allocation2 + $0x544] sm:$0xf]  ;;  %v4916_v36 = vor.u32 %v5961_v30, %v4913_v23 }
 0x301   :  { %v5869_v3 = vld [vmem:[#allocation2 + $0x5c] sm:$0xf0]  ;;  %v5169_v33 = vld [vmem:[#allocation2 + $0x560] sm:$0xf0] }
 0x302   :  { %v4783_v40 = vld [vmem:[#allocation2 + $0x240] sm:$0xf]  ;;  %v4528_v44 = vor.u32 %v5869_v3, %v4527_v37  ;;  %2781 = vmatpush.bf16.msrb.mxu3 %v5328_v41  ;;  %v5425_v35 = vld [vmem:[#allocation2 + $0x760] sm:$0xf0]  ;;  %v5172_v37 = vor.u32 %v6025_v31, %v5169_v33 }
 0x303   :  { %v5933_v42 = vld [vmem:[#allocation2 + $0x25c] sm:$0xf0]  ;;  %v5889_v3 = vld [vmem:[#allocation2 + $0x104] sm:$0xf] }
 0x304   :  { %v5039_v43 = vld [vmem:[#allocation2 + $0x440] sm:$0xf]  ;;  %v4784_v47 = vor.u32 %v5933_v42, %v4783_v40  ;;  %2743 = vmatpush.bf16.msrb.mxu0 %v4528_v44  ;;  %v4625_v40 = vld [vmem:[#allocation2 + $0x120] sm:$0xf0]  ;;  %v5428_v42 = vor.u32 %v6089_v34, %v5425_v35 }
 0x305   :  { %v5997_v39 = vld [vmem:[#allocation2 + $0x45c] sm:$0xf0]  ;;  %v5953_v41 = vld [vmem:[#allocation2 + $0x304] sm:$0xf] }
 0x306   :  { %v5295_v60 = vld [vmem:[#allocation2 + $0x640] sm:$0xf]  ;;  %v5040_v50 = vor.u32 %v5997_v39, %v5039_v43  ;;  %2756 = vmatpush.bf16.msrb.mxu1 %v4784_v47  ;;  %v4881_v43 = vld [vmem:[#allocation2 + $0x320] sm:$0xf0] }
 0x307   :  { %v6061_v61 = vld [vmem:[#allocation2 + $0x65c] sm:$0xf0]  ;;  %v6017_v39 = vld [vmem:[#allocation2 + $0x504] sm:$0xf] }
 0x308   :  { %v4495_v45 = vld [vmem:[#allocation2] sm:$0xf]  ;;  %v5296_v55 = vor.u32 %v6061_v61, %v5295_v60  ;;  %2769 = vmatpush.bf16.msrb.mxu2 %v5040_v50  ;;  %v5137_v60 = vld [vmem:[#allocation2 + $0x520] sm:$0xf0] }
 0x309   :  { %v5861_v46 = vld [vmem:[#allocation2 + $0x1c] sm:$0xf0]  ;;  %v6081_v61 = vld [vmem:[#allocation2 + $0x704] sm:$0xf]  ;;  %v5140_v47 = vor.u32 %v6017_v39, %v5137_v60 }
 0x30a   :  { %v4751_v51 = vld [vmem:[#allocation2 + $0x200] sm:$0xf]  ;;  %v4496_v0 = vor.u32 %v5861_v46, %v4495_v45  ;;  %2782 = vmatpush.bf16.msrb.mxu3 %v5296_v55  ;;  %v5393_v44 = vld [vmem:[#allocation2 + $0x720] sm:$0xf0]  ;;  %v4628_v45 = vor.u32 %v5889_v3, %v4625_v40  ;;  %v4884_v46 = vor.u32 %v5953_v41, %v4881_v43  ;;  %v4983_v3 = vld [vmem:[#allocation2 + $0x3c8] sm:$0xf] }
 0x30b   :  { %v5925_v52 = vld [vmem:[#allocation2 + $0x21c] sm:$0xf0]  ;;  %v5881_v50 = vld [vmem:[#allocation2 + $0xc4] sm:$0xf]  ;;  %v5982_v41 = vld [vmem:[#allocation2 + $0x3e4] sm:$0xf0] }
 0x30c   :  { %v5007_v54 = vld [vmem:[#allocation2 + $0x400] sm:$0xf]  ;;  %v4752_v5 = vor.u32 %v5925_v52, %v4751_v51  ;;  %2744 = vmatpush.bf16.msrb.mxu0 %v4496_v0  ;;  %v4593_v51 = vld [vmem:[#allocation2 + $0xe0] sm:$0xf0]  ;;  %v6046_v43 = vld [vmem:[#allocation2 + $0x5e4] sm:$0xf0] }
 0x30d   :  { %v5989_v56 = vld [vmem:[#allocation2 + $0x41c] sm:$0xf0]  ;;  %v5945_v52 = vld [vmem:[#allocation2 + $0x2c4] sm:$0xf]  ;;  %v4596_v62 = vor.u32 %v5881_v50, %v4593_v51  ;;  %v4695_v51 = vld [vmem:[#allocation2 + $0x188] sm:$0xf] }
 0x30e   :  { %v5263_v57 = vld [vmem:[#allocation2 + $0x600] sm:$0xf]  ;;  %v5008_v7 = vor.u32 %v5989_v56, %v5007_v54  ;;  %2757 = vmatpush.bf16.msrb.mxu1 %v4752_v5  ;;  %v5396_v54 = vor.u32 %v6081_v61, %v5393_v44  ;;  %v4849_v55 = vld [vmem:[#allocation2 + $0x2e0] sm:$0xf0]  ;;  %v5495_v61 = vld [vmem:[#allocation2 + $0x7c8] sm:$0xf] }
 0x30f   :  { %v6053_v58 = vld [vmem:[#allocation2 + $0x61c] sm:$0xf0]  ;;  %2745 = vmatmul.bf16.vlgmr.msrb.gmra.mxu0 %v6867_v32  ;;  %v6009_v56 = vld [vmem:[#allocation2 + $0x4c4] sm:$0xf]  ;;  %v4852_v63 = vor.u32 %v5945_v52, %v4849_v55  ;;  %v6110_v44 = vld [vmem:[#allocation2 + $0x7e4] sm:$0xf0] }
 0x310   :  { %v5264_v6 = vor.u32 %v6053_v58, %v5263_v57  ;;  %2770 = vmatpush.bf16.msrb.mxu2 %v5008_v7  ;;  %2789 = vmatpush.bf16.msra.mxu0 %v4724_v48  ;;  %v5105_v57 = vld [vmem:[#allocation2 + $0x4e0] sm:$0xf0]  ;;  %v5910_v52 = vld [vmem:[#allocation2 + $0x1a4] sm:$0xf0]  ;;  %v5496_v55 = vor.u32 %v6110_v44, %v5495_v61 }
 0x311   :  { %2758 = vmatmul.bf16.vlgmr.msrb.gmra.mxu1 %v6871_v26  ;;  %v6073_v58 = vld [vmem:[#allocation2 + $0x6c4] sm:$0xf]  ;;  %v5108_v0 = vor.u32 %v6009_v56, %v5105_v57  ;;  %v5974_v56 = vld [vmem:[#allocation2 + $0x3a4] sm:$0xf0] }
 0x312   :  { %2783 = vmatpush.bf16.msrb.mxu3 %v5264_v6  ;;  %2802 = vmatpush.bf16.msra.mxu1 %v4980_v8  ;;  %v4561_v2 = vld [vmem:[#allocation2 + $0xa0] sm:$0xf0]  ;;  %v5364_v5 = vor.u32 %v6073_v58, %v5361_v59  ;;  %v5207_v57 = vld [vmem:[#allocation2 + $0x588] sm:$0xf] }
 0x313   :  { %2771 = vmatmul.bf16.vlgmr.msrb.gmra.mxu2 %v6859_v18  ;;  %v5937_v4 = vld [vmem:[#allocation2 + $0x284] sm:$0xf]  ;;  %v4564_v8 = vor.u32 %v5873_v1, %v4561_v2  ;;  %v6038_v58 = vld [vmem:[#allocation2 + $0x5a4] sm:$0xf0] }
 0x314   :  { %2815 = vmatpush.bf16.msra.mxu2 %v5236_v24  ;;  %2790 = vmatpush.bf16.msra.mxu0 %v4692_v25  ;;  %v4817_v7 = vld [vmem:[#allocation2 + $0x2a0] sm:$0xf0]  ;;  %v5463_v59 = vld [vmem:[#allocation2 + $0x788] sm:$0xf]  ;;  %v5208_v1 = vor.u32 %v6038_v58, %v5207_v57 }
 0x315   :  { %2784 = vmatmul.bf16.vlgmr.msrb.gmra.mxu3 %v6863_v21  ;;  %v6001_v9 = vld [vmem:[#allocation2 + $0x484] sm:$0xf]  ;;  %v4820_v24 = vor.u32 %v5937_v4, %v4817_v7  ;;  %v4663_v2 = vld [vmem:[#allocation2 + $0x148] sm:$0xf] }
 0x316   :  { %2828 = vmatpush.bf16.msra.mxu3 %v5492_v14  ;;  %2803 = vmatpush.bf16.msra.mxu1 %v4948_v53  ;;  %v5073_v38 = vld [vmem:[#allocation2 + $0x4a0] sm:$0xf0]  ;;  %v5902_v4 = vld [vmem:[#allocation2 + $0x164] sm:$0xf0] }
 0x317   :  { %v6065_v6 = vld [vmem:[#allocation2 + $0x684] sm:$0xf]  ;;  %v5076_v10 = vor.u32 %v6001_v9, %v5073_v38  ;;  %v5966_v9 = vld [vmem:[#allocation2 + $0x364] sm:$0xf0] }
 0x318   :  { %2816 = vmatpush.bf16.msra.mxu2 %v5204_v27  ;;  %2791 = vmatpush.bf16.msra.mxu0 %v4660_v22  ;;  %v5329_v48 = vld [vmem:[#allocation2 + $0x6a0] sm:$0xf0]  ;;  %v5175_v38 = vld [vmem:[#allocation2 + $0x548] sm:$0xf] }
 0x319   :  { %v5865_v11 = vld [vmem:[#allocation2 + $0x44] sm:$0xf]  ;;  %v5332_v15 = vor.u32 %v6065_v6, %v5329_v48  ;;  %v6030_v6 = vld [vmem:[#allocation2 + $0x564] sm:$0xf0] }
 0x31a   :  { %2829 = vmatpush.bf16.msra.mxu3 %v5460_v12  ;;  %2804 = vmatpush.bf16.msra.mxu1 %v4916_v36  ;;  %v4529_v13 = vld [vmem:[#allocation2 + $0x60] sm:$0xf0]  ;;  %v4727_v36 = vld [vmem:[#allocation2 + $0x1c8] sm:$0xf] }
 0x31b   :  { %v5929_v14 = vld [vmem:[#allocation2 + $0x244] sm:$0xf]  ;;  %v4532_v53 = vor.u32 %v5865_v11, %v4529_v13  ;;  %v5431_v48 = vld [vmem:[#allocation2 + $0x748] sm:$0xf]  ;;  %v5176_v11 = vor.u32 %v6030_v6, %v5175_v38 }
 0x31c   :  { %2817 = vmatpush.bf16.msra.mxu2 %v5172_v37  ;;  %2792 = vmatpush.bf16.msra.mxu0 %v4628_v45  ;;  %v4785_v16 = vld [vmem:[#allocation2 + $0x260] sm:$0xf0]  ;;  %v5918_v37 = vld [vmem:[#allocation2 + $0x1e4] sm:$0xf0] }
 0x31d   :  { %v5993_v17 = vld [vmem:[#allocation2 + $0x444] sm:$0xf]  ;;  %v4788_v29 = vor.u32 %v5929_v14, %v4785_v16  ;;  %v4631_v13 = vld [vmem:[#allocation2 + $0x108] sm:$0xf] }
 0x31e   :  { %2830 = vmatpush.bf16.msra.mxu3 %v5428_v42  ;;  %2805 = vmatpush.bf16.msra.mxu1 %v4884_v46  ;;  %v5041_v19 = vld [vmem:[#allocation2 + $0x460] sm:$0xf0]  ;;  %v5239_v42 = vld [vmem:[#allocation2 + $0x5c8] sm:$0xf]  ;;  %v4728_v46 = vor.u32 %v5918_v37, %v4727_v36 }
 0x31f   :  { %v6057_v20 = vld [vmem:[#allocation2 + $0x644] sm:$0xf]  ;;  %v5044_v30 = vor.u32 %v5993_v17, %v5041_v19  ;;  %v5240_v50 = vor.u32 %v6046_v43, %v5239_v42  ;;  %v5894_v14 = vld [vmem:[#allocation2 + $0x124] sm:$0xf0] }
 0x320   :  { %2818 = vmatpush.bf16.msra.mxu2 %v5140_v47  ;;  %2793 = vmatpush.bf16.msra.mxu0 %v4596_v62  ;;  %v5297_v25 = vld [vmem:[#allocation2 + $0x660] sm:$0xf0]  ;;  %v4984_v47 = vor.u32 %v5982_v41, %v4983_v3  ;;  %v6102_v62 = vld [vmem:[#allocation2 + $0x7a4] sm:$0xf0] }
 0x321   :  { %v5857_v27 = vld [vmem:[#allocation2 + $0x4] sm:$0xf]  ;;  %v5300_v33 = vor.u32 %v6057_v20, %v5297_v25  ;;  %v5464_v7 = vor.u32 %v6102_v62, %v5463_v59  ;;  %v5958_v17 = vld [vmem:[#allocation2 + $0x324] sm:$0xf0] }
 0x322   :  { %2831 = vmatpush.bf16.msra.mxu3 %v5396_v54  ;;  %2806 = vmatpush.bf16.msra.mxu1 %v4852_v63  ;;  %v4497_v28 = vld [vmem:[#allocation2 + $0x20] sm:$0xf0]  ;;  %v4951_v54 = vld [vmem:[#allocation2 + $0x388] sm:$0xf]  ;;  %v4696_v63 = vor.u32 %v5910_v52, %v4695_v51 }
 0x323   :  { %v5921_v12 = vld [vmem:[#allocation2 + $0x204] sm:$0xf]  ;;  %v4500_v40 = vor.u32 %v5857_v27, %v4497_v28  ;;  %v5143_v19 = vld [vmem:[#allocation2 + $0x508] sm:$0xf]  ;;  %v4632_v27 = vor.u32 %v5894_v14, %v4631_v13  ;;  %v5978_v13 = vld [vmem:[#allocation2 + $0x3cc] sm:$0xf] }
 0x324   :  { %2819 = vmatpush.bf16.msra.mxu2 %v5108_v0  ;;  %2794 = vmatpush.bf16.msra.mxu0 %v4564_v8  ;;  %v4753_v23 = vld [vmem:[#allocation2 + $0x220] sm:$0xf0]  ;;  %v4952_v0 = vor.u32 %v5974_v56, %v4951_v54  ;;  %v6094_v8 = vld [vmem:[#allocation2 + $0x764] sm:$0xf0] }
 0x325   :  { %v5985_v31 = vld [vmem:[#allocation2 + $0x404] sm:$0xf]  ;;  %v4756_v39 = vor.u32 %v5921_v12, %v4753_v23  ;;  %v5432_v16 = vor.u32 %v6094_v8, %v5431_v48  ;;  %v6022_v20 = vld [vmem:[#allocation2 + $0x524] sm:$0xf0] }
 0x326   :  { %2832 = vmatpush.bf16.msra.mxu3 %v5364_v5  ;;  %2807 = vmatpush.bf16.msra.mxu1 %v4820_v24  ;;  %v5009_v34 = vld [vmem:[#allocation2 + $0x420] sm:$0xf0]  ;;  %v4919_v5 = vld [vmem:[#allocation2 + $0x348] sm:$0xf]  ;;  %v4664_v24 = vor.u32 %v5902_v4, %v4663_v2 }
 0x327   :  { %v6049_v35 = vld [vmem:[#allocation2 + $0x604] sm:$0xf]  ;;  %v5012_v60 = vor.u32 %v5985_v31, %v5009_v34  ;;  %v5399_v25 = vld [vmem:[#allocation2 + $0x708] sm:$0xf] }
 0x328   :  { %2820 = vmatpush.bf16.msra.mxu2 %v5076_v10  ;;  %v5265_v22 = vld [vmem:[#allocation2 + $0x620] sm:$0xf0]  ;;  %2795 = vmatpush.bf16.msra.mxu0 %v4532_v53  ;;  %v4920_v10 = vor.u32 %v5966_v9, %v4919_v5  ;;  %v6086_v53 = vld [vmem:[#allocation2 + $0x724] sm:$0xf0] }
 0x329   :  { %v5268_v45 = vor.u32 %v6049_v35, %v5265_v22  ;;  %v5886_v12 = vld [vmem:[#allocation2 + $0xe4] sm:$0xf0]  ;;  %v5400_v31 = vor.u32 %v6086_v53, %v5399_v25  ;;  %v6106_v25 = vld [vmem:[#allocation2 + $0x7cc] sm:$0xf] }
 0x32a   :  { %2833 = vmatpush.bf16.msra.mxu3 %v5332_v15  ;;  %2808 = vmatpush.bf16.msra.mxu1 %v4788_v29  ;;  %v4887_v15 = vld [vmem:[#allocation2 + $0x308] sm:$0xf]  ;;  %v5144_v29 = vor.u32 %v6022_v20, %v5143_v19  ;;  %v5497_v53 = vld [vmem:[#allocation2 + $0x7e8] sm:$0xf0] }
 0x32b   :  { %v4888_v28 = vor.u32 %v5958_v17, %v4887_v15  ;;  %v4855_v23 = vld [vmem:[#allocation2 + $0x2c8] sm:$0xf]  ;;  %v4985_v15 = vld [vmem:[#allocation2 + $0x3e8] sm:$0xf0] }
 0x32c   :  { %2821 = vmatpush.bf16.msra.mxu2 %v5044_v30  ;;  %2796 = vmatpush.bf16.msra.mxu0 %v4500_v40  ;;  %v4599_v30 = vld [vmem:[#allocation2 + $0xc8] sm:$0xf]  ;;  %v5241_v17 = vld [vmem:[#allocation2 + $0x5e8] sm:$0xf0] }
 0x32d   :  { %v5111_v34 = vld [vmem:[#allocation2 + $0x4c8] sm:$0xf]  ;;  %v4600_v37 = vor.u32 %v5886_v12, %v4599_v30  ;;  %v5906_v12 = vld [vmem:[#allocation2 + $0x18c] sm:$0xf] }
 0x32e   :  { %2834 = vmatpush.bf16.msra.mxu3 %v5300_v33  ;;  %2809 = vmatpush.bf16.msra.mxu1 %v4756_v39  ;;  %v5950_v33 = vld [vmem:[#allocation2 + $0x2e4] sm:$0xf0] }
 0x32f   :  { %2797 = vmatmul.bf16.vlgmr.msra.gmra.mxu0 %v6867_v32  ;;  %v6014_v35 = vld [vmem:[#allocation2 + $0x4e4] sm:$0xf0]  ;;  %v4856_v3 = vor.u32 %v5950_v33, %v4855_v23  ;;  %v4697_v23 = vld [vmem:[#allocation2 + $0x1a8] sm:$0xf0]  ;;  %v5500_v33 = vor.u32 %v6106_v25, %v5497_v53 }
 0x330   :  { %2822 = vmatpush.bf16.msra.mxu2 %v5012_v60  ;;  %2841 = vmatpush.bf16.msrb.mxu0 %v4728_v46  ;;  %v5367_v22 = vld [vmem:[#allocation2 + $0x6c8] sm:$0xf]  ;;  %v5112_v40 = vor.u32 %v6014_v35, %v5111_v34  ;;  %v4953_v34 = vld [vmem:[#allocation2 + $0x3a8] sm:$0xf0] }
 0x331   :  { %2810 = vmatmul.bf16.vlgmr.msra.gmra.mxu1 %v6871_v26  ;;  %v6078_v36 = vld [vmem:[#allocation2 + $0x6e4] sm:$0xf0]  ;;  %v6034_v35 = vld [vmem:[#allocation2 + $0x58c] sm:$0xf] }
 0x332   :  { %2835 = vmatpush.bf16.msra.mxu3 %v5268_v45  ;;  %2854 = vmatpush.bf16.msrb.mxu1 %v4984_v47  ;;  %v4567_v41 = vld [vmem:[#allocation2 + $0x88] sm:$0xf]  ;;  %v5368_v39 = vor.u32 %v6078_v36, %v5367_v22  ;;  %v5209_v22 = vld [vmem:[#allocation2 + $0x5a8] sm:$0xf0] }
 0x333   :  { %2823 = vmatmul.bf16.vlgmr.msra.gmra.mxu2 %v6859_v18  ;;  %v5878_v42 = vld [vmem:[#allocation2 + $0xa4] sm:$0xf0]  ;;  %v6098_v36 = vld [vmem:[#allocation2 + $0x78c] sm:$0xf] }
 0x334   :  { %2867 = vmatpush.bf16.msrb.mxu2 %v5240_v50  ;;  %2842 = vmatpush.bf16.msrb.mxu0 %v4696_v63  ;;  %v4823_v43 = vld [vmem:[#allocation2 + $0x288] sm:$0xf]  ;;  %v4568_v47 = vor.u32 %v5878_v42, %v4567_v41  ;;  %v5212_v41 = vor.u32 %v6034_v35, %v5209_v22  ;;  %v5898_v42 = vld [vmem:[#allocation2 + $0x14c] sm:$0xf] }
 0x335   :  { %2836 = vmatmul.bf16.vlgmr.msra.gmra.mxu3 %v6863_v21  ;;  %v5942_v60 = vld [vmem:[#allocation2 + $0x2a4] sm:$0xf0]  ;;  %v6002_v25 = vld [vmem:[#allocation2 + $0x48c] sm:$0xf] }
 0x336   :  { %2880 = vmatpush.bf16.msrb.mxu3 %v5496_v55  ;;  %2855 = vmatpush.bf16.msrb.mxu1 %v4952_v0  ;;  %v5079_v61 = vld [vmem:[#allocation2 + $0x488] sm:$0xf]  ;;  %v4824_v50 = vor.u32 %v5942_v60, %v4823_v43  ;;  %v4665_v43 = vld [vmem:[#allocation2 + $0x168] sm:$0xf0] }
 0x337   :  { %v6006_v44 = vld [vmem:[#allocation2 + $0x4a4] sm:$0xf0]  ;;  %v5081_v53 = vld [vmem:[#allocation2 + $0x4a8] sm:$0xf0] }
 0x338   :  { %2868 = vmatpush.bf16.msrb.mxu2 %v5208_v1  ;;  %2843 = vmatpush.bf16.msrb.mxu0 %v4664_v24  ;;  %v5335_v45 = vld [vmem:[#allocation2 + $0x688] sm:$0xf]  ;;  %v5080_v51 = vor.u32 %v6006_v44, %v5079_v61  ;;  %v4921_v61 = vld [vmem:[#allocation2 + $0x368] sm:$0xf0] }
 0x339   :  { %v6070_v46 = vld [vmem:[#allocation2 + $0x6a4] sm:$0xf0]  ;;  %v6026_v44 = vld [vmem:[#allocation2 + $0x54c] sm:$0xf] }
 0x33a   :  { %2881 = vmatpush.bf16.msrb.mxu3 %v5464_v7  ;;  %2856 = vmatpush.bf16.msrb.mxu1 %v4920_v10  ;;  %v4535_v52 = vld [vmem:[#allocation2 + $0x48] sm:$0xf]  ;;  %v5336_v56 = vor.u32 %v6070_v46, %v5335_v45  ;;  %v5914_v10 = vld [vmem:[#allocation2 + $0x1cc] sm:$0xf] }
 0x33b   :  { %v5870_v54 = vld [vmem:[#allocation2 + $0x64] sm:$0xf0]  ;;  %v5177_v45 = vld [vmem:[#allocation2 + $0x568] sm:$0xf0] }
 0x33c   :  { %2869 = vmatpush.bf16.msrb.mxu2 %v5176_v11  ;;  %2844 = vmatpush.bf16.msrb.mxu0 %v4632_v27  ;;  %v4791_v55 = vld [vmem:[#allocation2 + $0x248] sm:$0xf]  ;;  %v4536_v0 = vor.u32 %v5870_v54, %v4535_v52  ;;  %v4729_v11 = vld [vmem:[#allocation2 + $0x1e8] sm:$0xf0]  ;;  %v5180_v52 = vor.u32 %v6026_v44, %v5177_v45 }
 0x33d   :  { %v5934_v57 = vld [vmem:[#allocation2 + $0x264] sm:$0xf0]  ;;  %v6090_v46 = vld [vmem:[#allocation2 + $0x74c] sm:$0xf] }
 0x33e   :  { %2882 = vmatpush.bf16.msrb.mxu3 %v5432_v16  ;;  %2857 = vmatpush.bf16.msrb.mxu1 %v4888_v28  ;;  %v5047_v58 = vld [vmem:[#allocation2 + $0x448] sm:$0xf]  ;;  %v4792_v4 = vor.u32 %v5934_v57, %v4791_v55  ;;  %v6042_v16 = vld [vmem:[#allocation2 + $0x5cc] sm:$0xf]  ;;  %v4732_v28 = vor.u32 %v5914_v10, %v4729_v11 }
 0x33f   :  { %v5998_v59 = vld [vmem:[#allocation2 + $0x464] sm:$0xf0]  ;;  %v5244_v30 = vor.u32 %v6042_v16, %v5241_v17  ;;  %v5890_v54 = vld [vmem:[#allocation2 + $0x10c] sm:$0xf] }
 0x340   :  { %2870 = vmatpush.bf16.msrb.mxu2 %v5144_v29  ;;  %2845 = vmatpush.bf16.msrb.mxu0 %v4600_v37  ;;  %v5303_v62 = vld [vmem:[#allocation2 + $0x648] sm:$0xf]  ;;  %v5048_v5 = vor.u32 %v5998_v59, %v5047_v58  ;;  %v4988_v29 = vor.u32 %v5978_v13, %v4985_v15  ;;  %v5465_v37 = vld [vmem:[#allocation2 + $0x7a8] sm:$0xf0] }
 0x341   :  { %v6062_v63 = vld [vmem:[#allocation2 + $0x664] sm:$0xf0]  ;;  %v5468_v60 = vor.u32 %v6098_v36, %v5465_v37  ;;  %v4633_v55 = vld [vmem:[#allocation2 + $0x128] sm:$0xf0] }
 0x342   :  { %2883 = vmatpush.bf16.msrb.mxu3 %v5400_v31  ;;  %2858 = vmatpush.bf16.msrb.mxu1 %v4856_v3  ;;  %v4503_v1 = vld [vmem:[#allocation2 + $0x8] sm:$0xf]  ;;  %v5304_v6 = vor.u32 %v6062_v63, %v5303_v62  ;;  %v5970_v31 = vld [vmem:[#allocation2 + $0x38c] sm:$0xf]  ;;  %v4700_v3 = vor.u32 %v5906_v12, %v4697_v23  ;;  %v5084_v12 = vor.u32 %v6002_v25, %v5081_v53  ;;  %v5967_v25 = vld [vmem:[#allocation2 + $0x36c] sm:$0xf0] }
 0x343   :  { %v5862_v2 = vld [vmem:[#allocation2 + $0x24] sm:$0xf0]  ;;  %v4889_v58 = vld [vmem:[#allocation2 + $0x328] sm:$0xf0]  ;;  %v5183_v53 = vld [vmem:[#allocation2 + $0x550] sm:$0xf] }
 0x344   :  { %2871 = vmatpush.bf16.msrb.mxu2 %v5112_v40  ;;  %2846 = vmatpush.bf16.msrb.mxu0 %v4568_v47  ;;  %v4759_v7 = vld [vmem:[#allocation2 + $0x208] sm:$0xf]  ;;  %v4504_v14 = vor.u32 %v5862_v2, %v4503_v1  ;;  %v4956_v40 = vor.u32 %v5970_v31, %v4953_v34  ;;  %v5433_v47 = vld [vmem:[#allocation2 + $0x768] sm:$0xf0]  ;;  %v4636_v1 = vor.u32 %v5890_v54, %v4633_v55  ;;  %v4991_v54 = vld [vmem:[#allocation2 + $0x3d0] sm:$0xf] }
 0x345   :  { %v5926_v9 = vld [vmem:[#allocation2 + $0x224] sm:$0xf0]  ;;  %v5436_v57 = vor.u32 %v6090_v46, %v5433_v47  ;;  %v6018_v59 = vld [vmem:[#allocation2 + $0x50c] sm:$0xf] }
 0x346   :  { %2884 = vmatpush.bf16.msrb.mxu3 %v5368_v39  ;;  %2859 = vmatpush.bf16.msrb.mxu1 %v4824_v50  ;;  %v5015_v38 = vld [vmem:[#allocation2 + $0x408] sm:$0xf]  ;;  %v4760_v19 = vor.u32 %v5926_v9, %v4759_v7  ;;  %v5962_v39 = vld [vmem:[#allocation2 + $0x34c] sm:$0xf]  ;;  %v4668_v50 = vor.u32 %v5898_v42, %v4665_v43 }
 0x347   :  { %v5990_v48 = vld [vmem:[#allocation2 + $0x424] sm:$0xf0]  ;;  %v5145_v62 = vld [vmem:[#allocation2 + $0x528] sm:$0xf0] }
 0x348   :  { %2872 = vmatpush.bf16.msrb.mxu2 %v5080_v51  ;;  %v5271_v8 = vld [vmem:[#allocation2 + $0x608] sm:$0xf]  ;;  %2847 = vmatpush.bf16.msrb.mxu0 %v4536_v0  ;;  %v5016_v20 = vor.u32 %v5990_v48, %v5015_v38  ;;  %v4924_v51 = vor.u32 %v5962_v39, %v4921_v61  ;;  %v6082_v63 = vld [vmem:[#allocation2 + $0x70c] sm:$0xf] }
 0x349   :  { %v6054_v24 = vld [vmem:[#allocation2 + $0x624] sm:$0xf0]  ;;  %v5401_v0 = vld [vmem:[#allocation2 + $0x728] sm:$0xf0] }
 0x34a   :  { %2885 = vmatpush.bf16.msrb.mxu3 %v5336_v56  ;;  %2860 = vmatpush.bf16.msrb.mxu1 %v4792_v4  ;;  %v5272_v27 = vor.u32 %v6054_v24, %v5271_v8  ;;  %v5954_v56 = vld [vmem:[#allocation2 + $0x30c] sm:$0xf]  ;;  %v5148_v4 = vor.u32 %v6018_v59, %v5145_v62  ;;  %v5404_v38 = vor.u32 %v6082_v63, %v5401_v0  ;;  %v5503_v63 = vld [vmem:[#allocation2 + $0x7d0] sm:$0xf] }
 0x34b   :  { %v4892_v2 = vor.u32 %v5954_v56, %v4889_v58  ;;  %v4601_v7 = vld [vmem:[#allocation2 + $0xe8] sm:$0xf0]  ;;  %v5983_v56 = vld [vmem:[#allocation2 + $0x3ec] sm:$0xf0] }
 0x34c   :  { %2873 = vmatpush.bf16.msrb.mxu2 %v5048_v5  ;;  %2848 = vmatpush.bf16.msrb.mxu0 %v4504_v14  ;;  %v5882_v5 = vld [vmem:[#allocation2 + $0xcc] sm:$0xf]  ;;  %v6047_v58 = vld [vmem:[#allocation2 + $0x5ec] sm:$0xf0] }
 0x34d   :  { %v5946_v9 = vld [vmem:[#allocation2 + $0x2cc] sm:$0xf]  ;;  %v4604_v11 = vor.u32 %v5882_v5, %v4601_v7  ;;  %v6111_v0 = vld [vmem:[#allocation2 + $0x7ec] sm:$0xf0] }
 0x34e   :  { %2886 = vmatpush.bf16.msrb.mxu3 %v5304_v6  ;;  %2861 = vmatpush.bf16.msrb.mxu1 %v4760_v19  ;;  %v4857_v6 = vld [vmem:[#allocation2 + $0x2e8] sm:$0xf0]  ;;  %v4703_v7 = vld [vmem:[#allocation2 + $0x190] sm:$0xf] }
 0x34f   :  { %2849 = vmatmul.bf16.vlgmr.msrb.gmra.mxu0 %v6867_v32  ;;  %v6010_v48 = vld [vmem:[#allocation2 + $0x4cc] sm:$0xf]  ;;  %v4860_v13 = vor.u32 %v5946_v9, %v4857_v6  ;;  %v5911_v9 = vld [vmem:[#allocation2 + $0x1ac] sm:$0xf0]  ;;  %v5504_v6 = vor.u32 %v6111_v0, %v5503_v63 }
 0x350   :  { %2874 = vmatpush.bf16.msrb.mxu2 %v5016_v20  ;;  %2893 = vmatpush.bf16.msra.mxu0 %v4732_v28  ;;  %v5113_v8 = vld [vmem:[#allocation2 + $0x4e8] sm:$0xf0]  ;;  %v5087_v63 = vld [vmem:[#allocation2 + $0x490] sm:$0xf] }
 0x351   :  { %2862 = vmatmul.bf16.vlgmr.msrb.gmra.mxu1 %v6871_v26  ;;  %v6074_v24 = vld [vmem:[#allocation2 + $0x6cc] sm:$0xf]  ;;  %v5116_v14 = vor.u32 %v6010_v48, %v5113_v8  ;;  %v5975_v48 = vld [vmem:[#allocation2 + $0x3ac] sm:$0xf0] }
 0x352   :  { %2887 = vmatpush.bf16.msrb.mxu3 %v5272_v27  ;;  %2906 = vmatpush.bf16.msra.mxu1 %v4988_v29  ;;  %v5369_v10 = vld [vmem:[#allocation2 + $0x6e8] sm:$0xf0]  ;;  %v5215_v8 = vld [vmem:[#allocation2 + $0x590] sm:$0xf] }
 0x353   :  { %2875 = vmatmul.bf16.vlgmr.msrb.gmra.mxu2 %v6859_v18  ;;  %v5874_v15 = vld [vmem:[#allocation2 + $0x8c] sm:$0xf]  ;;  %v5372_v19 = vor.u32 %v6074_v24, %v5369_v10  ;;  %v6039_v24 = vld [vmem:[#allocation2 + $0x5ac] sm:$0xf0] }
 0x354   :  { %2919 = vmatpush.bf16.msra.mxu2 %v5244_v30  ;;  %2894 = vmatpush.bf16.msra.mxu0 %v4700_v3  ;;  %v4569_v16 = vld [vmem:[#allocation2 + $0xa8] sm:$0xf0]  ;;  %v5471_v10 = vld [vmem:[#allocation2 + $0x790] sm:$0xf] }
 0x355   :  { %2888 = vmatmul.bf16.vlgmr.msrb.gmra.mxu3 %v6863_v21  ;;  %v5938_v17 = vld [vmem:[#allocation2 + $0x28c] sm:$0xf]  ;;  %v4572_v29 = vor.u32 %v5874_v15, %v4569_v16  ;;  %v5216_v15 = vor.u32 %v6039_v24, %v5215_v8  ;;  %v4671_v16 = vld [vmem:[#allocation2 + $0x150] sm:$0xf] }
 0x356   :  { %2932 = vmatpush.bf16.msra.mxu3 %v5500_v33  ;;  %2907 = vmatpush.bf16.msra.mxu1 %v4956_v40  ;;  %v4825_v20 = vld [vmem:[#allocation2 + $0x2a8] sm:$0xf0]  ;;  %v6007_v0 = vld [vmem:[#allocation2 + $0x4ac] sm:$0xf0] }
 0x357   :  { %v6066_v27 = vld [vmem:[#allocation2 + $0x68c] sm:$0xf]  ;;  %v4828_v30 = vor.u32 %v5938_v17, %v4825_v20  ;;  %v5903_v17 = vld [vmem:[#allocation2 + $0x16c] sm:$0xf0] }
 0x358   :  { %2920 = vmatpush.bf16.msra.mxu2 %v5212_v41  ;;  %2895 = vmatpush.bf16.msra.mxu0 %v4668_v50  ;;  %v5337_v28 = vld [vmem:[#allocation2 + $0x6a8] sm:$0xf0]  ;;  %v5935_v8 = vld [vmem:[#allocation2 + $0x26c] sm:$0xf0] }
 0x359   :  { %v5866_v23 = vld [vmem:[#allocation2 + $0x4c] sm:$0xf]  ;;  %v5340_v34 = vor.u32 %v6066_v27, %v5337_v28  ;;  %v6031_v27 = vld [vmem:[#allocation2 + $0x56c] sm:$0xf0] }
 0x35a   :  { %2933 = vmatpush.bf16.msra.mxu3 %v5468_v60  ;;  %2908 = vmatpush.bf16.msra.mxu1 %v4924_v51  ;;  %v4537_v31 = vld [vmem:[#allocation2 + $0x68] sm:$0xf0]  ;;  %v4735_v51 = vld [vmem:[#allocation2 + $0x1d0] sm:$0xf] }
 0x35b   :  { %v5930_v33 = vld [vmem:[#allocation2 + $0x24c] sm:$0xf]  ;;  %v4540_v40 = vor.u32 %v5866_v23, %v4537_v31  ;;  %v5439_v28 = vld [vmem:[#allocation2 + $0x750] sm:$0xf]  ;;  %v5184_v23 = vor.u32 %v6031_v27, %v5183_v53 }
 0x35c   :  { %2921 = vmatpush.bf16.msra.mxu2 %v5180_v52  ;;  %2896 = vmatpush.bf16.msra.mxu0 %v4636_v1  ;;  %v4793_v35 = vld [vmem:[#allocation2 + $0x268] sm:$0xf0]  ;;  %v5919_v52 = vld [vmem:[#allocation2 + $0x1ec] sm:$0xf0] }
 0x35d   :  { %v5994_v22 = vld [vmem:[#allocation2 + $0x44c] sm:$0xf]  ;;  %v4796_v43 = vor.u32 %v5930_v33, %v4793_v35  ;;  %v4639_v31 = vld [vmem:[#allocation2 + $0x110] sm:$0xf] }
 0x35e   :  { %2934 = vmatpush.bf16.msra.mxu3 %v5436_v57  ;;  %2909 = vmatpush.bf16.msra.mxu1 %v4892_v2  ;;  %v5049_v36 = vld [vmem:[#allocation2 + $0x468] sm:$0xf0]  ;;  %v5247_v57 = vld [vmem:[#allocation2 + $0x5d0] sm:$0xf]  ;;  %v4736_v2 = vor.u32 %v5919_v52, %v4735_v51 }
 0x35f   :  { %v6058_v37 = vld [vmem:[#allocation2 + $0x64c] sm:$0xf]  ;;  %v5052_v39 = vor.u32 %v5994_v22, %v5049_v36  ;;  %v5248_v5 = vor.u32 %v6047_v58, %v5247_v57  ;;  %v5895_v33 = vld [vmem:[#allocation2 + $0x12c] sm:$0xf0] }
 0x360   :  { %2922 = vmatpush.bf16.msra.mxu2 %v5148_v4  ;;  %2897 = vmatpush.bf16.msra.mxu0 %v4604_v11  ;;  %v5305_v3 = vld [vmem:[#allocation2 + $0x668] sm:$0xf0]  ;;  %v4992_v4 = vor.u32 %v5983_v56, %v4991_v54  ;;  %v6103_v11 = vld [vmem:[#allocation2 + $0x7ac] sm:$0xf0] }
 0x361   :  { %v5858_v41 = vld [vmem:[#allocation2 + $0xc] sm:$0xf]  ;;  %v5308_v45 = vor.u32 %v6058_v37, %v5305_v3  ;;  %v5472_v20 = vor.u32 %v6103_v11, %v5471_v10  ;;  %v5959_v22 = vld [vmem:[#allocation2 + $0x32c] sm:$0xf0] }
 0x362   :  { %2935 = vmatpush.bf16.msra.mxu3 %v5404_v38  ;;  %2910 = vmatpush.bf16.msra.mxu1 %v4860_v13  ;;  %v4505_v42 = vld [vmem:[#allocation2 + $0x28] sm:$0xf0]  ;;  %v4959_v38 = vld [vmem:[#allocation2 + $0x390] sm:$0xf]  ;;  %v4704_v13 = vor.u32 %v5911_v9, %v4703_v7  ;;  %v5088_v7 = vor.u32 %v6007_v0, %v5087_v63  ;;  %v4929_v63 = vld [vmem:[#allocation2 + $0x370] sm:$0xf0] }
 0x363   :  { %v5922_v60 = vld [vmem:[#allocation2 + $0x20c] sm:$0xf]  ;;  %v4508_v55 = vor.u32 %v5858_v41, %v4505_v42  ;;  %v5151_v36 = vld [vmem:[#allocation2 + $0x510] sm:$0xf]  ;;  %v4640_v41 = vor.u32 %v5895_v33, %v4639_v31  ;;  %v5979_v31 = vld [vmem:[#allocation2 + $0x3d4] sm:$0xf] }
 0x364   :  { %2923 = vmatpush.bf16.msra.mxu2 %v5116_v14  ;;  %2898 = vmatpush.bf16.msra.mxu0 %v4572_v29  ;;  %v4761_v61 = vld [vmem:[#allocation2 + $0x228] sm:$0xf0]  ;;  %v4960_v14 = vor.u32 %v5975_v48, %v4959_v38  ;;  %v6095_v29 = vld [vmem:[#allocation2 + $0x76c] sm:$0xf0]  ;;  %v6027_v0 = vld [vmem:[#allocation2 + $0x554] sm:$0xf] }
 0x365   :  { %v5986_v44 = vld [vmem:[#allocation2 + $0x40c] sm:$0xf]  ;;  %v4764_v59 = vor.u32 %v5922_v60, %v4761_v61  ;;  %v5440_v35 = vor.u32 %v6095_v29, %v5439_v28  ;;  %v6023_v37 = vld [vmem:[#allocation2 + $0x52c] sm:$0xf0] }
 0x366   :  { %2936 = vmatpush.bf16.msra.mxu3 %v5372_v19  ;;  %2911 = vmatpush.bf16.msra.mxu1 %v4828_v30  ;;  %v5017_v46 = vld [vmem:[#allocation2 + $0x428] sm:$0xf0]  ;;  %v4927_v19 = vld [vmem:[#allocation2 + $0x350] sm:$0xf]  ;;  %v4672_v30 = vor.u32 %v5903_v17, %v4671_v16 }
 0x367   :  { %v6050_v47 = vld [vmem:[#allocation2 + $0x60c] sm:$0xf]  ;;  %v5020_v62 = vor.u32 %v5986_v44, %v5017_v46  ;;  %v5407_v3 = vld [vmem:[#allocation2 + $0x710] sm:$0xf] }
 0x368   :  { %2924 = vmatpush.bf16.msra.mxu2 %v5084_v12  ;;  %v5273_v50 = vld [vmem:[#allocation2 + $0x628] sm:$0xf0]  ;;  %2899 = vmatpush.bf16.msra.mxu0 %v4540_v40  ;;  %v4928_v12 = vor.u32 %v5967_v25, %v4927_v19  ;;  %v6087_v40 = vld [vmem:[#allocation2 + $0x72c] sm:$0xf0] }
 0x369   :  { %v5276_v1 = vor.u32 %v6050_v47, %v5273_v50  ;;  %v5887_v60 = vld [vmem:[#allocation2 + $0xec] sm:$0xf0]  ;;  %v5408_v44 = vor.u32 %v6087_v40, %v5407_v3  ;;  %v6107_v3 = vld [vmem:[#allocation2 + $0x7d4] sm:$0xf] }
 0x36a   :  { %2937 = vmatpush.bf16.msra.mxu3 %v5340_v34  ;;  %2912 = vmatpush.bf16.msra.mxu1 %v4796_v43  ;;  %v4895_v34 = vld [vmem:[#allocation2 + $0x310] sm:$0xf]  ;;  %v5152_v43 = vor.u32 %v6023_v37, %v5151_v36  ;;  %v5505_v40 = vld [vmem:[#allocation2 + $0x7f0] sm:$0xf0] }
 0x36b   :  { %v4896_v42 = vor.u32 %v5959_v22, %v4895_v34  ;;  %v4863_v61 = vld [vmem:[#allocation2 + $0x2d0] sm:$0xf]  ;;  %v4993_v34 = vld [vmem:[#allocation2 + $0x3f0] sm:$0xf0] }
 0x36c   :  { %2925 = vmatpush.bf16.msra.mxu2 %v5052_v39  ;;  %2900 = vmatpush.bf16.msra.mxu0 %v4508_v55  ;;  %v4607_v39 = vld [vmem:[#allocation2 + $0xd0] sm:$0xf]  ;;  %v5249_v22 = vld [vmem:[#allocation2 + $0x5f0] sm:$0xf0] }
 0x36d   :  { %v5119_v46 = vld [vmem:[#allocation2 + $0x4d0] sm:$0xf]  ;;  %v4608_v52 = vor.u32 %v5887_v60, %v4607_v39  ;;  %v5907_v60 = vld [vmem:[#allocation2 + $0x194] sm:$0xf] }
 0x36e   :  { %2938 = vmatpush.bf16.msra.mxu3 %v5308_v45  ;;  %2913 = vmatpush.bf16.msra.mxu1 %v4764_v59  ;;  %v5951_v45 = vld [vmem:[#allocation2 + $0x2ec] sm:$0xf0] }
 0x36f   :  { %2901 = vmatmul.bf16.vlgmr.msra.gmra.mxu0 %v6867_v32  ;;  %v6015_v47 = vld [vmem:[#allocation2 + $0x4ec] sm:$0xf0]  ;;  %v4864_v54 = vor.u32 %v5951_v45, %v4863_v61  ;;  %v4705_v61 = vld [vmem:[#allocation2 + $0x1b0] sm:$0xf0]  ;;  %v5508_v45 = vor.u32 %v6107_v3, %v5505_v40 }
 0x370   :  { %2926 = vmatpush.bf16.msra.mxu2 %v5020_v62  ;;  %2945 = vmatpush.bf16.msrb.mxu0 %v4736_v2  ;;  %v5375_v50 = vld [vmem:[#allocation2 + $0x6d0] sm:$0xf]  ;;  %v5120_v55 = vor.u32 %v6015_v47, %v5119_v46  ;;  %v4961_v46 = vld [vmem:[#allocation2 + $0x3b0] sm:$0xf0] }
 0x371   :  { %2914 = vmatmul.bf16.vlgmr.msra.gmra.mxu1 %v6871_v26  ;;  %v6079_v51 = vld [vmem:[#allocation2 + $0x6ec] sm:$0xf0]  ;;  %v6035_v47 = vld [vmem:[#allocation2 + $0x594] sm:$0xf] }
 0x372   :  { %2939 = vmatpush.bf16.msra.mxu3 %v5276_v1  ;;  %2958 = vmatpush.bf16.msrb.mxu1 %v4992_v4  ;;  %v4575_v56 = vld [vmem:[#allocation2 + $0x90] sm:$0xf]  ;;  %v5376_v59 = vor.u32 %v6079_v51, %v5375_v50  ;;  %v5217_v50 = vld [vmem:[#allocation2 + $0x5b0] sm:$0xf0] }
 0x373   :  { %2927 = vmatmul.bf16.vlgmr.msra.gmra.mxu2 %v6859_v18  ;;  %v5879_v57 = vld [vmem:[#allocation2 + $0xac] sm:$0xf0]  ;;  %v6099_v51 = vld [vmem:[#allocation2 + $0x794] sm:$0xf] }
 0x374   :  { %2971 = vmatpush.bf16.msrb.mxu2 %v5248_v5  ;;  %2946 = vmatpush.bf16.msrb.mxu0 %v4704_v13  ;;  %v4831_v58 = vld [vmem:[#allocation2 + $0x290] sm:$0xf]  ;;  %v4576_v4 = vor.u32 %v5879_v57, %v4575_v56  ;;  %v5220_v56 = vor.u32 %v6035_v47, %v5217_v50  ;;  %v5899_v57 = vld [vmem:[#allocation2 + $0x154] sm:$0xf] }
 0x375   :  { %2940 = vmatmul.bf16.vlgmr.msra.gmra.mxu3 %v6863_v21  ;;  %v5943_v62 = vld [vmem:[#allocation2 + $0x2ac] sm:$0xf0]  ;;  %v5939_v3 = vld [vmem:[#allocation2 + $0x294] sm:$0xf] }
 0x376   :  { %2984 = vmatpush.bf16.msrb.mxu3 %v5504_v6  ;;  %2959 = vmatpush.bf16.msrb.mxu1 %v4960_v14  ;;  %v5343_v1 = vld [vmem:[#allocation2 + $0x690] sm:$0xf]  ;;  %v4832_v5 = vor.u32 %v5943_v62, %v4831_v58  ;;  %v4673_v58 = vld [vmem:[#allocation2 + $0x170] sm:$0xf0] }
 0x377   :  { %v6071_v2 = vld [vmem:[#allocation2 + $0x6ac] sm:$0xf0]  ;;  %v5867_v47 = vld [vmem:[#allocation2 + $0x54] sm:$0xf] }
 0x378   :  { %2972 = vmatpush.bf16.msrb.mxu2 %v5216_v15  ;;  %2947 = vmatpush.bf16.msrb.mxu0 %v4672_v30  ;;  %v4543_v9 = vld [vmem:[#allocation2 + $0x50] sm:$0xf]  ;;  %v5344_v48 = vor.u32 %v6071_v2, %v5343_v1  ;;  %v5185_v1 = vld [vmem:[#allocation2 + $0x570] sm:$0xf0] }
 0x379   :  { %v5871_v38 = vld [vmem:[#allocation2 + $0x6c] sm:$0xf0]  ;;  %v6091_v2 = vld [vmem:[#allocation2 + $0x754] sm:$0xf] }
 0x37a   :  { %2985 = vmatpush.bf16.msrb.mxu3 %v5472_v20  ;;  %2960 = vmatpush.bf16.msrb.mxu1 %v4928_v12  ;;  %v4799_v6 = vld [vmem:[#allocation2 + $0x250] sm:$0xf]  ;;  %v4544_v14 = vor.u32 %v5871_v38, %v4543_v9  ;;  %v5915_v12 = vld [vmem:[#allocation2 + $0x1d4] sm:$0xf]  ;;  %v5188_v9 = vor.u32 %v6027_v0, %v5185_v1 }
 0x37b   :  { %v5055_v24 = vld [vmem:[#allocation2 + $0x450] sm:$0xf]  ;;  %v4800_v17 = vor.u32 %v5935_v8, %v4799_v6  ;;  %v5891_v38 = vld [vmem:[#allocation2 + $0x114] sm:$0xf] }
 0x37c   :  { %2973 = vmatpush.bf16.msrb.mxu2 %v5184_v23  ;;  %2948 = vmatpush.bf16.msrb.mxu0 %v4640_v41  ;;  %v5999_v10 = vld [vmem:[#allocation2 + $0x46c] sm:$0xf0]  ;;  %v4737_v23 = vld [vmem:[#allocation2 + $0x1f0] sm:$0xf0] }
 0x37d   :  { %v5311_v11 = vld [vmem:[#allocation2 + $0x650] sm:$0xf]  ;;  %v5056_v19 = vor.u32 %v5999_v10, %v5055_v24  ;;  %v4641_v6 = vld [vmem:[#allocation2 + $0x130] sm:$0xf0] }
 0x37e   :  { %2986 = vmatpush.bf16.msrb.mxu3 %v5440_v35  ;;  %2961 = vmatpush.bf16.msrb.mxu1 %v4896_v42  ;;  %v6063_v13 = vld [vmem:[#allocation2 + $0x66c] sm:$0xf0]  ;;  %v6043_v35 = vld [vmem:[#allocation2 + $0x5d4] sm:$0xf]  ;;  %v4740_v42 = vor.u32 %v5915_v12, %v4737_v23 }
 0x37f   :  { %v4511_v15 = vld [vmem:[#allocation2 + $0x10] sm:$0xf]  ;;  %v5312_v27 = vor.u32 %v6063_v13, %v5311_v11  ;;  %v5252_v39 = vor.u32 %v6043_v35, %v5249_v22  ;;  %v4897_v24 = vld [vmem:[#allocation2 + $0x330] sm:$0xf0] }
 0x380   :  { %2974 = vmatpush.bf16.msrb.mxu2 %v5152_v43  ;;  %2949 = vmatpush.bf16.msrb.mxu0 %v4608_v52  ;;  %v5863_v16 = vld [vmem:[#allocation2 + $0x2c] sm:$0xf0]  ;;  %v4996_v43 = vor.u32 %v5979_v31, %v4993_v34  ;;  %v5473_v52 = vld [vmem:[#allocation2 + $0x7b0] sm:$0xf0] }
 0x381   :  { %v4767_v20 = vld [vmem:[#allocation2 + $0x210] sm:$0xf]  ;;  %v4512_v33 = vor.u32 %v5863_v16, %v4511_v15  ;;  %v5476_v62 = vor.u32 %v6099_v51, %v5473_v52  ;;  %v6019_v10 = vld [vmem:[#allocation2 + $0x514] sm:$0xf]  ;;  %v4644_v15 = vor.u32 %v5891_v38, %v4641_v6 }
 0x382   :  { %2987 = vmatpush.bf16.msrb.mxu3 %v5408_v44  ;;  %2962 = vmatpush.bf16.msrb.mxu1 %v4864_v54  ;;  %v5927_v25 = vld [vmem:[#allocation2 + $0x22c] sm:$0xf0]  ;;  %v5971_v44 = vld [vmem:[#allocation2 + $0x394] sm:$0xf]  ;;  %v4708_v54 = vor.u32 %v5907_v60, %v4705_v61 }
 0x383   :  { %v5023_v53 = vld [vmem:[#allocation2 + $0x410] sm:$0xf]  ;;  %v4768_v36 = vor.u32 %v5927_v25, %v4767_v20  ;;  %v5153_v11 = vld [vmem:[#allocation2 + $0x530] sm:$0xf0] }
 0x384   :  { %2975 = vmatpush.bf16.msrb.mxu2 %v5120_v55  ;;  %2950 = vmatpush.bf16.msrb.mxu0 %v4576_v4  ;;  %v5991_v28 = vld [vmem:[#allocation2 + $0x42c] sm:$0xf0]  ;;  %v4964_v55 = vor.u32 %v5971_v44, %v4961_v46  ;;  %v5441_v4 = vld [vmem:[#allocation2 + $0x770] sm:$0xf0] }
 0x385   :  { %v5279_v29 = vld [vmem:[#allocation2 + $0x610] sm:$0xf]  ;;  %v5024_v37 = vor.u32 %v5991_v28, %v5023_v53  ;;  %v5444_v8 = vor.u32 %v6091_v2, %v5441_v4  ;;  %v6083_v13 = vld [vmem:[#allocation2 + $0x714] sm:$0xf] }
 0x386   :  { %2988 = vmatpush.bf16.msrb.mxu3 %v5376_v59  ;;  %2963 = vmatpush.bf16.msrb.mxu1 %v4832_v5  ;;  %v6055_v30 = vld [vmem:[#allocation2 + $0x62c] sm:$0xf0]  ;;  %v5963_v59 = vld [vmem:[#allocation2 + $0x354] sm:$0xf]  ;;  %v4676_v5 = vor.u32 %v5899_v57, %v4673_v58 }
 0x387   :  { %v5280_v41 = vor.u32 %v6055_v30, %v5279_v29  ;;  %v5883_v20 = vld [vmem:[#allocation2 + $0xd4] sm:$0xf] }
 0x388   :  { %2976 = vmatpush.bf16.msrb.mxu2 %v5088_v7  ;;  %2951 = vmatpush.bf16.msrb.mxu0 %v4544_v14  ;;  %v4932_v7 = vor.u32 %v5963_v59, %v4929_v63  ;;  %v5409_v14 = vld [vmem:[#allocation2 + $0x730] sm:$0xf0] }
 0x389   :  { %v4609_v25 = vld [vmem:[#allocation2 + $0xf0] sm:$0xf0]  ;;  %v5412_v28 = vor.u32 %v6083_v13, %v5409_v14 }
 0x38a   :  { %2989 = vmatpush.bf16.msrb.mxu3 %v5344_v48  ;;  %2964 = vmatpush.bf16.msrb.mxu1 %v4800_v17  ;;  %v5955_v48 = vld [vmem:[#allocation2 + $0x314] sm:$0xf]  ;;  %v4612_v34 = vor.u32 %v5883_v20, %v4609_v25  ;;  %v4743_v20 = vld [vmem:[#allocation2 + $0x1d8] sm:$0xf] }
 0x38b   :  { %v4900_v17 = vor.u32 %v5955_v48, %v4897_v24  ;;  %v5947_v53 = vld [vmem:[#allocation2 + $0x2d4] sm:$0xf]  ;;  %v5920_v25 = vld [vmem:[#allocation2 + $0x1f4] sm:$0xf0] }
 0x38c   :  { %2977 = vmatpush.bf16.msrb.mxu2 %v5056_v19  ;;  %2952 = vmatpush.bf16.msrb.mxu0 %v4512_v33  ;;  %v2746_v16 = vpop.f32.mrf.mxu0  ;;  %v5156_v19 = vor.u32 %v6019_v10, %v5153_v11  ;;  %v4865_v29 = vld [vmem:[#allocation2 + $0x2f0] sm:$0xf0] }
 0x38d   :  { %v6011_v30 = vld [vmem:[#allocation2 + $0x4d4] sm:$0xf]  ;;  %v4868_v35 = vor.u32 %v5947_v53, %v4865_v29  ;;  %v4999_v53 = vld [vmem:[#allocation2 + $0x3d8] sm:$0xf] }
 0x38e   :  { %2990 = vmatpush.bf16.msrb.mxu3 %v5312_v27  ;;  %2965 = vmatpush.bf16.msrb.mxu1 %v4768_v36  ;;  %v2759_v27 = vpop.f32.mrf.mxu1  ;;  %v5121_v12 = vld [vmem:[#allocation2 + $0x4f0] sm:$0xf0]  ;;  %v5255_v29 = vld [vmem:[#allocation2 + $0x5d8] sm:$0xf] }
 0x38f   :  { %2953 = vmatmul.bf16.vlgmr.msrb.gmra.mxu0 %v6867_v32  ;;  %v2760_v23 = vadd.f32 %v2759_v27, %v2746_v16  ;;  %v6075_v31 = vld [vmem:[#allocation2 + $0x6d4] sm:$0xf]  ;;  %v5124_v22 = vor.u32 %v6011_v30, %v5121_v12  ;;  %v6048_v30 = vld [vmem:[#allocation2 + $0x5f4] sm:$0xf0] }
 0x390   :  { %2978 = vmatpush.bf16.msrb.mxu2 %v5024_v37  ;;  %2997 = vmatpush.bf16.msra.mxu0 %v4740_v42  ;;  %v5377_v33 = vld [vmem:[#allocation2 + $0x6f0] sm:$0xf0] }
 0x391   :  { %2966 = vmatmul.bf16.vlgmr.msrb.gmra.mxu1 %v6871_v26  ;;  %v5875_v36 = vld [vmem:[#allocation2 + $0x94] sm:$0xf] }
 0x392   :  { %2991 = vmatpush.bf16.msrb.mxu3 %v5280_v41  ;;  %3010 = vmatpush.bf16.msra.mxu1 %v4996_v43  ;;  %v4577_v37 = vld [vmem:[#allocation2 + $0xb0] sm:$0xf0]  ;;  %v5380_v41 = vor.u32 %v6075_v31, %v5377_v33  ;;  %v5511_v31 = vld [vmem:[#allocation2 + $0x7d8] sm:$0xf] }
 0x393   :  { %2979 = vmatmul.bf16.vlgmr.msrb.gmra.mxu2 %v6859_v18  ;;  %v4833_v42 = vld [vmem:[#allocation2 + $0x2b0] sm:$0xf0]  ;;  %v4580_v46 = vor.u32 %v5875_v36, %v4577_v37  ;;  %v6112_v33 = vld [vmem:[#allocation2 + $0x7f4] sm:$0xf0]  ;;  %v4744_v36 = vor.u32 %v5920_v25, %v4743_v20 }
 0x394   :  { %3023 = vmatpush.bf16.msra.mxu2 %v5252_v39  ;;  %2998 = vmatpush.bf16.msra.mxu0 %v4708_v54  ;;  %v6003_v43 = vld [vmem:[#allocation2 + $0x494] sm:$0xf]  ;;  %v2748_v51 = vpop.f32.mrf.mxu0  ;;  %v4836_v52 = vor.u32 %v5939_v3, %v4833_v42  ;;  %v5256_v3 = vor.u32 %v6048_v30, %v5255_v29  ;;  %v4967_v42 = vld [vmem:[#allocation2 + $0x398] sm:$0xf] }
 0x395   :  { %2992 = vmatmul.bf16.vlgmr.msrb.gmra.mxu3 %v6863_v21  ;;  %v5089_v39 = vld [vmem:[#allocation2 + $0x4b0] sm:$0xf0]  ;;  %v4871_v29 = vld [vmem:[#allocation2 + $0x2d8] sm:$0xf] }
 0x396   :  { %3036 = vmatpush.bf16.msra.mxu3 %v5508_v45  ;;  %3011 = vmatpush.bf16.msra.mxu1 %v4964_v55  ;;  %v2772_v40 = vpop.f32.mrf.mxu2  ;;  %v6067_v44 = vld [vmem:[#allocation2 + $0x694] sm:$0xf]  ;;  %v5092_v54 = vor.u32 %v6003_v43, %v5089_v39  ;;  %v2761_v58 = vpop.f32.mrf.mxu1  ;;  %v5512_v43 = vor.u32 %v6112_v33, %v5511_v31  ;;  %v5976_v39 = vld [vmem:[#allocation2 + $0x3b4] sm:$0xf0] }
 0x397   :  { %v2773_v60 = vadd.f32 %v2772_v40, %v2760_v23  ;;  %v5345_v45 = vld [vmem:[#allocation2 + $0x6b0] sm:$0xf0]  ;;  %v4711_v40 = vld [vmem:[#allocation2 + $0x198] sm:$0xf] }
 0x398   :  { %3024 = vmatpush.bf16.msra.mxu2 %v5220_v56  ;;  %2999 = vmatpush.bf16.msra.mxu0 %v4676_v5  ;;  %v2785_v61 = vpop.f32.mrf.mxu3  ;;  %v4545_v55 = vld [vmem:[#allocation2 + $0x70] sm:$0xf0]  ;;  %v5348_v59 = vor.u32 %v6067_v44, %v5345_v45  ;;  %v5479_v44 = vld [vmem:[#allocation2 + $0x798] sm:$0xf] }
 0x399   :  { %v6893_v50 = vadd.f32 %v2785_v61, %v2773_v60  ;;  %v5931_v56 = vld [vmem:[#allocation2 + $0x254] sm:$0xf]  ;;  %v4548_v5 = vor.u32 %v5867_v47, %v4545_v55  ;;  %v5223_v60 = vld [vmem:[#allocation2 + $0x598] sm:$0xf] }
 0x39a   :  { %3037 = vmatpush.bf16.msra.mxu3 %v5476_v62  ;;  %3012 = vmatpush.bf16.msra.mxu1 %v4932_v7  ;;  %v4801_v57 = vld [vmem:[#allocation2 + $0x270] sm:$0xf0]  ;;  %v6040_v61 = vld [vmem:[#allocation2 + $0x5b4] sm:$0xf0] }
 0x39b   :  { %v5995_v62 = vld [vmem:[#allocation2 + $0x454] sm:$0xf]  ;;  %v3153_v0 = vrot.slane %v6893_v50, 4  ;;  %v3209_v1 = vmul.f32 %v6893_v50, %v6893_v50  ;;  %v4804_v6 = vor.u32 %v5931_v56, %v4801_v57  ;;  %v6104_v45 = vld [vmem:[#allocation2 + $0x7b4] sm:$0xf0] }
 0x39c   :  { %3025 = vmatpush.bf16.msra.mxu2 %v5188_v9  ;;  %3000 = vmatpush.bf16.msra.mxu0 %v4644_v15  ;;  %v5057_v63 = vld [vmem:[#allocation2 + $0x470] sm:$0xf0]  ;;  %v4679_v55 = vld [vmem:[#allocation2 + $0x158] sm:$0xf]  ;;  %v5480_v58 = vor.u32 %v6104_v45, %v5479_v44 }
 0x39d   :  { %v6059_v2 = vld [vmem:[#allocation2 + $0x654] sm:$0xf]  ;;  %v5060_v48 = vor.u32 %v5995_v62, %v5057_v63  ;;  %v3154_v14 = vadd.f32 %v3153_v0, %v6893_v50  ;;  %v3217_v15 = vrot.slane %v3209_v1, 4  ;;  %v5904_v56 = vld [vmem:[#allocation2 + $0x174] sm:$0xf0] }
 0x39e   :  { %3038 = vmatpush.bf16.msra.mxu3 %v5444_v8  ;;  %3013 = vmatpush.bf16.msra.mxu1 %v4900_v17  ;;  %v5313_v4 = vld [vmem:[#allocation2 + $0x670] sm:$0xf0]  ;;  %v2774_v11 = vpop.f32.mrf.mxu2  ;;  %v4935_v57 = vld [vmem:[#allocation2 + $0x358] sm:$0xf] }
 0x39f   :  { %v5859_v7 = vld [vmem:[#allocation2 + $0x14] sm:$0xf]  ;;  %v5316_v13 = vor.u32 %v6059_v2, %v5313_v4  ;;  %v5191_v62 = vld [vmem:[#allocation2 + $0x558] sm:$0xf] }
 0x3a0   :  { %3026 = vmatpush.bf16.msra.mxu2 %v5156_v19  ;;  %3001 = vmatpush.bf16.msra.mxu0 %v4612_v34  ;;  %v4513_v9 = vld [vmem:[#allocation2 + $0x30] sm:$0xf0]  ;;  %v2787_v19 = vpop.f32.mrf.mxu3  ;;  %v3155_v34 = vrot.slane %v3154_v14, 2  ;;  %v6032_v63 = vld [vmem:[#allocation2 + $0x574] sm:$0xf0] }
 0x3a1   :  { %v5923_v38 = vld [vmem:[#allocation2 + $0x214] sm:$0xf]  ;;  %v4516_v27 = vor.u32 %v5859_v7, %v4513_v9  ;;  %v5447_v0 = vld [vmem:[#allocation2 + $0x758] sm:$0xf]  ;;  %v5192_v9 = vor.u32 %v6032_v63, %v5191_v62 }
 0x3a2   :  { %3039 = vmatpush.bf16.msra.mxu3 %v5412_v28  ;;  %3014 = vmatpush.bf16.msra.mxu1 %v4868_v35  ;;  %v4769_v8 = vld [vmem:[#allocation2 + $0x230] sm:$0xf0]  ;;  %v5984_v28 = vld [vmem:[#allocation2 + $0x3f4] sm:$0xf0]  ;;  %v3218_v35 = vadd.f32 %v3217_v15, %v3209_v1 }
 0x3a3   :  { %v5987_v24 = vld [vmem:[#allocation2 + $0x414] sm:$0xf]  ;;  %v4772_v12 = vor.u32 %v5923_v38, %v4769_v8  ;;  %v5000_v37 = vor.u32 %v5984_v28, %v4999_v53  ;;  %v6096_v1 = vld [vmem:[#allocation2 + $0x774] sm:$0xf0] }
 0x3a4   :  { %3027 = vmatpush.bf16.msra.mxu2 %v5124_v22  ;;  %3002 = vmatpush.bf16.msra.mxu0 %v4580_v46  ;;  %v5025_v10 = vld [vmem:[#allocation2 + $0x430] sm:$0xf0]  ;;  %v3156_v46 = vadd.f32 %v3155_v34, %v3154_v14  ;;  %v3219_v47 = vrot.slane %v3218_v35, 2  ;;  %v4647_v38 = vld [vmem:[#allocation2 + $0x118] sm:$0xf]  ;;  %v5448_v8 = vor.u32 %v6096_v1, %v5447_v0 }
 0x3a5   :  { %v6051_v16 = vld [vmem:[#allocation2 + $0x614] sm:$0xf]  ;;  %v5028_v23 = vor.u32 %v5987_v24, %v5025_v10  ;;  %v5960_v24 = vld [vmem:[#allocation2 + $0x334] sm:$0xf0] }
 0x3a6   :  { %3040 = vmatpush.bf16.msra.mxu3 %v5380_v41  ;;  %3015 = vmatpush.bf16.msra.mxu1 %v4836_v52  ;;  %v5281_v17 = vld [vmem:[#allocation2 + $0x630] sm:$0xf0]  ;;  %v5912_v41 = vld [vmem:[#allocation2 + $0x1b4] sm:$0xf0]  ;;  %v4968_v52 = vor.u32 %v5976_v39, %v4967_v42  ;;  %v3157_v2 = vrot.slane %v3156_v46, 1  ;;  %v3220_v4 = vadd.f32 %v3219_v47, %v3218_v35 }
 0x3a7   :  { %v5284_v22 = vor.u32 %v6051_v16, %v5281_v17  ;;  %v4712_v51 = vor.u32 %v5912_v41, %v4711_v40  ;;  %v5159_v10 = vld [vmem:[#allocation2 + $0x518] sm:$0xf] }
 0x3a8   :  { %3028 = vmatpush.bf16.msra.mxu2 %v5092_v54  ;;  %3003 = vmatpush.bf16.msra.mxu0 %v4548_v5  ;;  %v5224_v54 = vor.u32 %v6040_v61, %v5223_v60  ;;  %v4680_v5 = vor.u32 %v5904_v56, %v4679_v55  ;;  %v6024_v11 = vld [vmem:[#allocation2 + $0x534] sm:$0xf0]  ;;  %v3158_v15 = vadd.f32 %v3157_v2, %v3156_v46  ;;  %v3221_v16 = vrot.slane %v3220_v4, 1 }
 0x3a9   :  { %v6088_v14 = vld [vmem:[#allocation2 + $0x734] sm:$0xf0]  ;;  %v5160_v25 = vor.u32 %v6024_v11, %v5159_v10 }
 0x3aa   :  { %3041 = vmatpush.bf16.msra.mxu3 %v5348_v59  ;;  %3016 = vmatpush.bf16.msra.mxu1 %v4804_v6  ;;  %v5968_v59 = vld [vmem:[#allocation2 + $0x374] sm:$0xf0] }
 0x3ab   :  { %v4936_v7 = vor.u32 %v5968_v59, %v4935_v57  ;;  %v5896_v6 = vld [vmem:[#allocation2 + $0x134] sm:$0xf0] }
 0x3ac   :  { %3029 = vmatpush.bf16.msra.mxu2 %v5060_v48  ;;  %3004 = vmatpush.bf16.msra.mxu0 %v4516_v27  ;;  %v4903_v48 = vld [vmem:[#allocation2 + $0x318] sm:$0xf]  ;;  %v4648_v17 = vor.u32 %v5896_v6, %v4647_v38  ;;  %v2798_v19 = vpop.f32.mrf.mxu0 }
 0x3ad   :  { %v4904_v20 = vor.u32 %v5960_v24, %v4903_v48  ;;  %v4615_v27 = vld [vmem:[#allocation2 + $0xd8] sm:$0xf] }
 0x3ae   :  { %3042 = vmatpush.bf16.msra.mxu3 %v5316_v13  ;;  %3017 = vmatpush.bf16.msra.mxu1 %v4772_v12  ;;  %v5415_v13 = vld [vmem:[#allocation2 + $0x718] sm:$0xf]  ;;  %v2811_v53 = vpop.f32.mrf.mxu1 }
 0x3af   :  { %3005 = vmatmul.bf16.vlgmr.msra.gmra.mxu0 %v6867_v32  ;;  %v5888_v28 = vld [vmem:[#allocation2 + $0xf4] sm:$0xf0]  ;;  %v5416_v30 = vor.u32 %v6088_v14, %v5415_v13  ;;  %v2812_v12 = vadd.f32 %v2811_v53, %v2798_v19 }
 0x3b0   :  { %3030 = vmatpush.bf16.msra.mxu2 %v5028_v23  ;;  %3049 = vmatpush.bf16.msrb.mxu0 %v4744_v36  ;;  %v5952_v23 = vld [vmem:[#allocation2 + $0x2f4] sm:$0xf0]  ;;  %v3222_v36 = vadd.f32 %v3221_v16, %v3220_v4 }
 0x3b1   :  { %3018 = vmatmul.bf16.vlgmr.msra.gmra.mxu1 %v6871_v26  ;;  %v5127_v31 = vld [vmem:[#allocation2 + $0x4d8] sm:$0xf] }
 0x3b2   :  { %3043 = vmatpush.bf16.msra.mxu3 %v5284_v22  ;;  %3062 = vmatpush.bf16.msrb.mxu1 %v5000_v37  ;;  %v6016_v33 = vld [vmem:[#allocation2 + $0x4f4] sm:$0xf0]  ;;  %v6904_v22 = vmul.f32 %v3158_v15, %v6732_v49  ;;  %v4616_v37 = vor.u32 %v5888_v28, %v4615_v27 }
 0x3b3   :  { %3031 = vmatmul.bf16.vlgmr.msra.gmra.mxu2 %v6859_v18  ;;  %v5383_v34 = vld [vmem:[#allocation2 + $0x6d8] sm:$0xf]  ;;  %v5128_v40 = vor.u32 %v6016_v33, %v5127_v31  ;;  %v5916_v31 = vld [vmem:[#allocation2 + $0x1dc] sm:$0xf] }
 0x3b4   :  { %3075 = vmatpush.bf16.msrb.mxu2 %v5256_v3  ;;  %3050 = vmatpush.bf16.msrb.mxu0 %v4712_v51  ;;  %v6080_v35 = vld [vmem:[#allocation2 + $0x6f4] sm:$0xf0]  ;;  %v4872_v3 = vor.u32 %v5952_v23, %v4871_v29  ;;  %v3273_v55 = vmul.f32 %v6904_v22, %v6904_v22  ;;  %v2800_v62 = vpop.f32.mrf.mxu0  ;;  %v4745_v33 = vld [vmem:[#allocation2 + $0x1f8] sm:$0xf0] }
 0x3b5   :  { %3044 = vmatmul.bf16.vlgmr.msra.gmra.mxu3 %v6863_v21  ;;  %v4583_v42 = vld [vmem:[#allocation2 + $0x98] sm:$0xf]  ;;  %v5384_v60 = vor.u32 %v6080_v35, %v5383_v34  ;;  %v5980_v35 = vld [vmem:[#allocation2 + $0x3dc] sm:$0xf] }
 0x3b6   :  { %3088 = vmatpush.bf16.msrb.mxu3 %v5512_v43  ;;  %3063 = vmatpush.bf16.msrb.mxu1 %v4968_v52  ;;  %v2824_v41 = vpop.f32.mrf.mxu2  ;;  %v5880_v43 = vld [vmem:[#allocation2 + $0xb4] sm:$0xf0] }
 0x3b7   :  { %v4839_v39 = vld [vmem:[#allocation2 + $0x298] sm:$0xf]  ;;  %v2825_v61 = vadd.f32 %v2824_v41, %v2812_v12  ;;  %v4584_v57 = vor.u32 %v5880_v43, %v4583_v42  ;;  %v5257_v43 = vld [vmem:[#allocation2 + $0x5f8] sm:$0xf0] }
 0x3b8   :  { %3076 = vmatpush.bf16.msrb.mxu2 %v5224_v54  ;;  %3051 = vmatpush.bf16.msrb.mxu0 %v4680_v5  ;;  %v2837_v44 = vpop.f32.mrf.mxu3  ;;  %v5944_v45 = vld [vmem:[#allocation2 + $0x2b4] sm:$0xf0]  ;;  %v3265_v54 = vmul.f32 %v3222_v36, %v6732_v49  ;;  %v2813_v5 = vpop.f32.mrf.mxu1  ;;  %v5001_v36 = vld [vmem:[#allocation2 + $0x3f8] sm:$0xf0] }
 0x3b9   :  { %v5095_v46 = vld [vmem:[#allocation2 + $0x498] sm:$0xf]  ;;  %v6909_v56 = vadd.f32 %v2837_v44, %v2825_v61  ;;  %v4840_v63 = vor.u32 %v5944_v45, %v4839_v39  ;;  %v6108_v61 = vld [vmem:[#allocation2 + $0x7dc] sm:$0xf] }
 0x3ba   :  { %3089 = vmatpush.bf16.msrb.mxu3 %v5480_v58  ;;  %3064 = vmatpush.bf16.msrb.mxu1 %v4936_v7  ;;  %v6008_v47 = vld [vmem:[#allocation2 + $0x4b4] sm:$0xf0]  ;;  %v3281_v11 = vsub.f32 %v3265_v54, %v3273_v55  ;;  %v5513_v44 = vld [vmem:[#allocation2 + $0x7f8] sm:$0xf0]  ;;  %v5004_v54 = vor.u32 %v5980_v35, %v5001_v36 }
 0x3bb   :  { %v5351_v51 = vld [vmem:[#allocation2 + $0x698] sm:$0xf]  ;;  %v5096_v0 = vor.u32 %v6008_v47, %v5095_v46  ;;  %v3159_v7 = vrot.slane %v6909_v56, 4  ;;  %v5481_v5 = vld [vmem:[#allocation2 + $0x7b8] sm:$0xf0] }
 0x3bc   :  { %3077 = vmatpush.bf16.msrb.mxu2 %v5192_v9  ;;  %3052 = vmatpush.bf16.msrb.mxu0 %v4648_v17  ;;  %v6072_v52 = vld [vmem:[#allocation2 + $0x6b4] sm:$0xf0]  ;;  %v3210_v9 = vmul.f32 %v6909_v56, %v6909_v56  ;;  %v6020_v35 = vld [vmem:[#allocation2 + $0x51c] sm:$0xf] }
 0x3bd   :  { %v4551_v58 = vld [vmem:[#allocation2 + $0x58] sm:$0xf]  ;;  %v5352_v38 = vor.u32 %v6072_v52, %v5351_v51  ;;  %v3160_v13 = vadd.f32 %v3159_v7, %v6909_v56  ;;  %v4748_v51 = vor.u32 %v5916_v31, %v4745_v33  ;;  %v5908_v52 = vld [vmem:[#allocation2 + $0x19c] sm:$0xf] }
 0x3be   :  { %3090 = vmatpush.bf16.msrb.mxu3 %v5448_v8  ;;  %3065 = vmatpush.bf16.msrb.mxu1 %v4904_v20  ;;  %v5872_v59 = vld [vmem:[#allocation2 + $0x74] sm:$0xf0]  ;;  %v3223_v14 = vrot.slane %v3210_v9, 4  ;;  %v2826_v29 = vpop.f32.mrf.mxu2  ;;  %v4905_v31 = vld [vmem:[#allocation2 + $0x338] sm:$0xf0] }
 0x3bf   :  { %v4807_v1 = vld [vmem:[#allocation2 + $0x258] sm:$0xf]  ;;  %v4552_v15 = vor.u32 %v5872_v59, %v4551_v58  ;;  %v5972_v58 = vld [vmem:[#allocation2 + $0x39c] sm:$0xf] }
 0x3c0   :  { %3078 = vmatpush.bf16.msrb.mxu2 %v5160_v25  ;;  %3053 = vmatpush.bf16.msrb.mxu0 %v4616_v37  ;;  %v5936_v2 = vld [vmem:[#allocation2 + $0x274] sm:$0xf0]  ;;  %v3224_v12 = vadd.f32 %v3223_v14, %v3210_v9  ;;  %v2839_v34 = vpop.f32.mrf.mxu3  ;;  %v6044_v37 = vld [vmem:[#allocation2 + $0x5dc] sm:$0xf] }
 0x3c1   :  { %v5063_v4 = vld [vmem:[#allocation2 + $0x458] sm:$0xf]  ;;  %v4808_v20 = vor.u32 %v5936_v2, %v4807_v1  ;;  %v5260_v55 = vor.u32 %v6044_v37, %v5257_v43  ;;  %v4969_v59 = vld [vmem:[#allocation2 + $0x3b8] sm:$0xf0] }
 0x3c2   :  { %3091 = vmatpush.bf16.msrb.mxu3 %v5416_v30  ;;  %3066 = vmatpush.bf16.msrb.mxu1 %v4872_v3  ;;  %v6000_v6 = vld [vmem:[#allocation2 + $0x474] sm:$0xf0]  ;;  %v3161_v30 = vrot.slane %v3160_v13, 2  ;;  %v6915_v3 = vadd.f32 0.8, %v3281_v11  ;;  %v3225_v41 = vrot.slane %v3224_v12, 2 }
 0x3c3   :  { %v5319_v48 = vld [vmem:[#allocation2 + $0x658] sm:$0xf]  ;;  %v5064_v25 = vor.u32 %v6000_v6, %v5063_v4  ;;  %v6036_v1 = vld [vmem:[#allocation2 + $0x59c] sm:$0xf]  ;;  %v4972_v6 = vor.u32 %v5972_v58, %v4969_v59 }
 0x3c4   :  { %3079 = vmatpush.bf16.msrb.mxu2 %v5128_v40  ;;  %v6064_v8 = vld [vmem:[#allocation2 + $0x674] sm:$0xf0]  ;;  %3054 = vmatpush.bf16.msrb.mxu0 %v4584_v57  ;;  %v3162_v40 = vadd.f32 %v3161_v30, %v3160_v13  ;;  %v3226_v46 = vadd.f32 %v3225_v41, %v3224_v12  ;;  %v4713_v57 = vld [vmem:[#allocation2 + $0x1b8] sm:$0xf0]  ;;  %6215 = vrsqrt.f32 %v6915_v3  ;;  %vm3304_vm13 = vweird.f32 %v6915_v3 }
 0x3c5   :  { %v4519_v24 = vld [vmem:[#allocation2 + $0x18] sm:$0xf]  ;;  %v5320_v23 = vor.u32 %v6064_v8, %v5319_v48  ;;  %v5225_v2 = vld [vmem:[#allocation2 + $0x5b8] sm:$0xf0] }
 0x3c6   :  { %3092 = vmatpush.bf16.msrb.mxu3 %v5384_v60  ;;  %v5864_v10 = vld [vmem:[#allocation2 + $0x34] sm:$0xf0]  ;;  %3067 = vmatpush.bf16.msrb.mxu1 %v4840_v63  ;;  %v3163_v45 = vrot.slane %v3162_v40, 1  ;;  %v3227_v63 = vrot.slane %v3226_v46, 1  ;;  %v6100_v4 = vld [vmem:[#allocation2 + $0x79c] sm:$0xf]  ;;  %v5228_v48 = vor.u32 %v6036_v1, %v5225_v2 }
 0x3c7   :  { %v4775_v16 = vld [vmem:[#allocation2 + $0x218] sm:$0xf]  ;;  %v4520_v42 = vor.u32 %v5864_v10, %v4519_v24  ;;  %v5900_v8 = vld [vmem:[#allocation2 + $0x15c] sm:$0xf]  ;;  %v5484_v14 = vor.u32 %v6100_v4, %v5481_v5 }
 0x3c8   :  { %v5928_v17 = vld [vmem:[#allocation2 + $0x234] sm:$0xf0]  ;;  %3080 = vmatpush.bf16.msrb.mxu2 %v5096_v0  ;;  %3055 = vmatpush.bf16.msrb.mxu0 %v4552_v15  ;;  %v3164_v62 = vadd.f32 %v3163_v45, %v3162_v40  ;;  %v5516_v0 = vor.u32 %v6108_v61, %v5513_v44  ;;  %v3228_v9 = vadd.f32 %v3227_v63, %v3226_v46  ;;  %v4681_v24 = vld [vmem:[#allocation2 + $0x178] sm:$0xf0] }
 0x3c9   :  { %v5031_v19 = vld [vmem:[#allocation2 + $0x418] sm:$0xf]  ;;  %v4776_v39 = vor.u32 %v5928_v17, %v4775_v16  ;;  %v5964_v10 = vld [vmem:[#allocation2 + $0x35c] sm:$0xf] }
 0x3ca   :  { %v5992_v53 = vld [vmem:[#allocation2 + $0x434] sm:$0xf0]  ;;  %3093 = vmatpush.bf16.msrb.mxu3 %v5352_v38  ;;  %3068 = vmatpush.bf16.msrb.mxu1 %v4808_v20  ;;  %v6919_v7 = vmul.f32 %v3164_v62, %v6732_v49  ;;  %v4716_v38 = vor.u32 %v5908_v52, %v4713_v57  ;;  %v3266_v11 = vmul.f32 %v3228_v9, %v6732_v49  ;;  %v4937_v15 = vld [vmem:[#allocation2 + $0x378] sm:$0xf0] }
 0x3cb   :  { %v5287_v27 = vld [vmem:[#allocation2 + $0x618] sm:$0xf]  ;;  %v5032_v60 = vor.u32 %v5992_v53, %v5031_v19  ;;  %v6028_v16 = vld [vmem:[#allocation2 + $0x55c] sm:$0xf]  ;;  %v4940_v29 = vor.u32 %v5964_v10, %v4937_v15 }
 0x3cc   :  { %v6056_v28 = vld [vmem:[#allocation2 + $0x634] sm:$0xf0]  ;;  %3081 = vmatpush.bf16.msrb.mxu2 %v5064_v25  ;;  %3056 = vmatpush.bf16.msrb.mxu0 %v4520_v42  ;;  %v3274_v13 = vmul.f32 %v6919_v7, %v6919_v7  ;;  %v5193_v17 = vld [vmem:[#allocation2 + $0x578] sm:$0xf0]  ;;  %v6927_v25 = vpop.eup %6215  ;;  %v2850_v43 = vpop.f32.mrf.mxu0 }
 0x3cd   :  { %v5288_v47 = vor.u32 %v6056_v28, %v5287_v27  ;;  %v6092_v19 = vld [vmem:[#allocation2 + $0x75c] sm:$0xf]  ;;  %v4684_v27 = vor.u32 %v5900_v8, %v4681_v24  ;;  %v5196_v30 = vor.u32 %v6028_v16, %v5193_v17  ;;  %v3299_v37 = vmul.f32 %v6927_v25, %v6915_v3 }
 0x3ce   :  { %3094 = vmatpush.bf16.msrb.mxu3 %v5320_v23  ;;  %3069 = vmatpush.bf16.msrb.mxu1 %v4776_v39  ;;  %v5449_v20 = vld [vmem:[#allocation2 + $0x778] sm:$0xf0]  ;;  %v3282_v53 = vsub.f32 %v3266_v11, %v3274_v13  ;;  %v2863_v46 = vpop.f32.mrf.mxu1  ;;  %vm3305_vm14 = vweird.f32 %v6927_v25 }
 0x3cf   :  { %3057 = vmatmul.bf16.vlgmr.msrb.gmra.mxu0 %v6867_v32  ;;  %v5892_v28 = vld [vmem:[#allocation2 + $0x11c] sm:$0xf]  ;;  %v5452_v34 = vor.u32 %v6092_v19, %v5449_v20  ;;  %v3300_v57 = vmul.f32 %v6927_v25, %v3299_v37  ;;  %vm3306_vm0 = vmor %vm3304_vm13, %vm3305_vm14 }
 0x3d0   :  { %3082 = vmatpush.bf16.msrb.mxu2 %v5032_v60  ;;  %3101 = vmatpush.bf16.msra.mxu0 %v4748_v51  ;;  %v4649_v12 = vld [vmem:[#allocation2 + $0x138] sm:$0xf0]  ;;  %v6930_v33 = vadd.f32 0.8, %v3282_v53 }
 0x3d1   :  { %3070 = vmatmul.bf16.vlgmr.msrb.gmra.mxu1 %v6871_v26  ;;  %v5956_v23 = vld [vmem:[#allocation2 + $0x31c] sm:$0xf]  ;;  %v4652_v42 = vor.u32 %v5892_v28, %v4649_v12  ;;  %v3301_v11 = vmul.f32 0.5, %v3300_v57 }
 0x3d2   :  { %3095 = vmatpush.bf16.msrb.mxu3 %v5288_v47  ;;  %3114 = vmatpush.bf16.msra.mxu1 %v5004_v54  ;;  %v5161_v36 = vld [vmem:[#allocation2 + $0x538] sm:$0xf0]  ;;  %6217 = vrsqrt.f32 %v6930_v33  ;;  %v4908_v39 = vor.u32 %v5956_v23, %v4905_v31  ;;  %vm3314_vm11 = vweird.f32 %v6930_v33 }
 0x3d3   :  { %3083 = vmatmul.bf16.vlgmr.msrb.gmra.mxu2 %v6859_v18  ;;  %v6084_v40 = vld [vmem:[#allocation2 + $0x71c] sm:$0xf]  ;;  %v5164_v60 = vor.u32 %v6020_v35, %v5161_v36 }
 0x3d4   :  { %3127 = vmatpush.bf16.msra.mxu2 %v5260_v55  ;;  %3102 = vmatpush.bf16.msra.mxu0 %v4716_v38  ;;  %v5417_v41 = vld [vmem:[#allocation2 + $0x738] sm:$0xf0]  ;;  %v2864_v55 = vadd.f32 %v2863_v46, %v2850_v43  ;;  %v2852_v20 = vpop.f32.mrf.mxu0 }
 0x3d5   :  { %3096 = vmatmul.bf16.vlgmr.msrb.gmra.mxu3 %v6863_v21  ;;  %v5884_v61 = vld [vmem:[#allocation2 + $0xdc] sm:$0xf]  ;;  %v5420_v47 = vor.u32 %v6084_v40, %v5417_v41  ;;  %v3302_v40 = vsub.f32 1.5, %v3301_v11 }
 0x3d6   :  { %3140 = vmatpush.bf16.msra.mxu3 %v5516_v0  ;;  %3115 = vmatpush.bf16.msra.mxu1 %v4972_v6  ;;  %v4617_v44 = vld [vmem:[#allocation2 + $0xf8] sm:$0xf0]  ;;  %v2876_v5 = vpop.f32.mrf.mxu2  ;;  %v2865_v23 = vpop.f32.mrf.mxu1 }
 0x3d7   :  { %v5948_v45 = vld [vmem:[#allocation2 + $0x2dc] sm:$0xf]  ;;  %v4620_v62 = vor.u32 %v5884_v61, %v4617_v44  ;;  %v2877_v24 = vadd.f32 %v2876_v5, %v2864_v55 }
 0x3d8   :  { %3128 = vmatpush.bf16.msra.mxu2 %v5228_v48  ;;  %3103 = vmatpush.bf16.msra.mxu0 %v4684_v27  ;;  %v4873_v51 = vld [vmem:[#allocation2 + $0x2f8] sm:$0xf0]  ;;  %v6936_v9 = vpop.eup %6217  ;;  %v2889_v10 = vpop.f32.mrf.mxu3 }
 0x3d9   :  { %v6012_v52 = vld [vmem:[#allocation2 + $0x4dc] sm:$0xf]  ;;  %v4876_v63 = vor.u32 %v5948_v45, %v4873_v51  ;;  %v3309_v13 = vmul.f32 %v6936_v9, %v6930_v33  ;;  %v6940_v19 = vadd.f32 %v2889_v10, %v2877_v24  ;;  %vm3315_vm12 = vweird.f32 %v6936_v9 }
 0x3da   :  { %3141 = vmatpush.bf16.msra.mxu3 %v5484_v14  ;;  %3116 = vmatpush.bf16.msra.mxu1 %v4940_v29  ;;  %v5129_v54 = vld [vmem:[#allocation2 + $0x4f8] sm:$0xf0]  ;;  %vm6955_vm15 = vmor %vm3314_vm11, %vm3315_vm12 }
 0x3db   :  { %v6076_v58 = vld [vmem:[#allocation2 + $0x6dc] sm:$0xf]  ;;  %v5132_v0 = vor.u32 %v6012_v52, %v5129_v54  ;;  %v3310_v53 = vmul.f32 %v6936_v9, %v3309_v13  ;;  %v3165_v36 = vrot.slane %v6940_v19, 4  ;;  %v3211_v37 = vmul.f32 %v6940_v19, %v6940_v19 }
 0x3dc   :  { %3129 = vmatpush.bf16.msra.mxu2 %v5196_v30  ;;  %v5385_v59 = vld [vmem:[#allocation2 + $0x6f8] sm:$0xf0]  ;;  %3104 = vmatpush.bf16.msra.mxu0 %v4652_v42 }
 0x3dd   :  { %v5876_v1 = vld [vmem:[#allocation2 + $0x9c] sm:$0xf]  ;;  %v5388_v38 = vor.u32 %v6076_v58, %v5385_v59  ;;  %v3311_v41 = vmul.f32 0.5, %v3310_v53  ;;  %v3229_v61 = vrot.slane %v3211_v37, 4 }
 0x3de   :  { %3142 = vmatpush.bf16.msra.mxu3 %v5452_v34  ;;  %3117 = vmatpush.bf16.msra.mxu1 %v4908_v39  ;;  %v4585_v2 = vld [vmem:[#allocation2 + $0xb8] sm:$0xf0]  ;;  %v2878_v55 = vpop.f32.mrf.mxu2 }
 0x3df   :  { %v5940_v4 = vld [vmem:[#allocation2 + $0x29c] sm:$0xf]  ;;  %v4588_v16 = vor.u32 %v5876_v1, %v4585_v2  ;;  %v3312_v46 = vsub.f32 1.5, %v3311_v41  ;;  %v3303_v2 = vmul.f32 %v6927_v25, %v3302_v40 }
 0x3e0   :  { %3130 = vmatpush.bf16.msra.mxu2 %v5164_v60  ;;  %v4841_v6 = vld [vmem:[#allocation2 + $0x2b8] sm:$0xf0]  ;;  %3105 = vmatpush.bf16.msra.mxu0 %v4620_v62  ;;  %v3166_v60 = vadd.f32 %v3165_v36, %v6940_v19  ;;  %v3230_v62 = vadd.f32 %v3229_v61, %v3211_v37  ;;  %v2891_v1 = vpop.f32.mrf.mxu3 }
 0x3e1   :  { %v6004_v48 = vld [vmem:[#allocation2 + $0x49c] sm:$0xf]  ;;  %v4844_v27 = vor.u32 %v5940_v4, %v4841_v6  ;;  %v3313_v4 = vmul.f32 %v6936_v9, %v3312_v46 }
 0x3e2   :  { %3143 = vmatpush.bf16.msra.mxu3 %v5420_v47  ;;  %v5097_v8 = vld [vmem:[#allocation2 + $0x4b8] sm:$0xf0]  ;;  %3118 = vmatpush.bf16.msra.mxu1 %v4876_v63  ;;  %v3167_v59 = vrot.slane %v3166_v60, 2  ;;  %v3231_v11 = vrot.slane %v3230_v62, 2 }
 0x3e3   :  { %v6068_v14 = vld [vmem:[#allocation2 + $0x69c] sm:$0xf]  ;;  %v5100_v28 = vor.u32 %v6004_v48, %v5097_v8  ;;  %v3317_v6 = vsel %vm6955_vm15, %v6936_v9, %v3313_v4 }
 0x3e4   :  { %v5353_v15 = vld [vmem:[#allocation2 + $0x6b8] sm:$0xf0]  ;;  %3131 = vmatpush.bf16.msra.mxu2 %v5132_v0  ;;  %3106 = vmatpush.bf16.msra.mxu0 %v4588_v16  ;;  %v3386_v24 = vrot.slane %v3317_v6, 7  ;;  %v3168_v10 = vadd.f32 %v3167_v59, %v3166_v60  ;;  %v3232_v16 = vadd.f32 %v3231_v11, %v3230_v62 }
 0x3e5   :  { %v5868_v17 = vld [vmem:[#allocation2 + $0x5c] sm:$0xf]  ;;  %v5356_v31 = vor.u32 %v6068_v14, %v5353_v15  ;;  %v3307_v14 = vsel %vm3306_vm0, %v6927_v25, %v3303_v2  ;;  %vm3396_vm0 = vcmask 1044484  }
 0x3e6   :  { %v4553_v29 = vld [vmem:[#allocation2 + $0x78] sm:$0xf0]  ;;  %3144 = vmatpush.bf16.msra.mxu3 %v5388_v38  ;;  %3119 = vmatpush.bf16.msra.mxu1 %v4844_v27  ;;  %v6970_v3 = vsel %vm494_vm8, %v3307_v14, %v3386_v24  ;;  %v3169_v15 = vrot.slane %v3168_v10, 1 }
 0x3e7   :  { %v5932_v30 = vld [vmem:[#allocation2 + $0x25c] sm:$0xf]  ;;  %v4556_v39 = vor.u32 %v5868_v17, %v4553_v29  ;;  %v3233_v17 = vrot.slane %v3232_v16, 1 }
 0x3e8   :  { %v4809_v12 = vld [vmem:[#allocation2 + $0x278] sm:$0xf0]  ;;  %3132 = vmatpush.bf16.msra.mxu2 %v5100_v28  ;;  %v3170_v9 = vadd.f32 %v3169_v15, %v3168_v10 }
 0x3e9   :  { %v5996_v34 = vld [vmem:[#allocation2 + $0x45c] sm:$0xf]  ;;  %v4812_v47 = vor.u32 %v5932_v30, %v4809_v12  ;;  %3107 = vmatpush.bf16.msra.mxu0 %v4556_v39  ;;  %v3234_v20 = vadd.f32 %v3233_v17, %v3232_v16 }
 0x3ea   :  { %v5065_v35 = vld [vmem:[#allocation2 + $0x478] sm:$0xf0]  ;;  %3145 = vmatpush.bf16.msra.mxu3 %v5356_v31  ;;  %v6977_v25 = vmul.f32 %v3170_v9, %v6732_v49 }
 0x3eb   :  { %v6060_v42 = vld [vmem:[#allocation2 + $0x65c] sm:$0xf]  ;;  %v5068_v51 = vor.u32 %v5996_v34, %v5065_v35  ;;  %3120 = vmatpush.bf16.msra.mxu1 %v4812_v47  ;;  %v3267_v29 = vmul.f32 %v3234_v20, %v6732_v49 }
 0x3ec   :  { %v5321_v43 = vld [vmem:[#allocation2 + $0x678] sm:$0xf0]  ;;  %v2902_v53 = vpop.f32.mrf.mxu0 }
 0x3ed   :  { %v5860_v44 = vld [vmem:[#allocation2 + $0x1c] sm:$0xf]  ;;  %v5324_v58 = vor.u32 %v6060_v42, %v5321_v43  ;;  %3133 = vmatpush.bf16.msra.mxu2 %v5068_v51 }
 0x3ee   :  { %v4521_v45 = vld [vmem:[#allocation2 + $0x38] sm:$0xf0]  ;;  %v2915_v27 = vpop.f32.mrf.mxu1 }
 0x3ef   :  { %v5924_v52 = vld [vmem:[#allocation2 + $0x21c] sm:$0xf]  ;;  %v4524_v33 = vor.u32 %v5860_v44, %v4521_v45  ;;  %3146 = vmatpush.bf16.msra.mxu3 %v5324_v58  ;;  %v2916_v28 = vadd.f32 %v2915_v27, %v2902_v53 }
 0x3f0   :  { %v4777_v54 = vld [vmem:[#allocation2 + $0x238] sm:$0xf0] }
 0x3f1   :  { %v5988_v63 = vld [vmem:[#allocation2 + $0x41c] sm:$0xf]  ;;  %v4780_v48 = vor.u32 %v5924_v52, %v4777_v54  ;;  %3108 = vmatpush.bf16.msra.mxu0 %v4524_v33 }
 0x3f2   :  { %v5033_v0 = vld [vmem:[#allocation2 + $0x438] sm:$0xf0] }
 0x3f3   :  { %v6052_v5 = vld [vmem:[#allocation2 + $0x61c] sm:$0xf]  ;;  %v5036_v8 = vor.u32 %v5988_v63, %v5033_v0  ;;  %3121 = vmatpush.bf16.msra.mxu1 %v4780_v48 }
 0x3f4   :  { %v5289_v38 = vld [vmem:[#allocation2 + $0x638] sm:$0xf0]  ;;  %3109 = vmatmul.bf16.vlgmr.msra.gmra.mxu0 %v6867_v32  ;;  %v3275_v32 = vmul.f32 %v6977_v25, %v6977_v25 }
 0x3f5   :  { %v5292_v13 = vor.u32 %v6052_v5, %v5289_v38  ;;  %3134 = vmatpush.bf16.msra.mxu2 %v5036_v8 }
 0x3f6   :  { %3122 = vmatmul.bf16.vlgmr.msra.gmra.mxu1 %v6871_v26  ;;  %v2928_v30 = vpop.f32.mrf.mxu2  ;;  %v2917_v31 = vpop.f32.mrf.mxu1 }
 0x3f7   :  { %3147 = vmatpush.bf16.msra.mxu3 %v5292_v13  ;;  %v2929_v26 = vadd.f32 %v2928_v30, %v2916_v28 }
 0x3f8   :  { %3135 = vmatmul.bf16.vlgmr.msra.gmra.mxu2 %v6859_v18  ;;  %v2941_v12 = vpop.f32.mrf.mxu3  ;;  %v3283_v18 = vsub.f32 %v3267_v29, %v3275_v32 }
 0x3f9   :  { %v6982_v23 = vadd.f32 %v2941_v12, %v2929_v26 }
 0x3fa   :  { %3148 = vmatmul.bf16.vlgmr.msra.gmra.mxu3 %v6863_v21  ;;  %v2904_v21 = vpop.f32.mrf.mxu0  ;;  %v3292_v36 = vadd.f32 0.8, %v3283_v18 }
 0x3fb   :  { %v3171_v34 = vrot.slane %v6982_v23, 4  ;;  %v3212_v35 = vmul.f32 %v6982_v23, %v6982_v23 }
 0x3fc   :  { %6219 = vrsqrt.f32 %v3292_v36  ;;  %vm3324_vm1 = vweird.f32 %v3292_v36 }
 0x3fd   :  { %v3172_v37 = vadd.f32 %v3171_v34, %v6982_v23  ;;  %v3235_v40 = vrot.slane %v3212_v35, 4 }
 0x3fe   :  { %v2930_v41 = vpop.f32.mrf.mxu2 }
 0x3ff   :  { %v3173_v42 = vrot.slane %v3172_v37, 2  ;;  %v3236_v43 = vadd.f32 %v3235_v40, %v3212_v35 }
 0x400   :  { %v2943_v39 = vpop.f32.mrf.mxu3 }
 0x401   :  { %v3174_v60 = vadd.f32 %v3173_v42, %v3172_v37  ;;  %v3237_v61 = vrot.slane %v3236_v43, 2 }
 0x402   :  { %v6220_v51 = vpop.eup %6219 }
 0x403   :  { %v3175_v44 = vrot.slane %v3174_v60, 1  ;;  %v3238_v45 = vadd.f32 %v3237_v61, %v3236_v43  ;;  %v3319_v58 = vmul.f32 %v6220_v51, %v3292_v36  ;;  %vm3325_vm2 = vweird.f32 %v6220_v51 }
 0x404   :  { %vm3326_vm5 = vmor %vm3324_vm1, %vm3325_vm2 }
 0x405   :  { %v3176_v46 = vadd.f32 %v3175_v44, %v3174_v60  ;;  %v3239_v47 = vrot.slane %v3238_v45, 1  ;;  %v3320_v63 = vmul.f32 %v6220_v51, %v3319_v58 }
 0x407   :  { %v6989_v52 = vmul.f32 %v3176_v46, %v6732_v49  ;;  %v3240_v54 = vadd.f32 %v3239_v47, %v3238_v45  ;;  %v3321_v4 = vmul.f32 0.5, %v3320_v63 }
 0x409   :  { %v3268_v55 = vmul.f32 %v3240_v54, %v6732_v49  ;;  %v3276_v57 = vmul.f32 %v6989_v52, %v6989_v52  ;;  %v3322_v48 = vsub.f32 1.5, %v3321_v4 }
 0x40b   :  { %v3284_v59 = vsub.f32 %v3268_v55, %v3276_v57  ;;  %v3323_v16 = vmul.f32 %v6220_v51, %v3322_v48 }
 0x40c   :  { %v2954_v0 = vpop.f32.mrf.mxu0 }
 0x40d   :  { %v3293_v62 = vadd.f32 0.8, %v3284_v59  ;;  %v3327_v30 = vsel %vm3326_vm5, %v6220_v51, %v3323_v16 }
 0x40e   :  { %v2967_v1 = vpop.f32.mrf.mxu1  ;;  %v3387_v18 = vrot.slane %v3327_v30, 6 }
 0x40f   :  { %6221 = vrsqrt.f32 %v3293_v62  ;;  %v2968_v2 = vadd.f32 %v2967_v1, %v2954_v0  ;;  %vm3334_vm3 = vweird.f32 %v3293_v62 }
 0x414   :  { %v2956_v10 = vpop.f32.mrf.mxu0 }
 0x415   :  { %v6222_v38 = vpop.eup %6221 }
 0x416   :  { %v2980_v5 = vpop.f32.mrf.mxu2  ;;  %v3329_v8 = vmul.f32 %v6222_v38, %v3293_v62  ;;  %v2969_v13 = vpop.f32.mrf.mxu1  ;;  %vm3335_vm4 = vweird.f32 %v6222_v38 }
 0x417   :  { %v2981_v33 = vadd.f32 %v2980_v5, %v2968_v2  ;;  %vm3336_vm6 = vmor %vm3334_vm3, %vm3335_vm4 }
 0x418   :  { %v2993_v6 = vpop.f32.mrf.mxu3  ;;  %v3330_v11 = vmul.f32 %v6222_v38, %v3329_v8 }
 0x419   :  { %v6994_v24 = vadd.f32 %v2993_v6, %v2981_v33 }
 0x41a   :  { %v3331_v9 = vmul.f32 0.5, %v3330_v11 }
 0x41b   :  { %v3177_v14 = vrot.slane %v6994_v24, 4  ;;  %v3213_v15 = vmul.f32 %v6994_v24, %v6994_v24 }
 0x41c   :  { %v3332_v53 = vsub.f32 1.5, %v3331_v9 }
 0x41d   :  { %v3178_v17 = vadd.f32 %v3177_v14, %v6994_v24  ;;  %v3241_v20 = vrot.slane %v3213_v15, 4 }
 0x41e   :  { %v2982_v27 = vpop.f32.mrf.mxu2  ;;  %v3333_v26 = vmul.f32 %v6222_v38, %v3332_v53 }
 0x41f   :  { %v3179_v28 = vrot.slane %v3178_v17, 2  ;;  %v3242_v29 = vadd.f32 %v3241_v20, %v3213_v15 }
 0x420   :  { %v2995_v32 = vpop.f32.mrf.mxu3  ;;  %v3337_v12 = vsel %vm3336_vm6, %v6222_v38, %v3333_v26 }
 0x421   :  { %v3388_v21 = vrot.slane %v3337_v12, 5  ;;  %v3180_v31 = vadd.f32 %v3179_v28, %v3178_v17  ;;  %v3243_v34 = vrot.slane %v3242_v29, 2 }
 0x423   :  { %v3394_v35 = vsel %vm1136_vm7, %v3387_v18, %v3388_v21  ;;  %v3181_v37 = vrot.slane %v3180_v31, 1  ;;  %v3244_v40 = vadd.f32 %v3243_v34, %v3242_v29 }
 0x424   :  { %v7003_v36 = vsel %vm1138_vm10, %v6970_v3, %v3394_v35 }
 0x425   :  { %v3182_v41 = vadd.f32 %v3181_v37, %v3180_v31  ;;  %v3245_v42 = vrot.slane %v3244_v40, 1 }
 0x427   :  { %v7006_v43 = vmul.f32 %v3182_v41, %v6732_v49  ;;  %v3246_v39 = vadd.f32 %v3245_v42, %v3244_v40 }
 0x429   :  { %v3269_v45 = vmul.f32 %v3246_v39, %v6732_v49  ;;  %v3277_v46 = vmul.f32 %v7006_v43, %v7006_v43 }
 0x42b   :  { %v3285_v54 = vsub.f32 %v3269_v45, %v3277_v46 }
 0x42c   :  { %v3006_v60 = vpop.f32.mrf.mxu0 }
 0x42d   :  { %v3294_v63 = vadd.f32 0.8, %v3285_v54 }
 0x42e   :  { %v3019_v61 = vpop.f32.mrf.mxu1 }
 0x42f   :  { %v3020_v44 = vadd.f32 %v3019_v61, %v3006_v60  ;;  %6223 = vrsqrt.f32 %v3294_v63  ;;  %vm3344_vm9 = vweird.f32 %v3294_v63 }
 0x434   :  { %v3008_v57 = vpop.f32.mrf.mxu0 }
 0x435   :  { %v6224_v13 = vpop.eup %6223 }
 0x436   :  { %v3032_v47 = vpop.f32.mrf.mxu2  ;;  %v3021_v58 = vpop.f32.mrf.mxu1  ;;  %v3339_v17 = vmul.f32 %v6224_v13, %v3294_v63  ;;  %vm3345_vm11 = vweird.f32 %v6224_v13 }
 0x437   :  { %v3033_v51 = vadd.f32 %v3032_v47, %v3020_v44  ;;  %vm3346_vm14 = vmor %vm3344_vm9, %vm3345_vm11  ;;  %vm3398_vm9 = vcmask 1046534   ;;  %vm3400_vm11 = vcmask 1045508  }
 0x438   :  { %v3045_v3 = vpop.f32.mrf.mxu3  ;;  %v3340_v27 = vmul.f32 %v6224_v13, %v3339_v17 }
 0x439   :  { %v7011_v55 = vadd.f32 %v3045_v3, %v3033_v51 }
 0x43a   :  { %v3341_v30 = vmul.f32 0.5, %v3340_v27 }
 0x43b   :  { %v3183_v59 = vrot.slane %v7011_v55, 4  ;;  %v3214_v62 = vmul.f32 %v7011_v55, %v7011_v55 }
 0x43c   :  { %v3342_v31 = vsub.f32 1.5, %v3341_v30 }
 0x43d   :  { %v3184_v0 = vadd.f32 %v3183_v59, %v7011_v55  ;;  %v3247_v1 = vrot.slane %v3214_v62, 4 }
 0x43e   :  { %v3034_v2 = vpop.f32.mrf.mxu2  ;;  %v3343_v60 = vmul.f32 %v6224_v13, %v3342_v31 }
 0x43f   :  { %v3185_v4 = vrot.slane %v3184_v0, 2  ;;  %v3248_v5 = vadd.f32 %v3247_v1, %v3214_v62 }
 0x440   :  { %v3047_v38 = vpop.f32.mrf.mxu3  ;;  %v3347_v57 = vsel %vm3346_vm14, %v6224_v13, %v3343_v60 }
 0x441   :  { %v3186_v33 = vadd.f32 %v3185_v4, %v3184_v0  ;;  %v3249_v6 = vrot.slane %v3248_v5, 2  ;;  %v3389_v62 = vrot.slane %v3347_v57, 4 }
 0x443   :  { %v3187_v48 = vrot.slane %v3186_v33, 1  ;;  %v3250_v8 = vadd.f32 %v3249_v6, %v3248_v5 }
 0x445   :  { %v3188_v10 = vadd.f32 %v3187_v48, %v3186_v33  ;;  %v3251_v11 = vrot.slane %v3250_v8, 1 }
 0x447   :  { %v7018_v14 = vmul.f32 %v3188_v10, %v6732_v49  ;;  %v3252_v15 = vadd.f32 %v3251_v11, %v3250_v8 }
 0x449   :  { %v3270_v16 = vmul.f32 %v3252_v15, %v6732_v49  ;;  %v3278_v9 = vmul.f32 %v7018_v14, %v7018_v14 }
 0x44b   :  { %v3286_v20 = vsub.f32 %v3270_v16, %v3278_v9 }
 0x44c   :  { %v3058_v28 = vpop.f32.mrf.mxu0 }
 0x44d   :  { %v3295_v53 = vadd.f32 0.8, %v3286_v20 }
 0x44e   :  { %v3071_v29 = vpop.f32.mrf.mxu1 }
 0x44f   :  { %6225 = vrsqrt.f32 %v3295_v53  ;;  %v3072_v32 = vadd.f32 %v3071_v29, %v3058_v28  ;;  %vm3354_vm12 = vweird.f32 %v3295_v53 }
 0x454   :  { %v3060_v37 = vpop.f32.mrf.mxu0 }
 0x455   :  { %v6226_v12 = vpop.eup %6225 }
 0x456   :  { %v3084_v26 = vpop.f32.mrf.mxu2  ;;  %v3349_v34 = vmul.f32 %v6226_v12, %v3295_v53  ;;  %v3073_v41 = vpop.f32.mrf.mxu1  ;;  %vm3355_vm13 = vweird.f32 %v6226_v12 }
 0x457   :  { %v3085_v18 = vadd.f32 %v3084_v26, %v3072_v32  ;;  %vm3356_vm15 = vmor %vm3354_vm12, %vm3355_vm13  ;;  %vm3402_vm12 = vcmask 1043456  }
 0x458   :  { %v3097_v21 = vpop.f32.mrf.mxu3  ;;  %v3350_v40 = vmul.f32 %v6226_v12, %v3349_v34 }
 0x459   :  { %v7023_v35 = vadd.f32 %v3097_v21, %v3085_v18 }
 0x45a   :  { %v3351_v61 = vmul.f32 0.5, %v3350_v40 }
 0x45b   :  { %v3189_v42 = vrot.slane %v7023_v35, 4  ;;  %v3215_v39 = vmul.f32 %v7023_v35, %v7023_v35 }
 0x45c   :  { %v3352_v46 = vsub.f32 1.5, %v3351_v61 }
 0x45d   :  { %v3190_v44 = vadd.f32 %v3189_v42, %v7023_v35  ;;  %v3253_v45 = vrot.slane %v3215_v39, 4 }
 0x45e   :  { %v3086_v47 = vpop.f32.mrf.mxu2  ;;  %v3353_v58 = vmul.f32 %v6226_v12, %v3352_v46 }
 0x45f   :  { %v3191_v51 = vrot.slane %v3190_v44, 2  ;;  %v3254_v3 = vadd.f32 %v3253_v45, %v3215_v39 }
 0x460   :  { %v3099_v54 = vpop.f32.mrf.mxu3  ;;  %v3357_v59 = vsel %vm3356_vm15, %v6226_v12, %v3353_v58 }
 0x461   :  { %v3390_v63 = vrot.slane %v3357_v59, 3  ;;  %v3192_v0 = vadd.f32 %v3191_v51, %v3190_v44  ;;  %v3255_v1 = vrot.slane %v3254_v3, 2 }
 0x463   :  { %v7030_v2 = vsel %vm3396_vm0, %v3389_v62, %v3390_v63  ;;  %v3193_v4 = vrot.slane %v3192_v0, 1  ;;  %v3256_v5 = vadd.f32 %v3255_v1, %v3254_v3 }
 0x465   :  { %v3194_v38 = vadd.f32 %v3193_v4, %v3192_v0  ;;  %v3257_v33 = vrot.slane %v3256_v5, 1 }
 0x467   :  { %v7033_v8 = vmul.f32 %v3194_v38, %v6732_v49  ;;  %v3258_v10 = vadd.f32 %v3257_v33, %v3256_v5 }
 0x469   :  { %v3271_v13 = vmul.f32 %v3258_v10, %v6732_v49  ;;  %v3279_v15 = vmul.f32 %v7033_v8, %v7033_v8  ;;  %v3289_v10 = vld [vmem:[#allocation18] sm:$0xff] }
 0x46b   :  { %v3287_v27 = vsub.f32 %v3271_v13, %v3279_v15 }
 0x46d   :  { %v3296_v30 = vadd.f32 0.8, %v3287_v27 }
 0x46f   :  { %6227 = vrsqrt.f32 %v3296_v30  ;;  %vm3364_vm1 = vweird.f32 %v3296_v30 }
 0x471   :  { %v3110_v6 = vpop.f32.mrf.mxu0 }
 0x473   :  { %v3123_v48 = vpop.f32.mrf.mxu1 }
 0x474   :  { %v3124_v11 = vadd.f32 %v3123_v48, %v3110_v6 }
 0x475   :  { %v6228_v61 = vpop.eup %6227 }
 0x476   :  { %v3359_v51 = vmul.f32 %v6228_v61, %v3296_v30  ;;  %vm3365_vm2 = vweird.f32 %v6228_v61 }
 0x477   :  { %vm3366_vm4 = vmor %vm3364_vm1, %vm3365_vm2 }
 0x478   :  { %v3360_v57 = vmul.f32 %v6228_v61, %v3359_v51 }
 0x479   :  { %v3112_v20 = vpop.f32.mrf.mxu0 }
 0x47a   :  { %v3361_v58 = vmul.f32 0.5, %v3360_v57 }
 0x47b   :  { %v3136_v16 = vpop.f32.mrf.mxu2  ;;  %v3125_v53 = vpop.f32.mrf.mxu1 }
 0x47c   :  { %v3137_v9 = vadd.f32 %v3136_v16, %v3124_v11  ;;  %v3362_v62 = vsub.f32 1.5, %v3361_v58 }
 0x47d   :  { %v3149_v17 = vpop.f32.mrf.mxu3 }
 0x47e   :  { %v7038_v28 = vadd.f32 %v3149_v17, %v3137_v9  ;;  %v3363_v1 = vmul.f32 %v6228_v61, %v3362_v62 }
 0x480   :  { %v3195_v29 = vrot.slane %v7038_v28, 4  ;;  %v3216_v32 = vmul.f32 %v7038_v28, %v7038_v28  ;;  %v3367_v38 = vsel %vm3366_vm4, %v6228_v61, %v3363_v1  ;;  %v3406_v61 = vld [vmem:[#allocation19] sm:$0xff] }
 0x481   :  { %v3391_v6 = vrot.slane %v3367_v38, 2 }
 0x482   :  { %v3196_v26 = vadd.f32 %v3195_v29, %v7038_v28  ;;  %v3259_v12 = vrot.slane %v3216_v32, 4 }
 0x483   :  { %v3138_v18 = vpop.f32.mrf.mxu2 }
 0x484   :  { %v3197_v21 = vrot.slane %v3196_v26, 2  ;;  %v3260_v31 = vadd.f32 %v3259_v12, %v3216_v32 }
 0x485   :  { %v3151_v34 = vpop.f32.mrf.mxu3 }
 0x486   :  { %v3198_v37 = vadd.f32 %v3197_v21, %v3196_v26  ;;  %v3261_v40 = vrot.slane %v3260_v31, 2 }
 0x488   :  { %v3199_v41 = vrot.slane %v3198_v37, 1  ;;  %v3262_v42 = vadd.f32 %v3261_v40, %v3260_v31 }
 0x48a   :  { %v3200_v39 = vadd.f32 %v3199_v41, %v3198_v37  ;;  %v3263_v60 = vrot.slane %v3262_v42, 1 }
 0x48c   :  { %v3208_v44 = vmul.f32 %v3200_v39, %v6732_v49  ;;  %v3264_v45 = vadd.f32 %v3263_v60, %v3262_v42 }
 0x48e   :  { %v3272_v46 = vmul.f32 %v3264_v45, %v6732_v49  ;;  %v3280_v47 = vmul.f32 %v3208_v44, %v3208_v44 }
 0x490   :  { %v3288_v3 = vsub.f32 %v3272_v46, %v3280_v47 }
 0x492   :  { %v3297_v54 = vadd.f32 0.8, %v3288_v3 }
 0x494   :  { %6229 = vrsqrt.f32 %v3297_v54  ;;  %vm3374_vm5 = vweird.f32 %v3297_v54 }
 0x49a   :  { %v6230_v59 = vpop.eup %6229 }
 0x49b   :  { %v3369_v63 = vmul.f32 %v6230_v59, %v3297_v54  ;;  %vm3375_vm3 = vweird.f32 %v6230_v59 }
 0x49c   :  { %vm3376_vm6 = vmor %vm3374_vm5, %vm3375_vm3 }
 0x49d   :  { %v3370_v0 = vmul.f32 %v6230_v59, %v3369_v63 }
 0x49f   :  { %v3371_v4 = vmul.f32 0.5, %v3370_v0 }
 0x4a1   :  { %v3372_v5 = vsub.f32 1.5, %v3371_v4 }
 0x4a3   :  { %v3373_v49 = vmul.f32 %v6230_v59, %v3372_v5 }
 0x4a5   :  { %v3377_v33 = vsel %vm3376_vm6, %v6230_v59, %v3373_v49 }
 0x4a6   :  { %v3392_v48 = vrot.slane %v3377_v33, 1 }
 0x4a8   :  { %v3399_v11 = vsel %vm3398_vm9, %v3391_v6, %v3392_v48 }
 0x4a9   :  { %v3401_v13 = vsel %vm3400_vm11, %v7030_v2, %v3399_v11 }
 0x4aa   :  { %v3403_v15 = vsel %vm3402_vm12, %v7003_v36, %v3401_v13 }
 0x4ab   :  { %v3405_v16 = vmul.f32 %v3403_v15, %v3289_v10 }
 0x4ad   :  { %v3408_v9 = vperm.slane %v3405_v16, 0  ;;  %v3409_v17 = vperm.slane %v3405_v16, 1  ;;  %v3410_v20 = vperm.slane %v3405_v16, 2  ;;  %v3411_v53 = vperm.slane %v3405_v16, 3 }
 0x4ae   :  { %v3412_v27 = vperm.slane %v3405_v16, 4  ;;  %v3413_v29 = vperm.slane %v3405_v16, 5  ;;  %v3414_v32 = vperm.slane %v3405_v16, 6  ;;  %v3415_v30 = vperm.slane %v3405_v16, 7 }
 0x4af   :  { %v3424_v26 = vmul.f32 %v3408_v9, %v6904_v22  ;;  %v3425_v12 = vmul.f32 %v3409_v17, %v6919_v7  ;;  %v3426_v18 = vmul.f32 %v3410_v20, %v6977_v25  ;;  %v3427_v2 = vmul.f32 %v3411_v53, %v6989_v52 }
 0x4b0   :  { %v3428_v21 = vmul.f32 %v3412_v27, %v7006_v43  ;;  %v3429_v36 = vmul.f32 %v3413_v29, %v7018_v14  ;;  %v3430_v31 = vmul.f32 %v3414_v32, %v7033_v8  ;;  %v3431_v34 = vmul.f32 %v3415_v30, %v3208_v44 }
 0x4b1   :  { %v3440_v37 = vrot.slane %v3425_v12, 7  ;;  %v3441_v40 = vrot.slane %v3426_v18, 6  ;;  %v3442_v41 = vrot.slane %v3427_v2, 5  ;;  %v3456_v42 = vmul.f32 %v3408_v9, %v6893_v50 }
 0x4b2   :  { %v3443_v39 = vrot.slane %v3428_v21, 4  ;;  %v3444_v22 = vrot.slane %v3429_v36, 3  ;;  %v3445_v60 = vrot.slane %v3430_v31, 2  ;;  %v3446_v7 = vrot.slane %v3431_v34, 1 }
 0x4b3   :  { %v3447_v25 = vsel %vm494_vm8, %v3424_v26, %v3440_v37  ;;  %v3448_v52 = vsel %vm1136_vm7, %v3441_v40, %v3442_v41  ;;  %v3457_v43 = vmul.f32 %v3409_v17, %v6909_v56  ;;  %v3458_v14 = vmul.f32 %v3410_v20, %v6940_v19 }
 0x4b4   :  { %v3449_v8 = vsel %vm1138_vm10, %v3447_v25, %v3448_v52  ;;  %v3450_v44 = vsel %vm3396_vm0, %v3443_v39, %v3444_v22  ;;  %v3451_v45 = vsel %vm3398_vm9, %v3445_v60, %v3446_v7  ;;  %v3459_v50 = vmul.f32 %v3411_v53, %v6982_v23 }
 0x4b5   :  { %v3452_v46 = vsel %vm3400_vm11, %v3450_v44, %v3451_v45  ;;  %v3460_v47 = vmul.f32 %v3412_v27, %v6994_v24  ;;  %v3461_v51 = vmul.f32 %v3413_v29, %v7011_v55  ;;  %v3462_v19 = vmul.f32 %v3414_v32, %v7023_v35 }
 0x4b6   :  { %v3453_v3 = vsel %vm3402_vm12, %v3449_v8, %v3452_v46  ;;  %v3463_v54 = vmul.f32 %v3415_v30, %v7038_v28 }
 0x4b7   :  { %v3455_v56 = vsub.f32 %v3406_v61, %v3453_v3 }
 0x4b9   :  { %v3465_v57 = vperm.slane %v3455_v56, 0  ;;  %v3466_v58 = vperm.slane %v3455_v56, 1  ;;  %v3467_v59 = vperm.slane %v3455_v56, 2  ;;  %v3468_v62 = vperm.slane %v3455_v56, 3 }
 0x4ba   :  { %v3469_v63 = vperm.slane %v3455_v56, 4  ;;  %v3470_v0 = vperm.slane %v3455_v56, 5  ;;  %v3471_v23 = vperm.slane %v3455_v56, 6  ;;  %v3472_v1 = vperm.slane %v3455_v56, 7 }
 0x4bb   :  { %v3481_v4 = vadd.f32 %v3465_v57, %v3456_v42  ;;  %v3482_v5 = vadd.f32 %v3466_v58, %v3457_v43  ;;  %v3483_v24 = vadd.f32 %v3467_v59, %v3458_v14  ;;  %v3484_v38 = vadd.f32 %v3468_v62, %v3459_v50 }
 0x4bc   :  { %v3485_v55 = vadd.f32 %v3469_v63, %v3460_v47  ;;  %v3486_v49 = vadd.f32 %v3470_v0, %v3461_v51  ;;  %v3487_v33 = vadd.f32 %v3471_v23, %v3462_v19  ;;  %v3488_v6 = vadd.f32 %v3472_v1, %v3463_v54 }
 0x4bd   :  { %v3489_v48 = vmul.f32 0.2, %v3481_v4  ;;  %v3490_v35 = vmul.f32 0.2, %v3482_v5  ;;  %v3491_v10 = vmul.f32 0.2, %v3483_v24 }
 0x4be   :  { %v3492_v28 = vmul.f32 0.2, %v3484_v38  ;;  %v3493_v11 = vmul.f32 0.2, %v3485_v55  ;;  %v3494_v13 = vmul.f32 0.2, %v3486_v49 }
 0x4bf   :  { %v3495_v15 = vmul.f32 0.2, %v3487_v33  ;;  %v3496_v16 = vmul.f32 0.2, %v3488_v6  ;;  %v7073_v9 = vmax.f32 %v3481_v4, %v3489_v48  ;;  %v7075_v17 = vmax.f32 %v3482_v5, %v3490_v35 }
 0x4c0   :  { %v7077_v20 = vmax.f32 %v3483_v24, %v3491_v10  ;;  %v7079_v53 = vmax.f32 %v3484_v38, %v3492_v28  ;;  %v7081_v27 = vmax.f32 %v3485_v55, %v3493_v11  ;;  %v7083_v29 = vmax.f32 %v3486_v49, %v3494_v13 }
 0x4c1   :  { %v7085_v32 = vmax.f32 %v3487_v33, %v3495_v15  ;;  %v7087_v30 = vmax.f32 %v3488_v6, %v3496_v16 }
 0x4c2   :  { %6560 = dma.done.wait [#allocation4 + $0x1], 8192 }
 0x4c3   :  { %6561 = vsyncadd [#allocation4 + $0x1], 4294959104  ;;  %v6120_v26 = vld [vmem:[#allocation3 + $0x38] sm:$0xff]  ;;  %v6119_v21 = vld [vmem:[#allocation3 + $0x30] sm:$0xff]  ;;  %v3511_v63 = vpack.c.bf16 %v7077_v20, %v7077_v20  ;;  %v3509_v0 = vpack.c.bf16 %v7073_v9, %v7073_v9  ;;  %v3512_v23 = vpack.c.bf16 %v7079_v53, %v7079_v53  ;;  %v3510_v1 = vpack.c.bf16 %v7075_v17, %v7075_v17 }
 0x4c4   :  { %v6128_v12 = vld [vmem:[#allocation3 + $0x78] sm:$0xff]  ;;  %4033 = vmatpush.bf16.msrb.mxu0 %v6120_v26  ;;  %v6127_v36 = vld [vmem:[#allocation3 + $0x70] sm:$0xff]  ;;  %v6118_v37 = vld [vmem:[#allocation3 + $0x28] sm:$0xff] }
 0x4c5   :  { %v6136_v18 = vld [vmem:[#allocation3 + $0xb8] sm:$0xff]  ;;  %4046 = vmatpush.bf16.msrb.mxu1 %v6128_v12  ;;  %v6135_v31 = vld [vmem:[#allocation3 + $0xb0] sm:$0xff]  ;;  %v6126_v40 = vld [vmem:[#allocation3 + $0x68] sm:$0xff] }
 0x4c6   :  { %v6144_v2 = vld [vmem:[#allocation3 + $0xf8] sm:$0xff]  ;;  %4059 = vmatpush.bf16.msrb.mxu2 %v6136_v18  ;;  %v6143_v34 = vld [vmem:[#allocation3 + $0xf0] sm:$0xff]  ;;  %v6134_v41 = vld [vmem:[#allocation3 + $0xa8] sm:$0xff] }
 0x4c7   :  { %4072 = vmatpush.bf16.msrb.mxu3 %v6144_v2  ;;  %v6142_v42 = vld [vmem:[#allocation3 + $0xe8] sm:$0xff]  ;;  %v6117_v39 = vld [vmem:[#allocation3 + $0x20] sm:$0xff]  ;;  %v6116_v25 = vld [vmem:[#allocation3 + $0x18] sm:$0xff] }
 0x4c8   :  { %4034 = vmatpush.bf16.msrb.mxu0 %v6119_v21  ;;  %v6125_v22 = vld [vmem:[#allocation3 + $0x60] sm:$0xff]  ;;  %v6124_v52 = vld [vmem:[#allocation3 + $0x58] sm:$0xff]  ;;  %v6115_v61 = vld [vmem:[#allocation3 + $0x10] sm:$0xff] }
 0x4c9   :  { %4047 = vmatpush.bf16.msrb.mxu1 %v6127_v36  ;;  %v6133_v60 = vld [vmem:[#allocation3 + $0xa0] sm:$0xff]  ;;  %v6132_v43 = vld [vmem:[#allocation3 + $0x98] sm:$0xff]  ;;  %v6123_v8 = vld [vmem:[#allocation3 + $0x50] sm:$0xff] }
 0x4ca   :  { %4060 = vmatpush.bf16.msrb.mxu2 %v6135_v31  ;;  %v6141_v7 = vld [vmem:[#allocation3 + $0xe0] sm:$0xff]  ;;  %v6140_v14 = vld [vmem:[#allocation3 + $0xd8] sm:$0xff]  ;;  %v6131_v44 = vld [vmem:[#allocation3 + $0x90] sm:$0xff] }
 0x4cb   :  { %4073 = vmatpush.bf16.msrb.mxu3 %v6143_v34  ;;  %v6139_v45 = vld [vmem:[#allocation3 + $0xd0] sm:$0xff]  ;;  %v6114_v50 = vld [vmem:[#allocation3 + $0x8] sm:$0xff]  ;;  %v6113_v3 = vld [vmem:[#allocation3] sm:$0xff] }
 0x4cc   :  { %4035 = vmatpush.bf16.msrb.mxu0 %v6118_v37  ;;  %v6122_v46 = vld [vmem:[#allocation3 + $0x48] sm:$0xff]  ;;  %v6121_v56 = vld [vmem:[#allocation3 + $0x40] sm:$0xff]  ;;  %v6152_v57 = vld [vmem:[#allocation3 + $0x138] sm:$0xff]  ;;  %v3513_v37 = vpack.c.bf16 %v7081_v27, %v7081_v27 }
 0x4cd   :  { %4048 = vmatpush.bf16.msrb.mxu1 %v6126_v40  ;;  %v6130_v47 = vld [vmem:[#allocation3 + $0x88] sm:$0xff]  ;;  %v6129_v19 = vld [vmem:[#allocation3 + $0x80] sm:$0xff]  ;;  %v6160_v58 = vld [vmem:[#allocation3 + $0x178] sm:$0xff]  ;;  %v3514_v40 = vpack.c.bf16 %v7083_v29, %v7083_v29 }
 0x4ce   :  { %4061 = vmatpush.bf16.msrb.mxu2 %v6134_v41  ;;  %v6138_v51 = vld [vmem:[#allocation3 + $0xc8] sm:$0xff]  ;;  %v6137_v54 = vld [vmem:[#allocation3 + $0xc0] sm:$0xff]  ;;  %v6168_v59 = vld [vmem:[#allocation3 + $0x1b8] sm:$0xff]  ;;  %v3515_v41 = vpack.c.bf16 %v7085_v32, %v7085_v32 }
 0x4cf   :  { %4074 = vmatpush.bf16.msrb.mxu3 %v6142_v42  ;;  %v6176_v62 = vld [vmem:[#allocation3 + $0x1f8] sm:$0xff]  ;;  %v6151_v4 = vld [vmem:[#allocation3 + $0x130] sm:$0xff]  ;;  %v6150_v55 = vld [vmem:[#allocation3 + $0x128] sm:$0xff]  ;;  %v3516_v42 = vpack.c.bf16 %v7087_v30, %v7087_v30 }
 0x4d0   :  { %4036 = vmatpush.bf16.msrb.mxu0 %v6117_v39  ;;  %v6159_v5 = vld [vmem:[#allocation3 + $0x170] sm:$0xff]  ;;  %v6158_v49 = vld [vmem:[#allocation3 + $0x168] sm:$0xff]  ;;  %v6149_v48 = vld [vmem:[#allocation3 + $0x120] sm:$0xff] }
 0x4d1   :  { %4049 = vmatpush.bf16.msrb.mxu1 %v6125_v22  ;;  %v6167_v24 = vld [vmem:[#allocation3 + $0x1b0] sm:$0xff]  ;;  %v6166_v33 = vld [vmem:[#allocation3 + $0x1a8] sm:$0xff]  ;;  %v6157_v35 = vld [vmem:[#allocation3 + $0x160] sm:$0xff] }
 0x4d2   :  { %4062 = vmatpush.bf16.msrb.mxu2 %v6133_v60  ;;  %v6175_v38 = vld [vmem:[#allocation3 + $0x1f0] sm:$0xff]  ;;  %v6174_v6 = vld [vmem:[#allocation3 + $0x1e8] sm:$0xff]  ;;  %v6165_v10 = vld [vmem:[#allocation3 + $0x1a0] sm:$0xff] }
 0x4d3   :  { %4075 = vmatpush.bf16.msrb.mxu3 %v6141_v7  ;;  %v6173_v28 = vld [vmem:[#allocation3 + $0x1e0] sm:$0xff]  ;;  %v6148_v11 = vld [vmem:[#allocation3 + $0x118] sm:$0xff]  ;;  %v6147_v9 = vld [vmem:[#allocation3 + $0x110] sm:$0xff] }
 0x4d4   :  { %4037 = vmatpush.bf16.msrb.mxu0 %v6116_v25  ;;  %v6156_v13 = vld [vmem:[#allocation3 + $0x158] sm:$0xff]  ;;  %v6155_v17 = vld [vmem:[#allocation3 + $0x150] sm:$0xff]  ;;  %v6146_v26 = vld [vmem:[#allocation3 + $0x108] sm:$0xff] }
 0x4d5   :  { %4050 = vmatpush.bf16.msrb.mxu1 %v6124_v52  ;;  %v6164_v15 = vld [vmem:[#allocation3 + $0x198] sm:$0xff]  ;;  %v6163_v20 = vld [vmem:[#allocation3 + $0x190] sm:$0xff]  ;;  %v6154_v12 = vld [vmem:[#allocation3 + $0x148] sm:$0xff] }
 0x4d6   :  { %4063 = vmatpush.bf16.msrb.mxu2 %v6132_v43  ;;  %v6172_v16 = vld [vmem:[#allocation3 + $0x1d8] sm:$0xff]  ;;  %v6171_v53 = vld [vmem:[#allocation3 + $0x1d0] sm:$0xff]  ;;  %v6162_v18 = vld [vmem:[#allocation3 + $0x188] sm:$0xff] }
 0x4d7   :  { %4076 = vmatpush.bf16.msrb.mxu3 %v6140_v14  ;;  %v6170_v2 = vld [vmem:[#allocation3 + $0x1c8] sm:$0xff]  ;;  %v6145_v21 = vld [vmem:[#allocation3 + $0x100] sm:$0xff] }
 0x4d8   :  { %4038 = vmatpush.bf16.msrb.mxu0 %v6115_v61  ;;  %v6153_v36 = vld [vmem:[#allocation3 + $0x140] sm:$0xff] }
 0x4d9   :  { %4051 = vmatpush.bf16.msrb.mxu1 %v6123_v8  ;;  %v6161_v31 = vld [vmem:[#allocation3 + $0x180] sm:$0xff] }
 0x4da   :  { %4064 = vmatpush.bf16.msrb.mxu2 %v6131_v44  ;;  %v6169_v34 = vld [vmem:[#allocation3 + $0x1c0] sm:$0xff] }
 0x4db   :  { %4077 = vmatpush.bf16.msrb.mxu3 %v6139_v45  ;;  %v6231_v25 = vld [vmem:[#allocation21] ss:$0 sm:$0xff] }
 0x4dc   :  { %4039 = vmatpush.bf16.msrb.mxu0 %v6114_v50 }
 0x4dd   :  { %4052 = vmatpush.bf16.msrb.mxu1 %v6122_v46 }
 0x4de   :  { %4065 = vmatpush.bf16.msrb.mxu2 %v6130_v47 }
 0x4df   :  { %4078 = vmatpush.bf16.msrb.mxu3 %v6138_v51 }
 0x4e0   :  { %4040 = vmatpush.bf16.msrb.mxu0 %v6113_v3 }
 0x4e1   :  { %4053 = vmatpush.bf16.msrb.mxu1 %v6121_v56 }
 0x4e2   :  { %4066 = vmatpush.bf16.msrb.mxu2 %v6129_v19 }
 0x4e3   :  { %4079 = vmatpush.bf16.msrb.mxu3 %v6137_v54  ;;  %4041 = vmatmul.bf16.vlgmr.msrb.gmra.mxu0 %v3509_v0 }
 0x4e4   :  { %4085 = vmatpush.bf16.msra.mxu0 %v6152_v57  ;;  %4054 = vmatmul.bf16.vlgmr.msrb.gmra.mxu1 %v3510_v1 }
 0x4e5   :  { %4098 = vmatpush.bf16.msra.mxu1 %v6160_v58  ;;  %4067 = vmatmul.bf16.vlgmr.msrb.gmra.mxu2 %v3511_v63 }
 0x4e6   :  { %4111 = vmatpush.bf16.msra.mxu2 %v6168_v59  ;;  %4080 = vmatmul.bf16.vlgmr.msrb.gmra.mxu3 %v3512_v23 }
 0x4e7   :  { %4124 = vmatpush.bf16.msra.mxu3 %v6176_v62 }
 0x4e8   :  { %4086 = vmatpush.bf16.msra.mxu0 %v6151_v4 }
 0x4e9   :  { %4099 = vmatpush.bf16.msra.mxu1 %v6159_v5 }
 0x4ea   :  { %4112 = vmatpush.bf16.msra.mxu2 %v6167_v24 }
 0x4eb   :  { %4125 = vmatpush.bf16.msra.mxu3 %v6175_v38 }
 0x4ec   :  { %4087 = vmatpush.bf16.msra.mxu0 %v6150_v55 }
 0x4ed   :  { %4100 = vmatpush.bf16.msra.mxu1 %v6158_v49 }
 0x4ee   :  { %4113 = vmatpush.bf16.msra.mxu2 %v6166_v33 }
 0x4ef   :  { %4126 = vmatpush.bf16.msra.mxu3 %v6174_v6 }
 0x4f0   :  { %4088 = vmatpush.bf16.msra.mxu0 %v6149_v48 }
 0x4f1   :  { %4101 = vmatpush.bf16.msra.mxu1 %v6157_v35 }
 0x4f2   :  { %4114 = vmatpush.bf16.msra.mxu2 %v6165_v10 }
 0x4f3   :  { %4127 = vmatpush.bf16.msra.mxu3 %v6173_v28 }
 0x4f4   :  { %4089 = vmatpush.bf16.msra.mxu0 %v6148_v11 }
 0x4f5   :  { %4102 = vmatpush.bf16.msra.mxu1 %v6156_v13 }
 0x4f6   :  { %4115 = vmatpush.bf16.msra.mxu2 %v6164_v15 }
 0x4f7   :  { %4128 = vmatpush.bf16.msra.mxu3 %v6172_v16 }
 0x4f8   :  { %4090 = vmatpush.bf16.msra.mxu0 %v6147_v9 }
 0x4f9   :  { %4103 = vmatpush.bf16.msra.mxu1 %v6155_v17 }
 0x4fa   :  { %4116 = vmatpush.bf16.msra.mxu2 %v6163_v20 }
 0x4fb   :  { %4129 = vmatpush.bf16.msra.mxu3 %v6171_v53 }
 0x4fc   :  { %4091 = vmatpush.bf16.msra.mxu0 %v6146_v26 }
 0x4fd   :  { %4104 = vmatpush.bf16.msra.mxu1 %v6154_v12 }
 0x4fe   :  { %4117 = vmatpush.bf16.msra.mxu2 %v6162_v18 }
 0x4ff   :  { %4130 = vmatpush.bf16.msra.mxu3 %v6170_v2 }
 0x500   :  { %4092 = vmatpush.bf16.msra.mxu0 %v6145_v21 }
 0x501   :  { %4105 = vmatpush.bf16.msra.mxu1 %v6153_v36 }
 0x502   :  { %4118 = vmatpush.bf16.msra.mxu2 %v6161_v31 }
 0x503   :  { %4131 = vmatpush.bf16.msra.mxu3 %v6169_v34  ;;  %4093 = vmatmul.bf16.vlgmr.msra.gmra.mxu0 %v3513_v37 }
 0x504   :  { %4106 = vmatmul.bf16.vlgmr.msra.gmra.mxu1 %v3514_v40 }
 0x505   :  { %4119 = vmatmul.bf16.vlgmr.msra.gmra.mxu2 %v3515_v41 }
 0x506   :  { %4132 = vmatmul.bf16.vlgmr.msra.gmra.mxu3 %v3516_v42 }
 0x560   :  { %v4042_v39 = vpop.f32.mrf.mxu0 }
 0x561   :  { %v4055_v22 = vpop.f32.mrf.mxu1  ;;  %v4043_v14 = vadd.f32 %v6231_v25, %v4042_v39 }
 0x563   :  { %v4056_v32 = vadd.f32 %v4055_v22, %v4043_v14 }
 0x568   :  { %v4068_v27 = vpop.f32.mrf.mxu2  ;;  %v4044_v7 = vpop.f32.mrf.mxu0 }
 0x569   :  { %v4081_v60 = vpop.f32.mrf.mxu3  ;;  %v4057_v29 = vpop.f32.mrf.mxu1  ;;  %v4069_v61 = vadd.f32 %v4068_v27, %v4056_v32 }
 0x56b   :  { %v4082_v8 = vadd.f32 %v4081_v60, %v4069_v61 }
 0x570   :  { %v4070_v52 = vpop.f32.mrf.mxu2 }
 0x571   :  { %v4083_v43 = vpop.f32.mrf.mxu3 }
 0x580   :  { %v4094_v30 = vpop.f32.mrf.mxu0 }
 0x581   :  { %v4107_v44 = vpop.f32.mrf.mxu1  ;;  %v4095_v45 = vadd.f32 %v4094_v30, %v4082_v8 }
 0x583   :  { %v4108_v50 = vadd.f32 %v4107_v44, %v4095_v45 }
 0x588   :  { %v4120_v46 = vpop.f32.mrf.mxu2  ;;  %v4096_v3 = vpop.f32.mrf.mxu0 }
 0x589   :  { %v4133_v47 = vpop.f32.mrf.mxu3  ;;  %v4121_v51 = vadd.f32 %v4120_v46, %v4108_v50  ;;  %v4109_v56 = vpop.f32.mrf.mxu1 }
 0x58b   :  { %v4134_v19 = vadd.f32 %v4133_v47, %v4121_v51 }
 0x58d   :  { %6232 = vtanh.f32 %v4134_v19 }
 0x590   :  { %v4122_v54 = vpop.f32.mrf.mxu2 }
 0x591   :  { %v4135_v57 = vpop.f32.mrf.mxu3 }
 0x593   :  { %v6233_v58 = vpop.eup %6232 }
 0x594   :  { %4138 = vst [vmem:[%s7124_s16] sm:$0xff] %v6233_v58 }
 0x595   :  { %4143 = vsyncpa [#allocation6], 1 }
 0x596   :  { %4144 = vsyncpa [#allocation8], 1 }
 0x597   :  { %4145 = vsyncpa [#allocation11], 1 }
 0x598   :  { %4146 = vsyncpa [#allocation14], 1 }
 0x599   :  { %4147 = vsyncpa [#allocation17], 1 }
 0x59a   :  { %4148 = vsyncpa [#allocation20], 1 }
 0x59b   :  { %4149 = vsyncmov [#allocation4] }
 0x59e   :  { %s4150_s0 = vpop.sfrf %4149 }
 0x59f   :  { %p5773_p0 = scmp.ne.s32.totalorder %s4150_s0, 0 }
 0x5a1   :  { %4154 = shalt.err (%p5773_p0)  }
 0x5a2   :  { %4156 = vsyncmov [#allocation4 + $0x1] }
 0x5a5   :  { %s4157_s17 = vpop.sfrf %4156 }
 0x5a6   :  { %p5774_p1 = scmp.ne.s32.totalorder %s4157_s17, 0 }
 0x5a8   :  { %4161 = shalt.err (%p5774_p1)  }

</bundles_post_ra>
